<compile_context>
chip_gen: v6e
topology: v6e:2x2x1
jax: 0.10.0
libtpu: 0.0.40
codegen_flags: <defaults>
</compile_context>

<pallas_src>
import functools

import jax
import jax.numpy as jnp
from jax import lax
from jax.experimental import pallas as pl
from jax.experimental.pallas import tpu as pltpu

EXPANSION = 4
BN_EPS = 1e-5


# ------------------------------- Pallas kernel ------------------------------ #

def _bottleneck_kernel(x_ref, w1_ref, b1_ref, w2_ref, b2_ref, w3_ref, b3_ref,
                       *rest, H, W, Ho, Wo, P, Cout, stride, identity):
    if identity:
        o_ref, h1p_ref = rest
        ws = bs = None
    else:
        ws_ref, bs_ref, o_ref, h1p_ref = rest
        ws = ws_ref[...]                      # (Cin, Cout) bf16
        bs = bs_ref[...]                      # (1, Cout)   f32

    # Hoist all weight / bias loads out of the row loops.
    w1 = w1_ref[...]                          # (Cin, P)    bf16
    b1 = b1_ref[...]                          # (1, P)      f32
    w2 = w2_ref[...]                          # (9P, P)     bf16
    b2 = b2_ref[...]                          # (1, P)      f32
    w3 = w3_ref[...]                          # (P, Cout)   bf16
    b3 = b3_ref[...]                          # (1, Cout)   f32

    # ---- conv1 (1x1) + folded BN1 + ReLU -> zero-padded fp32 VMEM scratch ----
    h1p_ref[...] = jnp.zeros((H + 2, W + 2, P), dtype=h1p_ref.dtype)
    for h in range(H):
        y = jnp.dot(x_ref[0, h], w1, preferred_element_type=jnp.float32)   # (W, P)
        h1p_ref[h + 1, pl.ds(1, W), :] = jnp.maximum(y + b1, 0.0)

    # Exact 0/1 subsampling operators for stride > 1 (tiny MXU ops; avoids strided loads
    # and avoids materializing any subsampled activations in HBM).
    if stride > 1:
        oi = lax.broadcasted_iota(jnp.int32, (Wo, W + 2), 0)
        ci = lax.broadcasted_iota(jnp.int32, (Wo, W + 2), 1)
        sel_tap = [(ci == stride * oi + kw).astype(jnp.float32) for kw in range(3)]
        oix = lax.broadcasted_iota(jnp.int32, (Wo, W), 0)
        cix = lax.broadcasted_iota(jnp.int32, (Wo, W), 1)
        sel_x = (cix == stride * oix).astype(jnp.bfloat16)

    # ---- per output row: conv2 (3x3) + BN2 + ReLU, conv3 (1x1) + BN3, shortcut, ReLU ----
    for ho in range(Ho):
        taps = []
        for kh in range(3):
            r = stride * ho + kh                                            # static int
            if stride == 1:
                for kw in range(3):
                    taps.append(h1p_ref[r, pl.ds(kw, Wo), :])               # (Wo, P) f32
            else:
                row = h1p_ref[r]                                            # (W+2, P) f32
                for kw in range(3):
                    taps.append(jnp.dot(sel_tap[kw], row,
                                        preferred_element_type=jnp.float32))
        cols = jnp.concatenate(taps, axis=-1).astype(jnp.bfloat16)          # (Wo, 9P)
        h2 = jnp.dot(cols, w2, preferred_element_type=jnp.float32)          # (Wo, P)
        h2 = jnp.maximum(h2 + b2, 0.0).astype(jnp.bfloat16)

        y = jnp.dot(h2, w3, preferred_element_type=jnp.float32) + b3        # (Wo, Cout)
        if identity:
            y = y + x_ref[0, ho].astype(jnp.float32)
        else:
            if stride == 1:
                xrow = x_ref[0, ho]                                         # (Wo, Cin) bf16
            else:
                xrow = jnp.dot(sel_x, x_ref[0, stride * ho],
                               preferred_element_type=jnp.float32).astype(jnp.bfloat16)
            y = y + jnp.dot(xrow, ws, preferred_element_type=jnp.float32) + bs
        o_ref[0, pl.ds(ho * Wo, Wo), :] = jnp.maximum(y, 0.0).astype(o_ref.dtype)


# -------------------------------- glue helpers ------------------------------ #

def fold_bn(gamma, beta, mean, var, eps=BN_EPS):
    scale = gamma / jnp.sqrt(var + eps)
    bias = beta - mean * scale
    return scale, bias


# ----------------------------- bottleneck forward ---------------------------- #

def ara_bottleneck_forward(x_nchw, ara, params, *, in_planes, planes, stride):
    """Pallas implementation of ARA_Bottleneck.forward (non-actnn, distribute=False)."""
    N, Cin, H, W = x_nchw.shape
    assert Cin == in_planes
    P = planes
    Cout = EXPANSION * planes
    Ho = (H + 2 - 3) // stride + 1
    Wo = (W + 2 - 3) // stride + 1
    identity = (stride == 1 and in_planes == Cout)

    x = jnp.transpose(x_nchw, (0, 2, 3, 1)).astype(jnp.bfloat16)            # NHWC bf16

    s1, b1 = fold_bn(*params["bn1"])
    s2, b2 = fold_bn(*params["bn2"])
    s3, b3 = fold_bn(*params["bn3"])

    # Fold BN scale into weights (fp32 math, then bf16 for the MXU).
    w1f = (params["w1"][:, :, 0, 0] * s1[:, None]).T.astype(jnp.bfloat16)   # (Cin, P)
    w2f = jnp.transpose(params["w2"] * s2[:, None, None, None],
                        (2, 3, 1, 0)).reshape(9 * P, P).astype(jnp.bfloat16)  # (9P, P)
    w3f = (params["w3"][:, :, 0, 0] * s3[:, None]).T.astype(jnp.bfloat16)   # (P, Cout)
    b1v = b1.reshape(1, P).astype(jnp.float32)
    b2v = b2.reshape(1, P).astype(jnp.float32)
    b3v = b3.reshape(1, Cout).astype(jnp.float32)

    inputs = [x, w1f, b1v, w2f, b2v, w3f, b3v]
    in_specs = [
        pl.BlockSpec((1, H, W, Cin), lambda n: (n, 0, 0, 0)),
        pl.BlockSpec((Cin, P), lambda n: (0, 0)),
        pl.BlockSpec((1, P), lambda n: (0, 0)),
        pl.BlockSpec((9 * P, P), lambda n: (0, 0)),
        pl.BlockSpec((1, P), lambda n: (0, 0)),
        pl.BlockSpec((P, Cout), lambda n: (0, 0)),
        pl.BlockSpec((1, Cout), lambda n: (0, 0)),
    ]

    m1, m2 = N * H * W, N * Ho * Wo
    flops = 2 * m1 * Cin * P + 2 * m2 * (9 * P) * P + 2 * m2 * P * Cout
    bytes_accessed = 2 * (x.size + w1f.size + w2f.size + w3f.size) \
        + 4 * (b1v.size + b2v.size + b3v.size) + 2 * m2 * Cout

    if not identity:
        ss, bsb = fold_bn(*params["bns"])
        wsf = (params["ws"][:, :, 0, 0] * ss[:, None]).T.astype(jnp.bfloat16)  # (Cin, Cout)
        bsv = bsb.reshape(1, Cout).astype(jnp.float32)
        inputs += [wsf, bsv]
        in_specs += [pl.BlockSpec((Cin, Cout), lambda n: (0, 0)),
                     pl.BlockSpec((1, Cout), lambda n: (0, 0))]
        flops += 2 * m2 * Cin * Cout
        bytes_accessed += 2 * wsf.size + 4 * bsv.size

    kernel = functools.partial(_bottleneck_kernel, H=H, W=W, Ho=Ho, Wo=Wo,
                               P=P, Cout=Cout, stride=stride, identity=identity)

    out2d = pl.pallas_call(
        kernel,
        out_shape=jax.ShapeDtypeStruct((N, Ho * Wo, Cout), jnp.bfloat16),
        grid=(N,),
        in_specs=in_specs,
        out_specs=pl.BlockSpec((1, Ho * Wo, Cout), lambda n: (n, 0, 0)),
        scratch_shapes=[pltpu.VMEM((H + 2, W + 2, P), jnp.float32)],
        compiler_params=pltpu.CompilerParams(
            dimension_semantics=("parallel",),
            vmem_limit_bytes=32 * 1024 * 1024),
        cost_estimate=pl.CostEstimate(flops=int(flops), transcendentals=0,
                                      bytes_accessed=int(bytes_accessed)),
    )(*inputs)

    out = out2d.reshape(N, Ho, Wo, Cout).astype(jnp.float32)
    out = jnp.transpose(out, (0, 3, 1, 2))                                  # back to NCHW
    return out, ara


# ------------------------------ pure-JAX reference --------------------------- #

def _conv_ref(x, w, stride=1, padding=((0, 0), (0, 0))):
    return lax.conv_general_dilated(
        x, w, window_strides=(stride, stride), padding=padding,
        dimension_numbers=("NCHW", "OIHW", "NCHW"))


def _bn_ref(x, gamma, beta, mean, var, eps=BN_EPS):
    inv = gamma / jnp.sqrt(var + eps)
    return (x - mean[None, :, None, None]) * inv[None, :, None, None] \
        + beta[None, :, None, None]


def ref_forward(x_nchw, params, *, in_planes, planes, stride):
    out = _conv_ref(x_nchw, params["w1"])
    out = jax.nn.relu(_bn_ref(out, *params["bn1"]))
    out = _conv_ref(out, params["w2"], stride=stride, padding=((1, 1), (1, 1)))
    out = jax.nn.relu(_bn_ref(out, *params["bn2"]))
    out = _bn_ref(_conv_ref(out, params["w3"]), *params["bn3"])
    if stride == 1 and in_planes == EXPANSION * planes:
        out = out + x_nchw
    else:
        sc = _conv_ref(x_nchw, params["ws"], stride=stride)
        out = out + _bn_ref(sc, *params["bns"])
    return jax.nn.relu(out)


# ------------------------------------ main ------------------------------------ #

def make_params(key, in_planes, planes):
    C_out = EXPANSION * planes
    ks = jax.random.split(key, 8)

    def bn(k, c):
        k1, k2, k3, k4 = jax.random.split(k, 4)
        gamma = 1.0 + 0.1 * jax.random.normal(k1, (c,), jnp.float32)
        beta = 0.1 * jax.random.normal(k2, (c,), jnp.float32)
        mean = 0.05 * jax.random.normal(k3, (c,), jnp.float32)
        var = 1.0 + 0.1 * jnp.abs(jax.random.normal(k4, (c,), jnp.float32))
        return gamma, beta, mean, var

    return {
        "w1": 0.1 * jax.random.normal(ks[0], (planes, in_planes, 1, 1), jnp.float32),
        "w2": 0.1 * jax.random.normal(ks[1], (planes, planes, 3, 3), jnp.float32),
        "w3": 0.1 * jax.random.normal(ks[2], (C_out, planes, 1, 1), jnp.float32),
        "ws": 0.1 * jax.random.normal(ks[3], (C_out, in_planes, 1, 1), jnp.float32),
        "bn1": bn(ks[4], planes),
        "bn2": bn(ks[5], planes),
        "bn3": bn(ks[6], C_out),
        "bns": bn(ks[7], C_out),
    }


if __name__ == "__main__":
    key = jax.random.PRNGKey(0)
    k_x1, k_x2, k_p1, k_p2, k_ara = jax.random.split(key, 5)

    def q(a):  # round to bf16 precision (the kernel computes its matmuls in bf16)
        return a.astype(jnp.bfloat16).astype(jnp.float32)

    # Case 1: identity shortcut (stride=1, in_planes == 4*planes)
    in_planes1, planes1, stride1 = 32, 8, 1
    x1 = q(jax.random.normal(k_x1, (2, in_planes1, 16, 16), jnp.float32))
    p1 = make_params(k_p1, in_planes1, planes1)

    # Case 2: projection shortcut (stride=2)
    in_planes2, planes2, stride2 = 16, 8, 2
    x2 = q(jax.random.normal(k_x2, (2, in_planes2, 16, 16), jnp.float32))
    p2 = make_params(k_p2, in_planes2, planes2)

    # Both paths (kernel + reference) see bf16-representable weights.
    for p in (p1, p2):
        for name in ("w1", "w2", "w3", "ws"):
            p[name] = q(p[name])

    ara = jax.random.normal(k_ara, (2, 4), jnp.float32)  # opaque aux, passed through

    out1, ara1 = ara_bottleneck_forward(x1, ara, p1, in_planes=in_planes1,
                                        planes=planes1, stride=stride1)
    out2, ara2 = ara_bottleneck_forward(x2, ara, p2, in_planes=in_planes2,
                                        planes=planes2, stride=stride2)
    jax.block_until_ready((out1, out2))

    ref1 = ref_forward(x1, p1, in_planes=in_planes1, planes=planes1, stride=stride1)
    ref2 = ref_forward(x2, p2, in_planes=in_planes2, planes=planes2, stride=stride2)

    assert out1.shape == (2, EXPANSION * planes1, 16, 16)
    assert out2.shape == (2, EXPANSION * planes2, 8, 8)
    # bf16 kernel vs fp32 reference: tolerance sized for bf16 rounding of activations.
    assert jnp.allclose(out1, ref1, rtol=3e-2, atol=3e-2), \
        float(jnp.max(jnp.abs(out1 - ref1)))
    assert jnp.allclose(out2, ref2, rtol=3e-2, atol=3e-2), \
        float(jnp.max(jnp.abs(out2 - ref2)))
    assert jnp.allclose(ara1, ara) and jnp.allclose(ara2, ara)

    print("KERNEL_OK")
</pallas_src>

<mosaic_0001>
module attributes {stable_mosaic.version = 11 : i64} {
  func.func @_bottleneck_kernel(%arg0: i32, %arg1: memref<1x16x16x32xbf16, #tpu.memory_space<vmem>>, %arg2: memref<32x8xbf16, #tpu.memory_space<vmem>>, %arg3: memref<1x8xf32, #tpu.memory_space<vmem>>, %arg4: memref<72x8xbf16, #tpu.memory_space<vmem>>, %arg5: memref<1x8xf32, #tpu.memory_space<vmem>>, %arg6: memref<8x32xbf16, #tpu.memory_space<vmem>>, %arg7: memref<1x32xf32, #tpu.memory_space<vmem>>, %arg8: memref<1x256x32xbf16, #tpu.memory_space<vmem>>, %arg9: memref<18x18x8xf32, #tpu.memory_space<vmem>>) attributes {dimension_semantics = [#tpu.dimension_semantics<parallel>], iteration_bounds = array<i64: 2>, scalar_prefetch = 0 : i64, scratch_operands = 1 : i64, tpu.core_type = #tpu.core_type<tc>, window_params = [{transform_indices = @transform_0, window_bounds = array<i64: 1, 16, 16, 32>}, {pipeline_mode = #tpu.pipeline_mode<synchronous>, transform_indices = @transform_1, window_bounds = array<i64: 32, 8>}, {pipeline_mode = #tpu.pipeline_mode<synchronous>, transform_indices = @transform_2, window_bounds = array<i64: 1, 8>}, {pipeline_mode = #tpu.pipeline_mode<synchronous>, transform_indices = @transform_3, window_bounds = array<i64: 72, 8>}, {pipeline_mode = #tpu.pipeline_mode<synchronous>, transform_indices = @transform_4, window_bounds = array<i64: 1, 8>}, {pipeline_mode = #tpu.pipeline_mode<synchronous>, transform_indices = @transform_5, window_bounds = array<i64: 8, 32>}, {pipeline_mode = #tpu.pipeline_mode<synchronous>, transform_indices = @transform_6, window_bounds = array<i64: 1, 32>}, {transform_indices = @transform_7, window_bounds = array<i64: 1, 256, 32>}]} {
    %c0 = arith.constant 0 : index
    %c0_0 = arith.constant 0 : index
    %0 = vector.load %arg2[%c0, %c0_0] : memref<32x8xbf16, #tpu.memory_space<vmem>>, vector<32x8xbf16>
    %c0_1 = arith.constant 0 : index
    %c0_2 = arith.constant 0 : index
    %1 = vector.load %arg3[%c0_1, %c0_2] : memref<1x8xf32, #tpu.memory_space<vmem>>, vector<1x8xf32>
    %c0_3 = arith.constant 0 : index
    %c0_4 = arith.constant 0 : index
    %2 = vector.load %arg4[%c0_3, %c0_4] : memref<72x8xbf16, #tpu.memory_space<vmem>>, vector<72x8xbf16>
    %c0_5 = arith.constant 0 : index
    %c0_6 = arith.constant 0 : index
    %3 = vector.load %arg5[%c0_5, %c0_6] : memref<1x8xf32, #tpu.memory_space<vmem>>, vector<1x8xf32>
    %c0_7 = arith.constant 0 : index
    %c0_8 = arith.constant 0 : index
    %4 = vector.load %arg6[%c0_7, %c0_8] : memref<8x32xbf16, #tpu.memory_space<vmem>>, vector<8x32xbf16>
    %c0_9 = arith.constant 0 : index
    %c0_10 = arith.constant 0 : index
    %5 = vector.load %arg7[%c0_9, %c0_10] : memref<1x32xf32, #tpu.memory_space<vmem>>, vector<1x32xf32>
    %cst = arith.constant 0.000000e+00 : f32
    %6 = vector.broadcast %cst : f32 to vector<18x18x8xf32>
    %c0_11 = arith.constant 0 : index
    %c0_12 = arith.constant 0 : index
    %c0_13 = arith.constant 0 : index
    %7 = vector.load %arg9[%c0_11, %c0_12, %c0_13] : memref<18x18x8xf32, #tpu.memory_space<vmem>>, vector<18x18x8xf32>
    tpu.vector_store %arg9[%c0_11, %c0_12, %c0_13], %6 {strides = array<i32>} : memref<18x18x8xf32, #tpu.memory_space<vmem>>, vector<18x18x8xf32>,
    %c0_14 = arith.constant 0 : index
    %c0_15 = arith.constant 0 : index
    %c0_16 = arith.constant 0 : index
    %c0_17 = arith.constant 0 : index
    %8 = vector.load %arg1[%c0_14, %c0_15, %c0_16, %c0_17] : memref<1x16x16x32xbf16, #tpu.memory_space<vmem>>, vector<1x1x16x32xbf16>
    %9 = vector.shape_cast %8 : vector<1x1x16x32xbf16> to vector<16x32xbf16>
    %cst_18 = arith.constant dense<0.000000e+00> : vector<16x8xf32>
    %10 = tpu.matmul %9, %0, %cst_18 {dimension_numbers = #tpu.dot_dimension_numbers<[1], [0], [0], [1], [0, 0, 1, 1], [], []>} : vector<16x32xbf16>, vector<32x8xbf16>, vector<16x8xf32> -> vector<16x8xf32>
    %11 = vector.broadcast %1 : vector<1x8xf32> to vector<16x8xf32>
    %12 = arith.addf %10, %11 : vector<16x8xf32>
    %cst_19 = arith.constant 0.000000e+00 : f32
    %13 = vector.broadcast %cst_19 : f32 to vector<16x8xf32>
    %14 = arith.maximumf %12, %13 : vector<16x8xf32>
    %c1 = arith.constant 1 : index
    %c1_20 = arith.constant 1 : index
    %c0_21 = arith.constant 0 : index
    %15 = vector.load %arg9[%c1, %c1_20, %c0_21] : memref<18x18x8xf32, #tpu.memory_space<vmem>>, vector<1x16x8xf32>
    %16 = vector.shape_cast %15 : vector<1x16x8xf32> to vector<16x8xf32>
    %17 = vector.shape_cast %14 : vector<16x8xf32> to vector<1x16x8xf32>
    tpu.vector_store %arg9[%c1, %c1_20, %c0_21], %17 {strides = array<i32>} : memref<18x18x8xf32, #tpu.memory_space<vmem>>, vector<1x16x8xf32>,
    %c0_22 = arith.constant 0 : index
    %c1_23 = arith.constant 1 : index
    %c0_24 = arith.constant 0 : index
    %c0_25 = arith.constant 0 : index
    %18 = vector.load %arg1[%c0_22, %c1_23, %c0_24, %c0_25] : memref<1x16x16x32xbf16, #tpu.memory_space<vmem>>, vector<1x1x16x32xbf16>
    %19 = vector.shape_cast %18 : vector<1x1x16x32xbf16> to vector<16x32xbf16>
    %cst_26 = arith.constant dense<0.000000e+00> : vector<16x8xf32>
    %20 = tpu.matmul %19, %0, %cst_26 {dimension_numbers = #tpu.dot_dimension_numbers<[1], [0], [0], [1], [0, 0, 1, 1], [], []>} : vector<16x32xbf16>, vector<32x8xbf16>, vector<16x8xf32> -> vector<16x8xf32>
    %21 = vector.broadcast %1 : vector<1x8xf32> to vector<16x8xf32>
    %22 = arith.addf %20, %21 : vector<16x8xf32>
    %cst_27 = arith.constant 0.000000e+00 : f32
    %23 = vector.broadcast %cst_27 : f32 to vector<16x8xf32>
    %24 = arith.maximumf %22, %23 : vector<16x8xf32>
    %c2 = arith.constant 2 : index
    %c1_28 = arith.constant 1 : index
    %c0_29 = arith.constant 0 : index
    %25 = vector.load %arg9[%c2, %c1_28, %c0_29] : memref<18x18x8xf32, #tpu.memory_space<vmem>>, vector<1x16x8xf32>
    %26 = vector.shape_cast %25 : vector<1x16x8xf32> to vector<16x8xf32>
    %27 = vector.shape_cast %24 : vector<16x8xf32> to vector<1x16x8xf32>
    tpu.vector_store %arg9[%c2, %c1_28, %c0_29], %27 {strides = array<i32>} : memref<18x18x8xf32, #tpu.memory_space<vmem>>, vector<1x16x8xf32>,
    %c0_30 = arith.constant 0 : index
    %c2_31 = arith.constant 2 : index
    %c0_32 = arith.constant 0 : index
    %c0_33 = arith.constant 0 : index
    %28 = vector.load %arg1[%c0_30, %c2_31, %c0_32, %c0_33] : memref<1x16x16x32xbf16, #tpu.memory_space<vmem>>, vector<1x1x16x32xbf16>
    %29 = vector.shape_cast %28 : vector<1x1x16x32xbf16> to vector<16x32xbf16>
    %cst_34 = arith.constant dense<0.000000e+00> : vector<16x8xf32>
    %30 = tpu.matmul %29, %0, %cst_34 {dimension_numbers = #tpu.dot_dimension_numbers<[1], [0], [0], [1], [0, 0, 1, 1], [], []>} : vector<16x32xbf16>, vector<32x8xbf16>, vector<16x8xf32> -> vector<16x8xf32>
    %31 = vector.broadcast %1 : vector<1x8xf32> to vector<16x8xf32>
    %32 = arith.addf %30, %31 : vector<16x8xf32>
    %cst_35 = arith.constant 0.000000e+00 : f32
    %33 = vector.broadcast %cst_35 : f32 to vector<16x8xf32>
    %34 = arith.maximumf %32, %33 : vector<16x8xf32>
    %c3 = arith.constant 3 : index
    %c1_36 = arith.constant 1 : index
    %c0_37 = arith.constant 0 : index
    %35 = vector.load %arg9[%c3, %c1_36, %c0_37] : memref<18x18x8xf32, #tpu.memory_space<vmem>>, vector<1x16x8xf32>
    %36 = vector.shape_cast %35 : vector<1x16x8xf32> to vector<16x8xf32>
    %37 = vector.shape_cast %34 : vector<16x8xf32> to vector<1x16x8xf32>
    tpu.vector_store %arg9[%c3, %c1_36, %c0_37], %37 {strides = array<i32>} : memref<18x18x8xf32, #tpu.memory_space<vmem>>, vector<1x16x8xf32>,
    %c0_38 = arith.constant 0 : index
    %c3_39 = arith.constant 3 : index
    %c0_40 = arith.constant 0 : index
    %c0_41 = arith.constant 0 : index
    %38 = vector.load %arg1[%c0_38, %c3_39, %c0_40, %c0_41] : memref<1x16x16x32xbf16, #tpu.memory_space<vmem>>, vector<1x1x16x32xbf16>
    %39 = vector.shape_cast %38 : vector<1x1x16x32xbf16> to vector<16x32xbf16>
    %cst_42 = arith.constant dense<0.000000e+00> : vector<16x8xf32>
    %40 = tpu.matmul %39, %0, %cst_42 {dimension_numbers = #tpu.dot_dimension_numbers<[1], [0], [0], [1], [0, 0, 1, 1], [], []>} : vector<16x32xbf16>, vector<32x8xbf16>, vector<16x8xf32> -> vector<16x8xf32>
    %41 = vector.broadcast %1 : vector<1x8xf32> to vector<16x8xf32>
    %42 = arith.addf %40, %41 : vector<16x8xf32>
    %cst_43 = arith.constant 0.000000e+00 : f32
    %43 = vector.broadcast %cst_43 : f32 to vector<16x8xf32>
    %44 = arith.maximumf %42, %43 : vector<16x8xf32>
    %c4 = arith.constant 4 : index
    %c1_44 = arith.constant 1 : index
    %c0_45 = arith.constant 0 : index
    %45 = vector.load %arg9[%c4, %c1_44, %c0_45] : memref<18x18x8xf32, #tpu.memory_space<vmem>>, vector<1x16x8xf32>
    %46 = vector.shape_cast %45 : vector<1x16x8xf32> to vector<16x8xf32>
    %47 = vector.shape_cast %44 : vector<16x8xf32> to vector<1x16x8xf32>
    tpu.vector_store %arg9[%c4, %c1_44, %c0_45], %47 {strides = array<i32>} : memref<18x18x8xf32, #tpu.memory_space<vmem>>, vector<1x16x8xf32>,
    %c0_46 = arith.constant 0 : index
    %c4_47 = arith.constant 4 : index
    %c0_48 = arith.constant 0 : index
    %c0_49 = arith.constant 0 : index
    %48 = vector.load %arg1[%c0_46, %c4_47, %c0_48, %c0_49] : memref<1x16x16x32xbf16, #tpu.memory_space<vmem>>, vector<1x1x16x32xbf16>
    %49 = vector.shape_cast %48 : vector<1x1x16x32xbf16> to vector<16x32xbf16>
    %cst_50 = arith.constant dense<0.000000e+00> : vector<16x8xf32>
    %50 = tpu.matmul %49, %0, %cst_50 {dimension_numbers = #tpu.dot_dimension_numbers<[1], [0], [0], [1], [0, 0, 1, 1], [], []>} : vector<16x32xbf16>, vector<32x8xbf16>, vector<16x8xf32> -> vector<16x8xf32>
    %51 = vector.broadcast %1 : vector<1x8xf32> to vector<16x8xf32>
    %52 = arith.addf %50, %51 : vector<16x8xf32>
    %cst_51 = arith.constant 0.000000e+00 : f32
    %53 = vector.broadcast %cst_51 : f32 to vector<16x8xf32>
    %54 = arith.maximumf %52, %53 : vector<16x8xf32>
    %c5 = arith.constant 5 : index
    %c1_52 = arith.constant 1 : index
    %c0_53 = arith.constant 0 : index
    %55 = vector.load %arg9[%c5, %c1_52, %c0_53] : memref<18x18x8xf32, #tpu.memory_space<vmem>>, vector<1x16x8xf32>
    %56 = vector.shape_cast %55 : vector<1x16x8xf32> to vector<16x8xf32>
    %57 = vector.shape_cast %54 : vector<16x8xf32> to vector<1x16x8xf32>
    tpu.vector_store %arg9[%c5, %c1_52, %c0_53], %57 {strides = array<i32>} : memref<18x18x8xf32, #tpu.memory_space<vmem>>, vector<1x16x8xf32>,
    %c0_54 = arith.constant 0 : index
    %c5_55 = arith.constant 5 : index
    %c0_56 = arith.constant 0 : index
    %c0_57 = arith.constant 0 : index
    %58 = vector.load %arg1[%c0_54, %c5_55, %c0_56, %c0_57] : memref<1x16x16x32xbf16, #tpu.memory_space<vmem>>, vector<1x1x16x32xbf16>
    %59 = vector.shape_cast %58 : vector<1x1x16x32xbf16> to vector<16x32xbf16>
    %cst_58 = arith.constant dense<0.000000e+00> : vector<16x8xf32>
    %60 = tpu.matmul %59, %0, %cst_58 {dimension_numbers = #tpu.dot_dimension_numbers<[1], [0], [0], [1], [0, 0, 1, 1], [], []>} : vector<16x32xbf16>, vector<32x8xbf16>, vector<16x8xf32> -> vector<16x8xf32>
    %61 = vector.broadcast %1 : vector<1x8xf32> to vector<16x8xf32>
    %62 = arith.addf %60, %61 : vector<16x8xf32>
    %cst_59 = arith.constant 0.000000e+00 : f32
    %63 = vector.broadcast %cst_59 : f32 to vector<16x8xf32>
    %64 = arith.maximumf %62, %63 : vector<16x8xf32>
    %c6 = arith.constant 6 : index
    %c1_60 = arith.constant 1 : index
    %c0_61 = arith.constant 0 : index
    %65 = vector.load %arg9[%c6, %c1_60, %c0_61] : memref<18x18x8xf32, #tpu.memory_space<vmem>>, vector<1x16x8xf32>
    %66 = vector.shape_cast %65 : vector<1x16x8xf32> to vector<16x8xf32>
    %67 = vector.shape_cast %64 : vector<16x8xf32> to vector<1x16x8xf32>
    tpu.vector_store %arg9[%c6, %c1_60, %c0_61], %67 {strides = array<i32>} : memref<18x18x8xf32, #tpu.memory_space<vmem>>, vector<1x16x8xf32>,
    %c0_62 = arith.constant 0 : index
    %c6_63 = arith.constant 6 : index
    %c0_64 = arith.constant 0 : index
    %c0_65 = arith.constant 0 : index
    %68 = vector.load %arg1[%c0_62, %c6_63, %c0_64, %c0_65] : memref<1x16x16x32xbf16, #tpu.memory_space<vmem>>, vector<1x1x16x32xbf16>
    %69 = vector.shape_cast %68 : vector<1x1x16x32xbf16> to vector<16x32xbf16>
    %cst_66 = arith.constant dense<0.000000e+00> : vector<16x8xf32>
    %70 = tpu.matmul %69, %0, %cst_66 {dimension_numbers = #tpu.dot_dimension_numbers<[1], [0], [0], [1], [0, 0, 1, 1], [], []>} : vector<16x32xbf16>, vector<32x8xbf16>, vector<16x8xf32> -> vector<16x8xf32>
    %71 = vector.broadcast %1 : vector<1x8xf32> to vector<16x8xf32>
    %72 = arith.addf %70, %71 : vector<16x8xf32>
    %cst_67 = arith.constant 0.000000e+00 : f32
    %73 = vector.broadcast %cst_67 : f32 to vector<16x8xf32>
    %74 = arith.maximumf %72, %73 : vector<16x8xf32>
    %c7 = arith.constant 7 : index
    %c1_68 = arith.constant 1 : index
    %c0_69 = arith.constant 0 : index
    %75 = vector.load %arg9[%c7, %c1_68, %c0_69] : memref<18x18x8xf32, #tpu.memory_space<vmem>>, vector<1x16x8xf32>
    %76 = vector.shape_cast %75 : vector<1x16x8xf32> to vector<16x8xf32>
    %77 = vector.shape_cast %74 : vector<16x8xf32> to vector<1x16x8xf32>
    tpu.vector_store %arg9[%c7, %c1_68, %c0_69], %77 {strides = array<i32>} : memref<18x18x8xf32, #tpu.memory_space<vmem>>, vector<1x16x8xf32>,
    %c0_70 = arith.constant 0 : index
    %c7_71 = arith.constant 7 : index
    %c0_72 = arith.constant 0 : index
    %c0_73 = arith.constant 0 : index
    %78 = vector.load %arg1[%c0_70, %c7_71, %c0_72, %c0_73] : memref<1x16x16x32xbf16, #tpu.memory_space<vmem>>, vector<1x1x16x32xbf16>
    %79 = vector.shape_cast %78 : vector<1x1x16x32xbf16> to vector<16x32xbf16>
    %cst_74 = arith.constant dense<0.000000e+00> : vector<16x8xf32>
    %80 = tpu.matmul %79, %0, %cst_74 {dimension_numbers = #tpu.dot_dimension_numbers<[1], [0], [0], [1], [0, 0, 1, 1], [], []>} : vector<16x32xbf16>, vector<32x8xbf16>, vector<16x8xf32> -> vector<16x8xf32>
    %81 = vector.broadcast %1 : vector<1x8xf32> to vector<16x8xf32>
    %82 = arith.addf %80, %81 : vector<16x8xf32>
    %cst_75 = arith.constant 0.000000e+00 : f32
    %83 = vector.broadcast %cst_75 : f32 to vector<16x8xf32>
    %84 = arith.maximumf %82, %83 : vector<16x8xf32>
    %c8 = arith.constant 8 : index
    %c1_76 = arith.constant 1 : index
    %c0_77 = arith.constant 0 : index
    %85 = vector.load %arg9[%c8, %c1_76, %c0_77] : memref<18x18x8xf32, #tpu.memory_space<vmem>>, vector<1x16x8xf32>
    %86 = vector.shape_cast %85 : vector<1x16x8xf32> to vector<16x8xf32>
    %87 = vector.shape_cast %84 : vector<16x8xf32> to vector<1x16x8xf32>
    tpu.vector_store %arg9[%c8, %c1_76, %c0_77], %87 {strides = array<i32>} : memref<18x18x8xf32, #tpu.memory_space<vmem>>, vector<1x16x8xf32>,
    %c0_78 = arith.constant 0 : index
    %c8_79 = arith.constant 8 : index
    %c0_80 = arith.constant 0 : index
    %c0_81 = arith.constant 0 : index
    %88 = vector.load %arg1[%c0_78, %c8_79, %c0_80, %c0_81] : memref<1x16x16x32xbf16, #tpu.memory_space<vmem>>, vector<1x1x16x32xbf16>
    %89 = vector.shape_cast %88 : vector<1x1x16x32xbf16> to vector<16x32xbf16>
    %cst_82 = arith.constant dense<0.000000e+00> : vector<16x8xf32>
    %90 = tpu.matmul %89, %0, %cst_82 {dimension_numbers = #tpu.dot_dimension_numbers<[1], [0], [0], [1], [0, 0, 1, 1], [], []>} : vector<16x32xbf16>, vector<32x8xbf16>, vector<16x8xf32> -> vector<16x8xf32>
    %91 = vector.broadcast %1 : vector<1x8xf32> to vector<16x8xf32>
    %92 = arith.addf %90, %91 : vector<16x8xf32>
    %cst_83 = arith.constant 0.000000e+00 : f32
    %93 = vector.broadcast %cst_83 : f32 to vector<16x8xf32>
    %94 = arith.maximumf %92, %93 : vector<16x8xf32>
    %c9 = arith.constant 9 : index
    %c1_84 = arith.constant 1 : index
    %c0_85 = arith.constant 0 : index
    %95 = vector.load %arg9[%c9, %c1_84, %c0_85] : memref<18x18x8xf32, #tpu.memory_space<vmem>>, vector<1x16x8xf32>
    %96 = vector.shape_cast %95 : vector<1x16x8xf32> to vector<16x8xf32>
    %97 = vector.shape_cast %94 : vector<16x8xf32> to vector<1x16x8xf32>
    tpu.vector_store %arg9[%c9, %c1_84, %c0_85], %97 {strides = array<i32>} : memref<18x18x8xf32, #tpu.memory_space<vmem>>, vector<1x16x8xf32>,
    %c0_86 = arith.constant 0 : index
    %c9_87 = arith.constant 9 : index
    %c0_88 = arith.constant 0 : index
    %c0_89 = arith.constant 0 : index
    %98 = vector.load %arg1[%c0_86, %c9_87, %c0_88, %c0_89] : memref<1x16x16x32xbf16, #tpu.memory_space<vmem>>, vector<1x1x16x32xbf16>
    %99 = vector.shape_cast %98 : vector<1x1x16x32xbf16> to vector<16x32xbf16>
    %cst_90 = arith.constant dense<0.000000e+00> : vector<16x8xf32>
    %100 = tpu.matmul %99, %0, %cst_90 {dimension_numbers = #tpu.dot_dimension_numbers<[1], [0], [0], [1], [0, 0, 1, 1], [], []>} : vector<16x32xbf16>, vector<32x8xbf16>, vector<16x8xf32> -> vector<16x8xf32>
    %101 = vector.broadcast %1 : vector<1x8xf32> to vector<16x8xf32>
    %102 = arith.addf %100, %101 : vector<16x8xf32>
    %cst_91 = arith.constant 0.000000e+00 : f32
    %103 = vector.broadcast %cst_91 : f32 to vector<16x8xf32>
    %104 = arith.maximumf %102, %103 : vector<16x8xf32>
    %c10 = arith.constant 10 : index
    %c1_92 = arith.constant 1 : index
    %c0_93 = arith.constant 0 : index
    %105 = vector.load %arg9[%c10, %c1_92, %c0_93] : memref<18x18x8xf32, #tpu.memory_space<vmem>>, vector<1x16x8xf32>
    %106 = vector.shape_cast %105 : vector<1x16x8xf32> to vector<16x8xf32>
    %107 = vector.shape_cast %104 : vector<16x8xf32> to vector<1x16x8xf32>
    tpu.vector_store %arg9[%c10, %c1_92, %c0_93], %107 {strides = array<i32>} : memref<18x18x8xf32, #tpu.memory_space<vmem>>, vector<1x16x8xf32>,
    %c0_94 = arith.constant 0 : index
    %c10_95 = arith.constant 10 : index
    %c0_96 = arith.constant 0 : index
    %c0_97 = arith.constant 0 : index
    %108 = vector.load %arg1[%c0_94, %c10_95, %c0_96, %c0_97] : memref<1x16x16x32xbf16, #tpu.memory_space<vmem>>, vector<1x1x16x32xbf16>
    %109 = vector.shape_cast %108 : vector<1x1x16x32xbf16> to vector<16x32xbf16>
    %cst_98 = arith.constant dense<0.000000e+00> : vector<16x8xf32>
    %110 = tpu.matmul %109, %0, %cst_98 {dimension_numbers = #tpu.dot_dimension_numbers<[1], [0], [0], [1], [0, 0, 1, 1], [], []>} : vector<16x32xbf16>, vector<32x8xbf16>, vector<16x8xf32> -> vector<16x8xf32>
    %111 = vector.broadcast %1 : vector<1x8xf32> to vector<16x8xf32>
    %112 = arith.addf %110, %111 : vector<16x8xf32>
    %cst_99 = arith.constant 0.000000e+00 : f32
    %113 = vector.broadcast %cst_99 : f32 to vector<16x8xf32>
    %114 = arith.maximumf %112, %113 : vector<16x8xf32>
    %c11 = arith.constant 11 : index
    %c1_100 = arith.constant 1 : index
    %c0_101 = arith.constant 0 : index
    %115 = vector.load %arg9[%c11, %c1_100, %c0_101] : memref<18x18x8xf32, #tpu.memory_space<vmem>>, vector<1x16x8xf32>
    %116 = vector.shape_cast %115 : vector<1x16x8xf32> to vector<16x8xf32>
    %117 = vector.shape_cast %114 : vector<16x8xf32> to vector<1x16x8xf32>
    tpu.vector_store %arg9[%c11, %c1_100, %c0_101], %117 {strides = array<i32>} : memref<18x18x8xf32, #tpu.memory_space<vmem>>, vector<1x16x8xf32>,
    %c0_102 = arith.constant 0 : index
    %c11_103 = arith.constant 11 : index
    %c0_104 = arith.constant 0 : index
    %c0_105 = arith.constant 0 : index
    %118 = vector.load %arg1[%c0_102, %c11_103, %c0_104, %c0_105] : memref<1x16x16x32xbf16, #tpu.memory_space<vmem>>, vector<1x1x16x32xbf16>
    %119 = vector.shape_cast %118 : vector<1x1x16x32xbf16> to vector<16x32xbf16>
    %cst_106 = arith.constant dense<0.000000e+00> : vector<16x8xf32>
    %120 = tpu.matmul %119, %0, %cst_106 {dimension_numbers = #tpu.dot_dimension_numbers<[1], [0], [0], [1], [0, 0, 1, 1], [], []>} : vector<16x32xbf16>, vector<32x8xbf16>, vector<16x8xf32> -> vector<16x8xf32>
    %121 = vector.broadcast %1 : vector<1x8xf32> to vector<16x8xf32>
    %122 = arith.addf %120, %121 : vector<16x8xf32>
    %cst_107 = arith.constant 0.000000e+00 : f32
    %123 = vector.broadcast %cst_107 : f32 to vector<16x8xf32>
    %124 = arith.maximumf %122, %123 : vector<16x8xf32>
    %c12 = arith.constant 12 : index
    %c1_108 = arith.constant 1 : index
    %c0_109 = arith.constant 0 : index
    %125 = vector.load %arg9[%c12, %c1_108, %c0_109] : memref<18x18x8xf32, #tpu.memory_space<vmem>>, vector<1x16x8xf32>
    %126 = vector.shape_cast %125 : vector<1x16x8xf32> to vector<16x8xf32>
    %127 = vector.shape_cast %124 : vector<16x8xf32> to vector<1x16x8xf32>
    tpu.vector_store %arg9[%c12, %c1_108, %c0_109], %127 {strides = array<i32>} : memref<18x18x8xf32, #tpu.memory_space<vmem>>, vector<1x16x8xf32>,
    %c0_110 = arith.constant 0 : index
    %c12_111 = arith.constant 12 : index
    %c0_112 = arith.constant 0 : index
    %c0_113 = arith.constant 0 : index
    %128 = vector.load %arg1[%c0_110, %c12_111, %c0_112, %c0_113] : memref<1x16x16x32xbf16, #tpu.memory_space<vmem>>, vector<1x1x16x32xbf16>
    %129 = vector.shape_cast %128 : vector<1x1x16x32xbf16> to vector<16x32xbf16>
    %cst_114 = arith.constant dense<0.000000e+00> : vector<16x8xf32>
    %130 = tpu.matmul %129, %0, %cst_114 {dimension_numbers = #tpu.dot_dimension_numbers<[1], [0], [0], [1], [0, 0, 1, 1], [], []>} : vector<16x32xbf16>, vector<32x8xbf16>, vector<16x8xf32> -> vector<16x8xf32>
    %131 = vector.broadcast %1 : vector<1x8xf32> to vector<16x8xf32>
    %132 = arith.addf %130, %131 : vector<16x8xf32>
    %cst_115 = arith.constant 0.000000e+00 : f32
    %133 = vector.broadcast %cst_115 : f32 to vector<16x8xf32>
    %134 = arith.maximumf %132, %133 : vector<16x8xf32>
    %c13 = arith.constant 13 : index
    %c1_116 = arith.constant 1 : index
    %c0_117 = arith.constant 0 : index
    %135 = vector.load %arg9[%c13, %c1_116, %c0_117] : memref<18x18x8xf32, #tpu.memory_space<vmem>>, vector<1x16x8xf32>
    %136 = vector.shape_cast %135 : vector<1x16x8xf32> to vector<16x8xf32>
    %137 = vector.shape_cast %134 : vector<16x8xf32> to vector<1x16x8xf32>
    tpu.vector_store %arg9[%c13, %c1_116, %c0_117], %137 {strides = array<i32>} : memref<18x18x8xf32, #tpu.memory_space<vmem>>, vector<1x16x8xf32>,
    %c0_118 = arith.constant 0 : index
    %c13_119 = arith.constant 13 : index
    %c0_120 = arith.constant 0 : index
    %c0_121 = arith.constant 0 : index
    %138 = vector.load %arg1[%c0_118, %c13_119, %c0_120, %c0_121] : memref<1x16x16x32xbf16, #tpu.memory_space<vmem>>, vector<1x1x16x32xbf16>
    %139 = vector.shape_cast %138 : vector<1x1x16x32xbf16> to vector<16x32xbf16>
    %cst_122 = arith.constant dense<0.000000e+00> : vector<16x8xf32>
    %140 = tpu.matmul %139, %0, %cst_122 {dimension_numbers = #tpu.dot_dimension_numbers<[1], [0], [0], [1], [0, 0, 1, 1], [], []>} : vector<16x32xbf16>, vector<32x8xbf16>, vector<16x8xf32> -> vector<16x8xf32>
    %141 = vector.broadcast %1 : vector<1x8xf32> to vector<16x8xf32>
    %142 = arith.addf %140, %141 : vector<16x8xf32>
    %cst_123 = arith.constant 0.000000e+00 : f32
    %143 = vector.broadcast %cst_123 : f32 to vector<16x8xf32>
    %144 = arith.maximumf %142, %143 : vector<16x8xf32>
    %c14 = arith.constant 14 : index
    %c1_124 = arith.constant 1 : index
    %c0_125 = arith.constant 0 : index
    %145 = vector.load %arg9[%c14, %c1_124, %c0_125] : memref<18x18x8xf32, #tpu.memory_space<vmem>>, vector<1x16x8xf32>
    %146 = vector.shape_cast %145 : vector<1x16x8xf32> to vector<16x8xf32>
    %147 = vector.shape_cast %144 : vector<16x8xf32> to vector<1x16x8xf32>
    tpu.vector_store %arg9[%c14, %c1_124, %c0_125], %147 {strides = array<i32>} : memref<18x18x8xf32, #tpu.memory_space<vmem>>, vector<1x16x8xf32>,
    %c0_126 = arith.constant 0 : index
    %c14_127 = arith.constant 14 : index
    %c0_128 = arith.constant 0 : index
    %c0_129 = arith.constant 0 : index
    %148 = vector.load %arg1[%c0_126, %c14_127, %c0_128, %c0_129] : memref<1x16x16x32xbf16, #tpu.memory_space<vmem>>, vector<1x1x16x32xbf16>
    %149 = vector.shape_cast %148 : vector<1x1x16x32xbf16> to vector<16x32xbf16>
    %cst_130 = arith.constant dense<0.000000e+00> : vector<16x8xf32>
    %150 = tpu.matmul %149, %0, %cst_130 {dimension_numbers = #tpu.dot_dimension_numbers<[1], [0], [0], [1], [0, 0, 1, 1], [], []>} : vector<16x32xbf16>, vector<32x8xbf16>, vector<16x8xf32> -> vector<16x8xf32>
    %151 = vector.broadcast %1 : vector<1x8xf32> to vector<16x8xf32>
    %152 = arith.addf %150, %151 : vector<16x8xf32>
    %cst_131 = arith.constant 0.000000e+00 : f32
    %153 = vector.broadcast %cst_131 : f32 to vector<16x8xf32>
    %154 = arith.maximumf %152, %153 : vector<16x8xf32>
    %c15 = arith.constant 15 : index
    %c1_132 = arith.constant 1 : index
    %c0_133 = arith.constant 0 : index
    %155 = vector.load %arg9[%c15, %c1_132, %c0_133] : memref<18x18x8xf32, #tpu.memory_space<vmem>>, vector<1x16x8xf32>
    %156 = vector.shape_cast %155 : vector<1x16x8xf32> to vector<16x8xf32>
    %157 = vector.shape_cast %154 : vector<16x8xf32> to vector<1x16x8xf32>
    tpu.vector_store %arg9[%c15, %c1_132, %c0_133], %157 {strides = array<i32>} : memref<18x18x8xf32, #tpu.memory_space<vmem>>, vector<1x16x8xf32>,
    %c0_134 = arith.constant 0 : index
    %c15_135 = arith.constant 15 : index
    %c0_136 = arith.constant 0 : index
    %c0_137 = arith.constant 0 : index
    %158 = vector.load %arg1[%c0_134, %c15_135, %c0_136, %c0_137] : memref<1x16x16x32xbf16, #tpu.memory_space<vmem>>, vector<1x1x16x32xbf16>
    %159 = vector.shape_cast %158 : vector<1x1x16x32xbf16> to vector<16x32xbf16>
    %cst_138 = arith.constant dense<0.000000e+00> : vector<16x8xf32>
    %160 = tpu.matmul %159, %0, %cst_138 {dimension_numbers = #tpu.dot_dimension_numbers<[1], [0], [0], [1], [0, 0, 1, 1], [], []>} : vector<16x32xbf16>, vector<32x8xbf16>, vector<16x8xf32> -> vector<16x8xf32>
    %161 = vector.broadcast %1 : vector<1x8xf32> to vector<16x8xf32>
    %162 = arith.addf %160, %161 : vector<16x8xf32>
    %cst_139 = arith.constant 0.000000e+00 : f32
    %163 = vector.broadcast %cst_139 : f32 to vector<16x8xf32>
    %164 = arith.maximumf %162, %163 : vector<16x8xf32>
    %c16 = arith.constant 16 : index
    %c1_140 = arith.constant 1 : index
    %c0_141 = arith.constant 0 : index
    %165 = vector.load %arg9[%c16, %c1_140, %c0_141] : memref<18x18x8xf32, #tpu.memory_space<vmem>>, vector<1x16x8xf32>
    %166 = vector.shape_cast %165 : vector<1x16x8xf32> to vector<16x8xf32>
    %167 = vector.shape_cast %164 : vector<16x8xf32> to vector<1x16x8xf32>
    tpu.vector_store %arg9[%c16, %c1_140, %c0_141], %167 {strides = array<i32>} : memref<18x18x8xf32, #tpu.memory_space<vmem>>, vector<1x16x8xf32>,
    %c0_142 = arith.constant 0 : index
    %c0_143 = arith.constant 0 : index
    %c0_144 = arith.constant 0 : index
    %168 = vector.load %arg9[%c0_142, %c0_143, %c0_144] : memref<18x18x8xf32, #tpu.memory_space<vmem>>, vector<1x16x8xf32>
    %169 = vector.shape_cast %168 : vector<1x16x8xf32> to vector<16x8xf32>
    %c0_145 = arith.constant 0 : index
    %c1_146 = arith.constant 1 : index
    %c0_147 = arith.constant 0 : index
    %170 = vector.load %arg9[%c0_145, %c1_146, %c0_147] : memref<18x18x8xf32, #tpu.memory_space<vmem>>, vector<1x16x8xf32>
    %171 = vector.shape_cast %170 : vector<1x16x8xf32> to vector<16x8xf32>
    %c0_148 = arith.constant 0 : index
    %c2_149 = arith.constant 2 : index
    %c0_150 = arith.constant 0 : index
    %172 = vector.load %arg9[%c0_148, %c2_149, %c0_150] : memref<18x18x8xf32, #tpu.memory_space<vmem>>, vector<1x16x8xf32>
    %173 = vector.shape_cast %172 : vector<1x16x8xf32> to vector<16x8xf32>
    %c1_151 = arith.constant 1 : index
    %c0_152 = arith.constant 0 : index
    %c0_153 = arith.constant 0 : index
    %174 = vector.load %arg9[%c1_151, %c0_152, %c0_153] : memref<18x18x8xf32, #tpu.memory_space<vmem>>, vector<1x16x8xf32>
    %175 = vector.shape_cast %174 : vector<1x16x8xf32> to vector<16x8xf32>
    %c1_154 = arith.constant 1 : index
    %c1_155 = arith.constant 1 : index
    %c0_156 = arith.constant 0 : index
    %176 = vector.load %arg9[%c1_154, %c1_155, %c0_156] : memref<18x18x8xf32, #tpu.memory_space<vmem>>, vector<1x16x8xf32>
    %177 = vector.shape_cast %176 : vector<1x16x8xf32> to vector<16x8xf32>
    %c1_157 = arith.constant 1 : index
    %c2_158 = arith.constant 2 : index
    %c0_159 = arith.constant 0 : index
    %178 = vector.load %arg9[%c1_157, %c2_158, %c0_159] : memref<18x18x8xf32, #tpu.memory_space<vmem>>, vector<1x16x8xf32>
    %179 = vector.shape_cast %178 : vector<1x16x8xf32> to vector<16x8xf32>
    %c2_160 = arith.constant 2 : index
    %c0_161 = arith.constant 0 : index
    %c0_162 = arith.constant 0 : index
    %180 = vector.load %arg9[%c2_160, %c0_161, %c0_162] : memref<18x18x8xf32, #tpu.memory_space<vmem>>, vector<1x16x8xf32>
    %181 = vector.shape_cast %180 : vector<1x16x8xf32> to vector<16x8xf32>
    %c2_163 = arith.constant 2 : index
    %c1_164 = arith.constant 1 : index
    %c0_165 = arith.constant 0 : index
    %182 = vector.load %arg9[%c2_163, %c1_164, %c0_165] : memref<18x18x8xf32, #tpu.memory_space<vmem>>, vector<1x16x8xf32>
    %183 = vector.shape_cast %182 : vector<1x16x8xf32> to vector<16x8xf32>
    %c2_166 = arith.constant 2 : index
    %c2_167 = arith.constant 2 : index
    %c0_168 = arith.constant 0 : index
    %184 = vector.load %arg9[%c2_166, %c2_167, %c0_168] : memref<18x18x8xf32, #tpu.memory_space<vmem>>, vector<1x16x8xf32>
    %185 = vector.shape_cast %184 : vector<1x16x8xf32> to vector<16x8xf32>
    %186 = tpu.concatenate %169, %171, %173, %175, %177, %179, %181, %183, %185 in 1 : vector<16x8xf32>, vector<16x8xf32>, vector<16x8xf32>, vector<16x8xf32>, vector<16x8xf32>, vector<16x8xf32>, vector<16x8xf32>, vector<16x8xf32>, vector<16x8xf32> -> vector<16x72xf32>
    %187 = arith.truncf %186 : vector<16x72xf32> to vector<16x72xbf16>
    %cst_169 = arith.constant dense<0.000000e+00> : vector<16x8xf32>
    %188 = tpu.matmul %187, %2, %cst_169 {dimension_numbers = #tpu.dot_dimension_numbers<[1], [0], [0], [1], [0, 0, 1, 1], [], []>} : vector<16x72xbf16>, vector<72x8xbf16>, vector<16x8xf32> -> vector<16x8xf32>
    %189 = vector.broadcast %3 : vector<1x8xf32> to vector<16x8xf32>
    %190 = arith.addf %188, %189 : vector<16x8xf32>
    %cst_170 = arith.constant 0.000000e+00 : f32
    %191 = vector.broadcast %cst_170 : f32 to vector<16x8xf32>
    %192 = arith.maximumf %190, %191 : vector<16x8xf32>
    %193 = arith.truncf %192 : vector<16x8xf32> to vector<16x8xbf16>
    %cst_171 = arith.constant dense<0.000000e+00> : vector<16x32xf32>
    %194 = tpu.matmul %193, %4, %cst_171 {dimension_numbers = #tpu.dot_dimension_numbers<[1], [0], [0], [1], [0, 0, 1, 1], [], []>} : vector<16x8xbf16>, vector<8x32xbf16>, vector<16x32xf32> -> vector<16x32xf32>
    %195 = vector.broadcast %5 : vector<1x32xf32> to vector<16x32xf32>
    %196 = arith.addf %194, %195 : vector<16x32xf32>
    %c0_172 = arith.constant 0 : index
    %c0_173 = arith.constant 0 : index
    %c0_174 = arith.constant 0 : index
    %c0_175 = arith.constant 0 : index
    %197 = vector.load %arg1[%c0_172, %c0_173, %c0_174, %c0_175] : memref<1x16x16x32xbf16, #tpu.memory_space<vmem>>, vector<1x1x16x32xbf16>
    %198 = vector.shape_cast %197 : vector<1x1x16x32xbf16> to vector<16x32xbf16>
    %199 = arith.extf %198 : vector<16x32xbf16> to vector<16x32xf32>
    %200 = arith.addf %196, %199 : vector<16x32xf32>
    %cst_176 = arith.constant 0.000000e+00 : f32
    %201 = vector.broadcast %cst_176 : f32 to vector<16x32xf32>
    %202 = arith.maximumf %200, %201 : vector<16x32xf32>
    %203 = arith.truncf %202 : vector<16x32xf32> to vector<16x32xbf16>
    %c0_177 = arith.constant 0 : index
    %c0_178 = arith.constant 0 : index
    %c0_179 = arith.constant 0 : index
    %204 = vector.load %arg8[%c0_177, %c0_178, %c0_179] : memref<1x256x32xbf16, #tpu.memory_space<vmem>>, vector<1x16x32xbf16>
    %205 = vector.shape_cast %204 : vector<1x16x32xbf16> to vector<16x32xbf16>
    %206 = vector.shape_cast %203 : vector<16x32xbf16> to vector<1x16x32xbf16>
    tpu.vector_store %arg8[%c0_177, %c0_178, %c0_179], %206 {strides = array<i32>} : memref<1x256x32xbf16, #tpu.memory_space<vmem>>, vector<1x16x32xbf16>,
    %c1_180 = arith.constant 1 : index
    %c0_181 = arith.constant 0 : index
    %c0_182 = arith.constant 0 : index
    %207 = vector.load %arg9[%c1_180, %c0_181, %c0_182] : memref<18x18x8xf32, #tpu.memory_space<vmem>>, vector<1x16x8xf32>
    %208 = vector.shape_cast %207 : vector<1x16x8xf32> to vector<16x8xf32>
    %c1_183 = arith.constant 1 : index
    %c1_184 = arith.constant 1 : index
    %c0_185 = arith.constant 0 : index
    %209 = vector.load %arg9[%c1_183, %c1_184, %c0_185] : memref<18x18x8xf32, #tpu.memory_space<vmem>>, vector<1x16x8xf32>
    %210 = vector.shape_cast %209 : vector<1x16x8xf32> to vector<16x8xf32>
    %c1_186 = arith.constant 1 : index
    %c2_187 = arith.constant 2 : index
    %c0_188 = arith.constant 0 : index
    %211 = vector.load %arg9[%c1_186, %c2_187, %c0_188] : memref<18x18x8xf32, #tpu.memory_space<vmem>>, vector<1x16x8xf32>
    %212 = vector.shape_cast %211 : vector<1x16x8xf32> to vector<16x8xf32>
    %c2_189 = arith.constant 2 : index
    %c0_190 = arith.constant 0 : index
    %c0_191 = arith.constant 0 : index
    %213 = vector.load %arg9[%c2_189, %c0_190, %c0_191] : memref<18x18x8xf32, #tpu.memory_space<vmem>>, vector<1x16x8xf32>
    %214 = vector.shape_cast %213 : vector<1x16x8xf32> to vector<16x8xf32>
    %c2_192 = arith.constant 2 : index
    %c1_193 = arith.constant 1 : index
    %c0_194 = arith.constant 0 : index
    %215 = vector.load %arg9[%c2_192, %c1_193, %c0_194] : memref<18x18x8xf32, #tpu.memory_space<vmem>>, vector<1x16x8xf32>
    %216 = vector.shape_cast %215 : vector<1x16x8xf32> to vector<16x8xf32>
    %c2_195 = arith.constant 2 : index
    %c2_196 = arith.constant 2 : index
    %c0_197 = arith.constant 0 : index
    %217 = vector.load %arg9[%c2_195, %c2_196, %c0_197] : memref<18x18x8xf32, #tpu.memory_space<vmem>>, vector<1x16x8xf32>
    %218 = vector.shape_cast %217 : vector<1x16x8xf32> to vector<16x8xf32>
    %c3_198 = arith.constant 3 : index
    %c0_199 = arith.constant 0 : index
    %c0_200 = arith.constant 0 : index
    %219 = vector.load %arg9[%c3_198, %c0_199, %c0_200] : memref<18x18x8xf32, #tpu.memory_space<vmem>>, vector<1x16x8xf32>
    %220 = vector.shape_cast %219 : vector<1x16x8xf32> to vector<16x8xf32>
    %c3_201 = arith.constant 3 : index
    %c1_202 = arith.constant 1 : index
    %c0_203 = arith.constant 0 : index
    %221 = vector.load %arg9[%c3_201, %c1_202, %c0_203] : memref<18x18x8xf32, #tpu.memory_space<vmem>>, vector<1x16x8xf32>
    %222 = vector.shape_cast %221 : vector<1x16x8xf32> to vector<16x8xf32>
    %c3_204 = arith.constant 3 : index
    %c2_205 = arith.constant 2 : index
    %c0_206 = arith.constant 0 : index
    %223 = vector.load %arg9[%c3_204, %c2_205, %c0_206] : memref<18x18x8xf32, #tpu.memory_space<vmem>>, vector<1x16x8xf32>
    %224 = vector.shape_cast %223 : vector<1x16x8xf32> to vector<16x8xf32>
    %225 = tpu.concatenate %208, %210, %212, %214, %216, %218, %220, %222, %224 in 1 : vector<16x8xf32>, vector<16x8xf32>, vector<16x8xf32>, vector<16x8xf32>, vector<16x8xf32>, vector<16x8xf32>, vector<16x8xf32>, vector<16x8xf32>, vector<16x8xf32> -> vector<16x72xf32>
    %226 = arith.truncf %225 : vector<16x72xf32> to vector<16x72xbf16>
    %cst_207 = arith.constant dense<0.000000e+00> : vector<16x8xf32>
    %227 = tpu.matmul %226, %2, %cst_207 {dimension_numbers = #tpu.dot_dimension_numbers<[1], [0], [0], [1], [0, 0, 1, 1], [], []>} : vector<16x72xbf16>, vector<72x8xbf16>, vector<16x8xf32> -> vector<16x8xf32>
    %228 = vector.broadcast %3 : vector<1x8xf32> to vector<16x8xf32>
    %229 = arith.addf %227, %228 : vector<16x8xf32>
    %cst_208 = arith.constant 0.000000e+00 : f32
    %230 = vector.broadcast %cst_208 : f32 to vector<16x8xf32>
    %231 = arith.maximumf %229, %230 : vector<16x8xf32>
    %232 = arith.truncf %231 : vector<16x8xf32> to vector<16x8xbf16>
    %cst_209 = arith.constant dense<0.000000e+00> : vector<16x32xf32>
    %233 = tpu.matmul %232, %4, %cst_209 {dimension_numbers = #tpu.dot_dimension_numbers<[1], [0], [0], [1], [0, 0, 1, 1], [], []>} : vector<16x8xbf16>, vector<8x32xbf16>, vector<16x32xf32> -> vector<16x32xf32>
    %234 = vector.broadcast %5 : vector<1x32xf32> to vector<16x32xf32>
    %235 = arith.addf %233, %234 : vector<16x32xf32>
    %c0_210 = arith.constant 0 : index
    %c1_211 = arith.constant 1 : index
    %c0_212 = arith.constant 0 : index
    %c0_213 = arith.constant 0 : index
    %236 = vector.load %arg1[%c0_210, %c1_211, %c0_212, %c0_213] : memref<1x16x16x32xbf16, #tpu.memory_space<vmem>>, vector<1x1x16x32xbf16>
    %237 = vector.shape_cast %236 : vector<1x1x16x32xbf16> to vector<16x32xbf16>
    %238 = arith.extf %237 : vector<16x32xbf16> to vector<16x32xf32>
    %239 = arith.addf %235, %238 : vector<16x32xf32>
    %cst_214 = arith.constant 0.000000e+00 : f32
    %240 = vector.broadcast %cst_214 : f32 to vector<16x32xf32>
    %241 = arith.maximumf %239, %240 : vector<16x32xf32>
    %242 = arith.truncf %241 : vector<16x32xf32> to vector<16x32xbf16>
    %c0_215 = arith.constant 0 : index
    %c16_216 = arith.constant 16 : index
    %c0_217 = arith.constant 0 : index
    %243 = vector.load %arg8[%c0_215, %c16_216, %c0_217] : memref<1x256x32xbf16, #tpu.memory_space<vmem>>, vector<1x16x32xbf16>
    %244 = vector.shape_cast %243 : vector<1x16x32xbf16> to vector<16x32xbf16>
    %245 = vector.shape_cast %242 : vector<16x32xbf16> to vector<1x16x32xbf16>
    tpu.vector_store %arg8[%c0_215, %c16_216, %c0_217], %245 {strides = array<i32>} : memref<1x256x32xbf16, #tpu.memory_space<vmem>>, vector<1x16x32xbf16>,
    %c2_218 = arith.constant 2 : index
    %c0_219 = arith.constant 0 : index
    %c0_220 = arith.constant 0 : index
    %246 = vector.load %arg9[%c2_218, %c0_219, %c0_220] : memref<18x18x8xf32, #tpu.memory_space<vmem>>, vector<1x16x8xf32>
    %247 = vector.shape_cast %246 : vector<1x16x8xf32> to vector<16x8xf32>
    %c2_221 = arith.constant 2 : index
    %c1_222 = arith.constant 1 : index
    %c0_223 = arith.constant 0 : index
    %248 = vector.load %arg9[%c2_221, %c1_222, %c0_223] : memref<18x18x8xf32, #tpu.memory_space<vmem>>, vector<1x16x8xf32>
    %249 = vector.shape_cast %248 : vector<1x16x8xf32> to vector<16x8xf32>
    %c2_224 = arith.constant 2 : index
    %c2_225 = arith.constant 2 : index
    %c0_226 = arith.constant 0 : index
    %250 = vector.load %arg9[%c2_224, %c2_225, %c0_226] : memref<18x18x8xf32, #tpu.memory_space<vmem>>, vector<1x16x8xf32>
    %251 = vector.shape_cast %250 : vector<1x16x8xf32> to vector<16x8xf32>
    %c3_227 = arith.constant 3 : index
    %c0_228 = arith.constant 0 : index
    %c0_229 = arith.constant 0 : index
    %252 = vector.load %arg9[%c3_227, %c0_228, %c0_229] : memref<18x18x8xf32, #tpu.memory_space<vmem>>, vector<1x16x8xf32>
    %253 = vector.shape_cast %252 : vector<1x16x8xf32> to vector<16x8xf32>
    %c3_230 = arith.constant 3 : index
    %c1_231 = arith.constant 1 : index
    %c0_232 = arith.constant 0 : index
    %254 = vector.load %arg9[%c3_230, %c1_231, %c0_232] : memref<18x18x8xf32, #tpu.memory_space<vmem>>, vector<1x16x8xf32>
    %255 = vector.shape_cast %254 : vector<1x16x8xf32> to vector<16x8xf32>
    %c3_233 = arith.constant 3 : index
    %c2_234 = arith.constant 2 : index
    %c0_235 = arith.constant 0 : index
    %256 = vector.load %arg9[%c3_233, %c2_234, %c0_235] : memref<18x18x8xf32, #tpu.memory_space<vmem>>, vector<1x16x8xf32>
    %257 = vector.shape_cast %256 : vector<1x16x8xf32> to vector<16x8xf32>
    %c4_236 = arith.constant 4 : index
    %c0_237 = arith.constant 0 : index
    %c0_238 = arith.constant 0 : index
    %258 = vector.load %arg9[%c4_236, %c0_237, %c0_238] : memref<18x18x8xf32, #tpu.memory_space<vmem>>, vector<1x16x8xf32>
    %259 = vector.shape_cast %258 : vector<1x16x8xf32> to vector<16x8xf32>
    %c4_239 = arith.constant 4 : index
    %c1_240 = arith.constant 1 : index
    %c0_241 = arith.constant 0 : index
    %260 = vector.load %arg9[%c4_239, %c1_240, %c0_241] : memref<18x18x8xf32, #tpu.memory_space<vmem>>, vector<1x16x8xf32>
    %261 = vector.shape_cast %260 : vector<1x16x8xf32> to vector<16x8xf32>
    %c4_242 = arith.constant 4 : index
    %c2_243 = arith.constant 2 : index
    %c0_244 = arith.constant 0 : index
    %262 = vector.load %arg9[%c4_242, %c2_243, %c0_244] : memref<18x18x8xf32, #tpu.memory_space<vmem>>, vector<1x16x8xf32>
    %263 = vector.shape_cast %262 : vector<1x16x8xf32> to vector<16x8xf32>
    %264 = tpu.concatenate %247, %249, %251, %253, %255, %257, %259, %261, %263 in 1 : vector<16x8xf32>, vector<16x8xf32>, vector<16x8xf32>, vector<16x8xf32>, vector<16x8xf32>, vector<16x8xf32>, vector<16x8xf32>, vector<16x8xf32>, vector<16x8xf32> -> vector<16x72xf32>
    %265 = arith.truncf %264 : vector<16x72xf32> to vector<16x72xbf16>
    %cst_245 = arith.constant dense<0.000000e+00> : vector<16x8xf32>
    %266 = tpu.matmul %265, %2, %cst_245 {dimension_numbers = #tpu.dot_dimension_numbers<[1], [0], [0], [1], [0, 0, 1, 1], [], []>} : vector<16x72xbf16>, vector<72x8xbf16>, vector<16x8xf32> -> vector<16x8xf32>
    %267 = vector.broadcast %3 : vector<1x8xf32> to vector<16x8xf32>
    %268 = arith.addf %266, %267 : vector<16x8xf32>
    %cst_246 = arith.constant 0.000000e+00 : f32
    %269 = vector.broadcast %cst_246 : f32 to vector<16x8xf32>
    %270 = arith.maximumf %268, %269 : vector<16x8xf32>
    %271 = arith.truncf %270 : vector<16x8xf32> to vector<16x8xbf16>
    %cst_247 = arith.constant dense<0.000000e+00> : vector<16x32xf32>
    %272 = tpu.matmul %271, %4, %cst_247 {dimension_numbers = #tpu.dot_dimension_numbers<[1], [0], [0], [1], [0, 0, 1, 1], [], []>} : vector<16x8xbf16>, vector<8x32xbf16>, vector<16x32xf32> -> vector<16x32xf32>
    %273 = vector.broadcast %5 : vector<1x32xf32> to vector<16x32xf32>
    %274 = arith.addf %272, %273 : vector<16x32xf32>
    %c0_248 = arith.constant 0 : index
    %c2_249 = arith.constant 2 : index
    %c0_250 = arith.constant 0 : index
    %c0_251 = arith.constant 0 : index
    %275 = vector.load %arg1[%c0_248, %c2_249, %c0_250, %c0_251] : memref<1x16x16x32xbf16, #tpu.memory_space<vmem>>, vector<1x1x16x32xbf16>
    %276 = vector.shape_cast %275 : vector<1x1x16x32xbf16> to vector<16x32xbf16>
    %277 = arith.extf %276 : vector<16x32xbf16> to vector<16x32xf32>
    %278 = arith.addf %274, %277 : vector<16x32xf32>
    %cst_252 = arith.constant 0.000000e+00 : f32
    %279 = vector.broadcast %cst_252 : f32 to vector<16x32xf32>
    %280 = arith.maximumf %278, %279 : vector<16x32xf32>
    %281 = arith.truncf %280 : vector<16x32xf32> to vector<16x32xbf16>
    %c0_253 = arith.constant 0 : index
    %c32 = arith.constant 32 : index
    %c0_254 = arith.constant 0 : index
    %282 = vector.load %arg8[%c0_253, %c32, %c0_254] : memref<1x256x32xbf16, #tpu.memory_space<vmem>>, vector<1x16x32xbf16>
    %283 = vector.shape_cast %282 : vector<1x16x32xbf16> to vector<16x32xbf16>
    %284 = vector.shape_cast %281 : vector<16x32xbf16> to vector<1x16x32xbf16>
    tpu.vector_store %arg8[%c0_253, %c32, %c0_254], %284 {strides = array<i32>} : memref<1x256x32xbf16, #tpu.memory_space<vmem>>, vector<1x16x32xbf16>,
    %c3_255 = arith.constant 3 : index
    %c0_256 = arith.constant 0 : index
    %c0_257 = arith.constant 0 : index
    %285 = vector.load %arg9[%c3_255, %c0_256, %c0_257] : memref<18x18x8xf32, #tpu.memory_space<vmem>>, vector<1x16x8xf32>
    %286 = vector.shape_cast %285 : vector<1x16x8xf32> to vector<16x8xf32>
    %c3_258 = arith.constant 3 : index
    %c1_259 = arith.constant 1 : index
    %c0_260 = arith.constant 0 : index
    %287 = vector.load %arg9[%c3_258, %c1_259, %c0_260] : memref<18x18x8xf32, #tpu.memory_space<vmem>>, vector<1x16x8xf32>
    %288 = vector.shape_cast %287 : vector<1x16x8xf32> to vector<16x8xf32>
    %c3_261 = arith.constant 3 : index
    %c2_262 = arith.constant 2 : index
    %c0_263 = arith.constant 0 : index
    %289 = vector.load %arg9[%c3_261, %c2_262, %c0_263] : memref<18x18x8xf32, #tpu.memory_space<vmem>>, vector<1x16x8xf32>
    %290 = vector.shape_cast %289 : vector<1x16x8xf32> to vector<16x8xf32>
    %c4_264 = arith.constant 4 : index
    %c0_265 = arith.constant 0 : index
    %c0_266 = arith.constant 0 : index
    %291 = vector.load %arg9[%c4_264, %c0_265, %c0_266] : memref<18x18x8xf32, #tpu.memory_space<vmem>>, vector<1x16x8xf32>
    %292 = vector.shape_cast %291 : vector<1x16x8xf32> to vector<16x8xf32>
    %c4_267 = arith.constant 4 : index
    %c1_268 = arith.constant 1 : index
    %c0_269 = arith.constant 0 : index
    %293 = vector.load %arg9[%c4_267, %c1_268, %c0_269] : memref<18x18x8xf32, #tpu.memory_space<vmem>>, vector<1x16x8xf32>
    %294 = vector.shape_cast %293 : vector<1x16x8xf32> to vector<16x8xf32>
    %c4_270 = arith.constant 4 : index
    %c2_271 = arith.constant 2 : index
    %c0_272 = arith.constant 0 : index
    %295 = vector.load %arg9[%c4_270, %c2_271, %c0_272] : memref<18x18x8xf32, #tpu.memory_space<vmem>>, vector<1x16x8xf32>
    %296 = vector.shape_cast %295 : vector<1x16x8xf32> to vector<16x8xf32>
    %c5_273 = arith.constant 5 : index
    %c0_274 = arith.constant 0 : index
    %c0_275 = arith.constant 0 : index
    %297 = vector.load %arg9[%c5_273, %c0_274, %c0_275] : memref<18x18x8xf32, #tpu.memory_space<vmem>>, vector<1x16x8xf32>
    %298 = vector.shape_cast %297 : vector<1x16x8xf32> to vector<16x8xf32>
    %c5_276 = arith.constant 5 : index
    %c1_277 = arith.constant 1 : index
    %c0_278 = arith.constant 0 : index
    %299 = vector.load %arg9[%c5_276, %c1_277, %c0_278] : memref<18x18x8xf32, #tpu.memory_space<vmem>>, vector<1x16x8xf32>
    %300 = vector.shape_cast %299 : vector<1x16x8xf32> to vector<16x8xf32>
    %c5_279 = arith.constant 5 : index
    %c2_280 = arith.constant 2 : index
    %c0_281 = arith.constant 0 : index
    %301 = vector.load %arg9[%c5_279, %c2_280, %c0_281] : memref<18x18x8xf32, #tpu.memory_space<vmem>>, vector<1x16x8xf32>
    %302 = vector.shape_cast %301 : vector<1x16x8xf32> to vector<16x8xf32>
    %303 = tpu.concatenate %286, %288, %290, %292, %294, %296, %298, %300, %302 in 1 : vector<16x8xf32>, vector<16x8xf32>, vector<16x8xf32>, vector<16x8xf32>, vector<16x8xf32>, vector<16x8xf32>, vector<16x8xf32>, vector<16x8xf32>, vector<16x8xf32> -> vector<16x72xf32>
    %304 = arith.truncf %303 : vector<16x72xf32> to vector<16x72xbf16>
    %cst_282 = arith.constant dense<0.000000e+00> : vector<16x8xf32>
    %305 = tpu.matmul %304, %2, %cst_282 {dimension_numbers = #tpu.dot_dimension_numbers<[1], [0], [0], [1], [0, 0, 1, 1], [], []>} : vector<16x72xbf16>, vector<72x8xbf16>, vector<16x8xf32> -> vector<16x8xf32>
    %306 = vector.broadcast %3 : vector<1x8xf32> to vector<16x8xf32>
    %307 = arith.addf %305, %306 : vector<16x8xf32>
    %cst_283 = arith.constant 0.000000e+00 : f32
    %308 = vector.broadcast %cst_283 : f32 to vector<16x8xf32>
    %309 = arith.maximumf %307, %308 : vector<16x8xf32>
    %310 = arith.truncf %309 : vector<16x8xf32> to vector<16x8xbf16>
    %cst_284 = arith.constant dense<0.000000e+00> : vector<16x32xf32>
    %311 = tpu.matmul %310, %4, %cst_284 {dimension_numbers = #tpu.dot_dimension_numbers<[1], [0], [0], [1], [0, 0, 1, 1], [], []>} : vector<16x8xbf16>, vector<8x32xbf16>, vector<16x32xf32> -> vector<16x32xf32>
    %312 = vector.broadcast %5 : vector<1x32xf32> to vector<16x32xf32>
    %313 = arith.addf %311, %312 : vector<16x32xf32>
    %c0_285 = arith.constant 0 : index
    %c3_286 = arith.constant 3 : index
    %c0_287 = arith.constant 0 : index
    %c0_288 = arith.constant 0 : index
    %314 = vector.load %arg1[%c0_285, %c3_286, %c0_287, %c0_288] : memref<1x16x16x32xbf16, #tpu.memory_space<vmem>>, vector<1x1x16x32xbf16>
    %315 = vector.shape_cast %314 : vector<1x1x16x32xbf16> to vector<16x32xbf16>
    %316 = arith.extf %315 : vector<16x32xbf16> to vector<16x32xf32>
    %317 = arith.addf %313, %316 : vector<16x32xf32>
    %cst_289 = arith.constant 0.000000e+00 : f32
    %318 = vector.broadcast %cst_289 : f32 to vector<16x32xf32>
    %319 = arith.maximumf %317, %318 : vector<16x32xf32>
    %320 = arith.truncf %319 : vector<16x32xf32> to vector<16x32xbf16>
    %c0_290 = arith.constant 0 : index
    %c48 = arith.constant 48 : index
    %c0_291 = arith.constant 0 : index
    %321 = vector.load %arg8[%c0_290, %c48, %c0_291] : memref<1x256x32xbf16, #tpu.memory_space<vmem>>, vector<1x16x32xbf16>
    %322 = vector.shape_cast %321 : vector<1x16x32xbf16> to vector<16x32xbf16>
    %323 = vector.shape_cast %320 : vector<16x32xbf16> to vector<1x16x32xbf16>
    tpu.vector_store %arg8[%c0_290, %c48, %c0_291], %323 {strides = array<i32>} : memref<1x256x32xbf16, #tpu.memory_space<vmem>>, vector<1x16x32xbf16>,
    %c4_292 = arith.constant 4 : index
    %c0_293 = arith.constant 0 : index
    %c0_294 = arith.constant 0 : index
    %324 = vector.load %arg9[%c4_292, %c0_293, %c0_294] : memref<18x18x8xf32, #tpu.memory_space<vmem>>, vector<1x16x8xf32>
    %325 = vector.shape_cast %324 : vector<1x16x8xf32> to vector<16x8xf32>
    %c4_295 = arith.constant 4 : index
    %c1_296 = arith.constant 1 : index
    %c0_297 = arith.constant 0 : index
    %326 = vector.load %arg9[%c4_295, %c1_296, %c0_297] : memref<18x18x8xf32, #tpu.memory_space<vmem>>, vector<1x16x8xf32>
    %327 = vector.shape_cast %326 : vector<1x16x8xf32> to vector<16x8xf32>
    %c4_298 = arith.constant 4 : index
    %c2_299 = arith.constant 2 : index
    %c0_300 = arith.constant 0 : index
    %328 = vector.load %arg9[%c4_298, %c2_299, %c0_300] : memref<18x18x8xf32, #tpu.memory_space<vmem>>, vector<1x16x8xf32>
    %329 = vector.shape_cast %328 : vector<1x16x8xf32> to vector<16x8xf32>
    %c5_301 = arith.constant 5 : index
    %c0_302 = arith.constant 0 : index
    %c0_303 = arith.constant 0 : index
    %330 = vector.load %arg9[%c5_301, %c0_302, %c0_303] : memref<18x18x8xf32, #tpu.memory_space<vmem>>, vector<1x16x8xf32>
    %331 = vector.shape_cast %330 : vector<1x16x8xf32> to vector<16x8xf32>
    %c5_304 = arith.constant 5 : index
    %c1_305 = arith.constant 1 : index
    %c0_306 = arith.constant 0 : index
    %332 = vector.load %arg9[%c5_304, %c1_305, %c0_306] : memref<18x18x8xf32, #tpu.memory_space<vmem>>, vector<1x16x8xf32>
    %333 = vector.shape_cast %332 : vector<1x16x8xf32> to vector<16x8xf32>
    %c5_307 = arith.constant 5 : index
    %c2_308 = arith.constant 2 : index
    %c0_309 = arith.constant 0 : index
    %334 = vector.load %arg9[%c5_307, %c2_308, %c0_309] : memref<18x18x8xf32, #tpu.memory_space<vmem>>, vector<1x16x8xf32>
    %335 = vector.shape_cast %334 : vector<1x16x8xf32> to vector<16x8xf32>
    %c6_310 = arith.constant 6 : index
    %c0_311 = arith.constant 0 : index
    %c0_312 = arith.constant 0 : index
    %336 = vector.load %arg9[%c6_310, %c0_311, %c0_312] : memref<18x18x8xf32, #tpu.memory_space<vmem>>, vector<1x16x8xf32>
    %337 = vector.shape_cast %336 : vector<1x16x8xf32> to vector<16x8xf32>
    %c6_313 = arith.constant 6 : index
    %c1_314 = arith.constant 1 : index
    %c0_315 = arith.constant 0 : index
    %338 = vector.load %arg9[%c6_313, %c1_314, %c0_315] : memref<18x18x8xf32, #tpu.memory_space<vmem>>, vector<1x16x8xf32>
    %339 = vector.shape_cast %338 : vector<1x16x8xf32> to vector<16x8xf32>
    %c6_316 = arith.constant 6 : index
    %c2_317 = arith.constant 2 : index
    %c0_318 = arith.constant 0 : index
    %340 = vector.load %arg9[%c6_316, %c2_317, %c0_318] : memref<18x18x8xf32, #tpu.memory_space<vmem>>, vector<1x16x8xf32>
    %341 = vector.shape_cast %340 : vector<1x16x8xf32> to vector<16x8xf32>
    %342 = tpu.concatenate %325, %327, %329, %331, %333, %335, %337, %339, %341 in 1 : vector<16x8xf32>, vector<16x8xf32>, vector<16x8xf32>, vector<16x8xf32>, vector<16x8xf32>, vector<16x8xf32>, vector<16x8xf32>, vector<16x8xf32>, vector<16x8xf32> -> vector<16x72xf32>
    %343 = arith.truncf %342 : vector<16x72xf32> to vector<16x72xbf16>
    %cst_319 = arith.constant dense<0.000000e+00> : vector<16x8xf32>
    %344 = tpu.matmul %343, %2, %cst_319 {dimension_numbers = #tpu.dot_dimension_numbers<[1], [0], [0], [1], [0, 0, 1, 1], [], []>} : vector<16x72xbf16>, vector<72x8xbf16>, vector<16x8xf32> -> vector<16x8xf32>
    %345 = vector.broadcast %3 : vector<1x8xf32> to vector<16x8xf32>
    %346 = arith.addf %344, %345 : vector<16x8xf32>
    %cst_320 = arith.constant 0.000000e+00 : f32
    %347 = vector.broadcast %cst_320 : f32 to vector<16x8xf32>
    %348 = arith.maximumf %346, %347 : vector<16x8xf32>
    %349 = arith.truncf %348 : vector<16x8xf32> to vector<16x8xbf16>
    %cst_321 = arith.constant dense<0.000000e+00> : vector<16x32xf32>
    %350 = tpu.matmul %349, %4, %cst_321 {dimension_numbers = #tpu.dot_dimension_numbers<[1], [0], [0], [1], [0, 0, 1, 1], [], []>} : vector<16x8xbf16>, vector<8x32xbf16>, vector<16x32xf32> -> vector<16x32xf32>
    %351 = vector.broadcast %5 : vector<1x32xf32> to vector<16x32xf32>
    %352 = arith.addf %350, %351 : vector<16x32xf32>
    %c0_322 = arith.constant 0 : index
    %c4_323 = arith.constant 4 : index
    %c0_324 = arith.constant 0 : index
    %c0_325 = arith.constant 0 : index
    %353 = vector.load %arg1[%c0_322, %c4_323, %c0_324, %c0_325] : memref<1x16x16x32xbf16, #tpu.memory_space<vmem>>, vector<1x1x16x32xbf16>
    %354 = vector.shape_cast %353 : vector<1x1x16x32xbf16> to vector<16x32xbf16>
    %355 = arith.extf %354 : vector<16x32xbf16> to vector<16x32xf32>
    %356 = arith.addf %352, %355 : vector<16x32xf32>
    %cst_326 = arith.constant 0.000000e+00 : f32
    %357 = vector.broadcast %cst_326 : f32 to vector<16x32xf32>
    %358 = arith.maximumf %356, %357 : vector<16x32xf32>
    %359 = arith.truncf %358 : vector<16x32xf32> to vector<16x32xbf16>
    %c0_327 = arith.constant 0 : index
    %c64 = arith.constant 64 : index
    %c0_328 = arith.constant 0 : index
    %360 = vector.load %arg8[%c0_327, %c64, %c0_328] : memref<1x256x32xbf16, #tpu.memory_space<vmem>>, vector<1x16x32xbf16>
    %361 = vector.shape_cast %360 : vector<1x16x32xbf16> to vector<16x32xbf16>
    %362 = vector.shape_cast %359 : vector<16x32xbf16> to vector<1x16x32xbf16>
    tpu.vector_store %arg8[%c0_327, %c64, %c0_328], %362 {strides = array<i32>} : memref<1x256x32xbf16, #tpu.memory_space<vmem>>, vector<1x16x32xbf16>,
    %c5_329 = arith.constant 5 : index
    %c0_330 = arith.constant 0 : index
    %c0_331 = arith.constant 0 : index
    %363 = vector.load %arg9[%c5_329, %c0_330, %c0_331] : memref<18x18x8xf32, #tpu.memory_space<vmem>>, vector<1x16x8xf32>
    %364 = vector.shape_cast %363 : vector<1x16x8xf32> to vector<16x8xf32>
    %c5_332 = arith.constant 5 : index
    %c1_333 = arith.constant 1 : index
    %c0_334 = arith.constant 0 : index
    %365 = vector.load %arg9[%c5_332, %c1_333, %c0_334] : memref<18x18x8xf32, #tpu.memory_space<vmem>>, vector<1x16x8xf32>
    %366 = vector.shape_cast %365 : vector<1x16x8xf32> to vector<16x8xf32>
    %c5_335 = arith.constant 5 : index
    %c2_336 = arith.constant 2 : index
    %c0_337 = arith.constant 0 : index
    %367 = vector.load %arg9[%c5_335, %c2_336, %c0_337] : memref<18x18x8xf32, #tpu.memory_space<vmem>>, vector<1x16x8xf32>
    %368 = vector.shape_cast %367 : vector<1x16x8xf32> to vector<16x8xf32>
    %c6_338 = arith.constant 6 : index
    %c0_339 = arith.constant 0 : index
    %c0_340 = arith.constant 0 : index
    %369 = vector.load %arg9[%c6_338, %c0_339, %c0_340] : memref<18x18x8xf32, #tpu.memory_space<vmem>>, vector<1x16x8xf32>
    %370 = vector.shape_cast %369 : vector<1x16x8xf32> to vector<16x8xf32>
    %c6_341 = arith.constant 6 : index
    %c1_342 = arith.constant 1 : index
    %c0_343 = arith.constant 0 : index
    %371 = vector.load %arg9[%c6_341, %c1_342, %c0_343] : memref<18x18x8xf32, #tpu.memory_space<vmem>>, vector<1x16x8xf32>
    %372 = vector.shape_cast %371 : vector<1x16x8xf32> to vector<16x8xf32>
    %c6_344 = arith.constant 6 : index
    %c2_345 = arith.constant 2 : index
    %c0_346 = arith.constant 0 : index
    %373 = vector.load %arg9[%c6_344, %c2_345, %c0_346] : memref<18x18x8xf32, #tpu.memory_space<vmem>>, vector<1x16x8xf32>
    %374 = vector.shape_cast %373 : vector<1x16x8xf32> to vector<16x8xf32>
    %c7_347 = arith.constant 7 : index
    %c0_348 = arith.constant 0 : index
    %c0_349 = arith.constant 0 : index
    %375 = vector.load %arg9[%c7_347, %c0_348, %c0_349] : memref<18x18x8xf32, #tpu.memory_space<vmem>>, vector<1x16x8xf32>
    %376 = vector.shape_cast %375 : vector<1x16x8xf32> to vector<16x8xf32>
    %c7_350 = arith.constant 7 : index
    %c1_351 = arith.constant 1 : index
    %c0_352 = arith.constant 0 : index
    %377 = vector.load %arg9[%c7_350, %c1_351, %c0_352] : memref<18x18x8xf32, #tpu.memory_space<vmem>>, vector<1x16x8xf32>
    %378 = vector.shape_cast %377 : vector<1x16x8xf32> to vector<16x8xf32>
    %c7_353 = arith.constant 7 : index
    %c2_354 = arith.constant 2 : index
    %c0_355 = arith.constant 0 : index
    %379 = vector.load %arg9[%c7_353, %c2_354, %c0_355] : memref<18x18x8xf32, #tpu.memory_space<vmem>>, vector<1x16x8xf32>
    %380 = vector.shape_cast %379 : vector<1x16x8xf32> to vector<16x8xf32>
    %381 = tpu.concatenate %364, %366, %368, %370, %372, %374, %376, %378, %380 in 1 : vector<16x8xf32>, vector<16x8xf32>, vector<16x8xf32>, vector<16x8xf32>, vector<16x8xf32>, vector<16x8xf32>, vector<16x8xf32>, vector<16x8xf32>, vector<16x8xf32> -> vector<16x72xf32>
    %382 = arith.truncf %381 : vector<16x72xf32> to vector<16x72xbf16>
    %cst_356 = arith.constant dense<0.000000e+00> : vector<16x8xf32>
    %383 = tpu.matmul %382, %2, %cst_356 {dimension_numbers = #tpu.dot_dimension_numbers<[1], [0], [0], [1], [0, 0, 1, 1], [], []>} : vector<16x72xbf16>, vector<72x8xbf16>, vector<16x8xf32> -> vector<16x8xf32>
    %384 = vector.broadcast %3 : vector<1x8xf32> to vector<16x8xf32>
    %385 = arith.addf %383, %384 : vector<16x8xf32>
    %cst_357 = arith.constant 0.000000e+00 : f32
    %386 = vector.broadcast %cst_357 : f32 to vector<16x8xf32>
    %387 = arith.maximumf %385, %386 : vector<16x8xf32>
    %388 = arith.truncf %387 : vector<16x8xf32> to vector<16x8xbf16>
    %cst_358 = arith.constant dense<0.000000e+00> : vector<16x32xf32>
    %389 = tpu.matmul %388, %4, %cst_358 {dimension_numbers = #tpu.dot_dimension_numbers<[1], [0], [0], [1], [0, 0, 1, 1], [], []>} : vector<16x8xbf16>, vector<8x32xbf16>, vector<16x32xf32> -> vector<16x32xf32>
    %390 = vector.broadcast %5 : vector<1x32xf32> to vector<16x32xf32>
    %391 = arith.addf %389, %390 : vector<16x32xf32>
    %c0_359 = arith.constant 0 : index
    %c5_360 = arith.constant 5 : index
    %c0_361 = arith.constant 0 : index
    %c0_362 = arith.constant 0 : index
    %392 = vector.load %arg1[%c0_359, %c5_360, %c0_361, %c0_362] : memref<1x16x16x32xbf16, #tpu.memory_space<vmem>>, vector<1x1x16x32xbf16>
    %393 = vector.shape_cast %392 : vector<1x1x16x32xbf16> to vector<16x32xbf16>
    %394 = arith.extf %393 : vector<16x32xbf16> to vector<16x32xf32>
    %395 = arith.addf %391, %394 : vector<16x32xf32>
    %cst_363 = arith.constant 0.000000e+00 : f32
    %396 = vector.broadcast %cst_363 : f32 to vector<16x32xf32>
    %397 = arith.maximumf %395, %396 : vector<16x32xf32>
    %398 = arith.truncf %397 : vector<16x32xf32> to vector<16x32xbf16>
    %c0_364 = arith.constant 0 : index
    %c80 = arith.constant 80 : index
    %c0_365 = arith.constant 0 : index
    %399 = vector.load %arg8[%c0_364, %c80, %c0_365] : memref<1x256x32xbf16, #tpu.memory_space<vmem>>, vector<1x16x32xbf16>
    %400 = vector.shape_cast %399 : vector<1x16x32xbf16> to vector<16x32xbf16>
    %401 = vector.shape_cast %398 : vector<16x32xbf16> to vector<1x16x32xbf16>
    tpu.vector_store %arg8[%c0_364, %c80, %c0_365], %401 {strides = array<i32>} : memref<1x256x32xbf16, #tpu.memory_space<vmem>>, vector<1x16x32xbf16>,
    %c6_366 = arith.constant 6 : index
    %c0_367 = arith.constant 0 : index
    %c0_368 = arith.constant 0 : index
    %402 = vector.load %arg9[%c6_366, %c0_367, %c0_368] : memref<18x18x8xf32, #tpu.memory_space<vmem>>, vector<1x16x8xf32>
    %403 = vector.shape_cast %402 : vector<1x16x8xf32> to vector<16x8xf32>
    %c6_369 = arith.constant 6 : index
    %c1_370 = arith.constant 1 : index
    %c0_371 = arith.constant 0 : index
    %404 = vector.load %arg9[%c6_369, %c1_370, %c0_371] : memref<18x18x8xf32, #tpu.memory_space<vmem>>, vector<1x16x8xf32>
    %405 = vector.shape_cast %404 : vector<1x16x8xf32> to vector<16x8xf32>
    %c6_372 = arith.constant 6 : index
    %c2_373 = arith.constant 2 : index
    %c0_374 = arith.constant 0 : index
    %406 = vector.load %arg9[%c6_372, %c2_373, %c0_374] : memref<18x18x8xf32, #tpu.memory_space<vmem>>, vector<1x16x8xf32>
    %407 = vector.shape_cast %406 : vector<1x16x8xf32> to vector<16x8xf32>
    %c7_375 = arith.constant 7 : index
    %c0_376 = arith.constant 0 : index
    %c0_377 = arith.constant 0 : index
    %408 = vector.load %arg9[%c7_375, %c0_376, %c0_377] : memref<18x18x8xf32, #tpu.memory_space<vmem>>, vector<1x16x8xf32>
    %409 = vector.shape_cast %408 : vector<1x16x8xf32> to vector<16x8xf32>
    %c7_378 = arith.constant 7 : index
    %c1_379 = arith.constant 1 : index
    %c0_380 = arith.constant 0 : index
    %410 = vector.load %arg9[%c7_378, %c1_379, %c0_380] : memref<18x18x8xf32, #tpu.memory_space<vmem>>, vector<1x16x8xf32>
    %411 = vector.shape_cast %410 : vector<1x16x8xf32> to vector<16x8xf32>
    %c7_381 = arith.constant 7 : index
    %c2_382 = arith.constant 2 : index
    %c0_383 = arith.constant 0 : index
    %412 = vector.load %arg9[%c7_381, %c2_382, %c0_383] : memref<18x18x8xf32, #tpu.memory_space<vmem>>, vector<1x16x8xf32>
    %413 = vector.shape_cast %412 : vector<1x16x8xf32> to vector<16x8xf32>
    %c8_384 = arith.constant 8 : index
    %c0_385 = arith.constant 0 : index
    %c0_386 = arith.constant 0 : index
    %414 = vector.load %arg9[%c8_384, %c0_385, %c0_386] : memref<18x18x8xf32, #tpu.memory_space<vmem>>, vector<1x16x8xf32>
    %415 = vector.shape_cast %414 : vector<1x16x8xf32> to vector<16x8xf32>
    %c8_387 = arith.constant 8 : index
    %c1_388 = arith.constant 1 : index
    %c0_389 = arith.constant 0 : index
    %416 = vector.load %arg9[%c8_387, %c1_388, %c0_389] : memref<18x18x8xf32, #tpu.memory_space<vmem>>, vector<1x16x8xf32>
    %417 = vector.shape_cast %416 : vector<1x16x8xf32> to vector<16x8xf32>
    %c8_390 = arith.constant 8 : index
    %c2_391 = arith.constant 2 : index
    %c0_392 = arith.constant 0 : index
    %418 = vector.load %arg9[%c8_390, %c2_391, %c0_392] : memref<18x18x8xf32, #tpu.memory_space<vmem>>, vector<1x16x8xf32>
    %419 = vector.shape_cast %418 : vector<1x16x8xf32> to vector<16x8xf32>
    %420 = tpu.concatenate %403, %405, %407, %409, %411, %413, %415, %417, %419 in 1 : vector<16x8xf32>, vector<16x8xf32>, vector<16x8xf32>, vector<16x8xf32>, vector<16x8xf32>, vector<16x8xf32>, vector<16x8xf32>, vector<16x8xf32>, vector<16x8xf32> -> vector<16x72xf32>
    %421 = arith.truncf %420 : vector<16x72xf32> to vector<16x72xbf16>
    %cst_393 = arith.constant dense<0.000000e+00> : vector<16x8xf32>
    %422 = tpu.matmul %421, %2, %cst_393 {dimension_numbers = #tpu.dot_dimension_numbers<[1], [0], [0], [1], [0, 0, 1, 1], [], []>} : vector<16x72xbf16>, vector<72x8xbf16>, vector<16x8xf32> -> vector<16x8xf32>
    %423 = vector.broadcast %3 : vector<1x8xf32> to vector<16x8xf32>
    %424 = arith.addf %422, %423 : vector<16x8xf32>
    %cst_394 = arith.constant 0.000000e+00 : f32
    %425 = vector.broadcast %cst_394 : f32 to vector<16x8xf32>
    %426 = arith.maximumf %424, %425 : vector<16x8xf32>
    %427 = arith.truncf %426 : vector<16x8xf32> to vector<16x8xbf16>
    %cst_395 = arith.constant dense<0.000000e+00> : vector<16x32xf32>
    %428 = tpu.matmul %427, %4, %cst_395 {dimension_numbers = #tpu.dot_dimension_numbers<[1], [0], [0], [1], [0, 0, 1, 1], [], []>} : vector<16x8xbf16>, vector<8x32xbf16>, vector<16x32xf32> -> vector<16x32xf32>
    %429 = vector.broadcast %5 : vector<1x32xf32> to vector<16x32xf32>
    %430 = arith.addf %428, %429 : vector<16x32xf32>
    %c0_396 = arith.constant 0 : index
    %c6_397 = arith.constant 6 : index
    %c0_398 = arith.constant 0 : index
    %c0_399 = arith.constant 0 : index
    %431 = vector.load %arg1[%c0_396, %c6_397, %c0_398, %c0_399] : memref<1x16x16x32xbf16, #tpu.memory_space<vmem>>, vector<1x1x16x32xbf16>
    %432 = vector.shape_cast %431 : vector<1x1x16x32xbf16> to vector<16x32xbf16>
    %433 = arith.extf %432 : vector<16x32xbf16> to vector<16x32xf32>
    %434 = arith.addf %430, %433 : vector<16x32xf32>
    %cst_400 = arith.constant 0.000000e+00 : f32
    %435 = vector.broadcast %cst_400 : f32 to vector<16x32xf32>
    %436 = arith.maximumf %434, %435 : vector<16x32xf32>
    %437 = arith.truncf %436 : vector<16x32xf32> to vector<16x32xbf16>
    %c0_401 = arith.constant 0 : index
    %c96 = arith.constant 96 : index
    %c0_402 = arith.constant 0 : index
    %438 = vector.load %arg8[%c0_401, %c96, %c0_402] : memref<1x256x32xbf16, #tpu.memory_space<vmem>>, vector<1x16x32xbf16>
    %439 = vector.shape_cast %438 : vector<1x16x32xbf16> to vector<16x32xbf16>
    %440 = vector.shape_cast %437 : vector<16x32xbf16> to vector<1x16x32xbf16>
    tpu.vector_store %arg8[%c0_401, %c96, %c0_402], %440 {strides = array<i32>} : memref<1x256x32xbf16, #tpu.memory_space<vmem>>, vector<1x16x32xbf16>,
    %c7_403 = arith.constant 7 : index
    %c0_404 = arith.constant 0 : index
    %c0_405 = arith.constant 0 : index
    %441 = vector.load %arg9[%c7_403, %c0_404, %c0_405] : memref<18x18x8xf32, #tpu.memory_space<vmem>>, vector<1x16x8xf32>
    %442 = vector.shape_cast %441 : vector<1x16x8xf32> to vector<16x8xf32>
    %c7_406 = arith.constant 7 : index
    %c1_407 = arith.constant 1 : index
    %c0_408 = arith.constant 0 : index
    %443 = vector.load %arg9[%c7_406, %c1_407, %c0_408] : memref<18x18x8xf32, #tpu.memory_space<vmem>>, vector<1x16x8xf32>
    %444 = vector.shape_cast %443 : vector<1x16x8xf32> to vector<16x8xf32>
    %c7_409 = arith.constant 7 : index
    %c2_410 = arith.constant 2 : index
    %c0_411 = arith.constant 0 : index
    %445 = vector.load %arg9[%c7_409, %c2_410, %c0_411] : memref<18x18x8xf32, #tpu.memory_space<vmem>>, vector<1x16x8xf32>
    %446 = vector.shape_cast %445 : vector<1x16x8xf32> to vector<16x8xf32>
    %c8_412 = arith.constant 8 : index
    %c0_413 = arith.constant 0 : index
    %c0_414 = arith.constant 0 : index
    %447 = vector.load %arg9[%c8_412, %c0_413, %c0_414] : memref<18x18x8xf32, #tpu.memory_space<vmem>>, vector<1x16x8xf32>
    %448 = vector.shape_cast %447 : vector<1x16x8xf32> to vector<16x8xf32>
    %c8_415 = arith.constant 8 : index
    %c1_416 = arith.constant 1 : index
    %c0_417 = arith.constant 0 : index
    %449 = vector.load %arg9[%c8_415, %c1_416, %c0_417] : memref<18x18x8xf32, #tpu.memory_space<vmem>>, vector<1x16x8xf32>
    %450 = vector.shape_cast %449 : vector<1x16x8xf32> to vector<16x8xf32>
    %c8_418 = arith.constant 8 : index
    %c2_419 = arith.constant 2 : index
    %c0_420 = arith.constant 0 : index
    %451 = vector.load %arg9[%c8_418, %c2_419, %c0_420] : memref<18x18x8xf32, #tpu.memory_space<vmem>>, vector<1x16x8xf32>
    %452 = vector.shape_cast %451 : vector<1x16x8xf32> to vector<16x8xf32>
    %c9_421 = arith.constant 9 : index
    %c0_422 = arith.constant 0 : index
    %c0_423 = arith.constant 0 : index
    %453 = vector.load %arg9[%c9_421, %c0_422, %c0_423] : memref<18x18x8xf32, #tpu.memory_space<vmem>>, vector<1x16x8xf32>
    %454 = vector.shape_cast %453 : vector<1x16x8xf32> to vector<16x8xf32>
    %c9_424 = arith.constant 9 : index
    %c1_425 = arith.constant 1 : index
    %c0_426 = arith.constant 0 : index
    %455 = vector.load %arg9[%c9_424, %c1_425, %c0_426] : memref<18x18x8xf32, #tpu.memory_space<vmem>>, vector<1x16x8xf32>
    %456 = vector.shape_cast %455 : vector<1x16x8xf32> to vector<16x8xf32>
    %c9_427 = arith.constant 9 : index
    %c2_428 = arith.constant 2 : index
    %c0_429 = arith.constant 0 : index
    %457 = vector.load %arg9[%c9_427, %c2_428, %c0_429] : memref<18x18x8xf32, #tpu.memory_space<vmem>>, vector<1x16x8xf32>
    %458 = vector.shape_cast %457 : vector<1x16x8xf32> to vector<16x8xf32>
    %459 = tpu.concatenate %442, %444, %446, %448, %450, %452, %454, %456, %458 in 1 : vector<16x8xf32>, vector<16x8xf32>, vector<16x8xf32>, vector<16x8xf32>, vector<16x8xf32>, vector<16x8xf32>, vector<16x8xf32>, vector<16x8xf32>, vector<16x8xf32> -> vector<16x72xf32>
    %460 = arith.truncf %459 : vector<16x72xf32> to vector<16x72xbf16>
    %cst_430 = arith.constant dense<0.000000e+00> : vector<16x8xf32>
    %461 = tpu.matmul %460, %2, %cst_430 {dimension_numbers = #tpu.dot_dimension_numbers<[1], [0], [0], [1], [0, 0, 1, 1], [], []>} : vector<16x72xbf16>, vector<72x8xbf16>, vector<16x8xf32> -> vector<16x8xf32>
    %462 = vector.broadcast %3 : vector<1x8xf32> to vector<16x8xf32>
    %463 = arith.addf %461, %462 : vector<16x8xf32>
    %cst_431 = arith.constant 0.000000e+00 : f32
    %464 = vector.broadcast %cst_431 : f32 to vector<16x8xf32>
    %465 = arith.maximumf %463, %464 : vector<16x8xf32>
    %466 = arith.truncf %465 : vector<16x8xf32> to vector<16x8xbf16>
    %cst_432 = arith.constant dense<0.000000e+00> : vector<16x32xf32>
    %467 = tpu.matmul %466, %4, %cst_432 {dimension_numbers = #tpu.dot_dimension_numbers<[1], [0], [0], [1], [0, 0, 1, 1], [], []>} : vector<16x8xbf16>, vector<8x32xbf16>, vector<16x32xf32> -> vector<16x32xf32>
    %468 = vector.broadcast %5 : vector<1x32xf32> to vector<16x32xf32>
    %469 = arith.addf %467, %468 : vector<16x32xf32>
    %c0_433 = arith.constant 0 : index
    %c7_434 = arith.constant 7 : index
    %c0_435 = arith.constant 0 : index
    %c0_436 = arith.constant 0 : index
    %470 = vector.load %arg1[%c0_433, %c7_434, %c0_435, %c0_436] : memref<1x16x16x32xbf16, #tpu.memory_space<vmem>>, vector<1x1x16x32xbf16>
    %471 = vector.shape_cast %470 : vector<1x1x16x32xbf16> to vector<16x32xbf16>
    %472 = arith.extf %471 : vector<16x32xbf16> to vector<16x32xf32>
    %473 = arith.addf %469, %472 : vector<16x32xf32>
    %cst_437 = arith.constant 0.000000e+00 : f32
    %474 = vector.broadcast %cst_437 : f32 to vector<16x32xf32>
    %475 = arith.maximumf %473, %474 : vector<16x32xf32>
    %476 = arith.truncf %475 : vector<16x32xf32> to vector<16x32xbf16>
    %c0_438 = arith.constant 0 : index
    %c112 = arith.constant 112 : index
    %c0_439 = arith.constant 0 : index
    %477 = vector.load %arg8[%c0_438, %c112, %c0_439] : memref<1x256x32xbf16, #tpu.memory_space<vmem>>, vector<1x16x32xbf16>
    %478 = vector.shape_cast %477 : vector<1x16x32xbf16> to vector<16x32xbf16>
    %479 = vector.shape_cast %476 : vector<16x32xbf16> to vector<1x16x32xbf16>
    tpu.vector_store %arg8[%c0_438, %c112, %c0_439], %479 {strides = array<i32>} : memref<1x256x32xbf16, #tpu.memory_space<vmem>>, vector<1x16x32xbf16>,
    %c8_440 = arith.constant 8 : index
    %c0_441 = arith.constant 0 : index
    %c0_442 = arith.constant 0 : index
    %480 = vector.load %arg9[%c8_440, %c0_441, %c0_442] : memref<18x18x8xf32, #tpu.memory_space<vmem>>, vector<1x16x8xf32>
    %481 = vector.shape_cast %480 : vector<1x16x8xf32> to vector<16x8xf32>
    %c8_443 = arith.constant 8 : index
    %c1_444 = arith.constant 1 : index
    %c0_445 = arith.constant 0 : index
    %482 = vector.load %arg9[%c8_443, %c1_444, %c0_445] : memref<18x18x8xf32, #tpu.memory_space<vmem>>, vector<1x16x8xf32>
    %483 = vector.shape_cast %482 : vector<1x16x8xf32> to vector<16x8xf32>
    %c8_446 = arith.constant 8 : index
    %c2_447 = arith.constant 2 : index
    %c0_448 = arith.constant 0 : index
    %484 = vector.load %arg9[%c8_446, %c2_447, %c0_448] : memref<18x18x8xf32, #tpu.memory_space<vmem>>, vector<1x16x8xf32>
    %485 = vector.shape_cast %484 : vector<1x16x8xf32> to vector<16x8xf32>
    %c9_449 = arith.constant 9 : index
    %c0_450 = arith.constant 0 : index
    %c0_451 = arith.constant 0 : index
    %486 = vector.load %arg9[%c9_449, %c0_450, %c0_451] : memref<18x18x8xf32, #tpu.memory_space<vmem>>, vector<1x16x8xf32>
    %487 = vector.shape_cast %486 : vector<1x16x8xf32> to vector<16x8xf32>
    %c9_452 = arith.constant 9 : index
    %c1_453 = arith.constant 1 : index
    %c0_454 = arith.constant 0 : index
    %488 = vector.load %arg9[%c9_452, %c1_453, %c0_454] : memref<18x18x8xf32, #tpu.memory_space<vmem>>, vector<1x16x8xf32>
    %489 = vector.shape_cast %488 : vector<1x16x8xf32> to vector<16x8xf32>
    %c9_455 = arith.constant 9 : index
    %c2_456 = arith.constant 2 : index
    %c0_457 = arith.constant 0 : index
    %490 = vector.load %arg9[%c9_455, %c2_456, %c0_457] : memref<18x18x8xf32, #tpu.memory_space<vmem>>, vector<1x16x8xf32>
    %491 = vector.shape_cast %490 : vector<1x16x8xf32> to vector<16x8xf32>
    %c10_458 = arith.constant 10 : index
    %c0_459 = arith.constant 0 : index
    %c0_460 = arith.constant 0 : index
    %492 = vector.load %arg9[%c10_458, %c0_459, %c0_460] : memref<18x18x8xf32, #tpu.memory_space<vmem>>, vector<1x16x8xf32>
    %493 = vector.shape_cast %492 : vector<1x16x8xf32> to vector<16x8xf32>
    %c10_461 = arith.constant 10 : index
    %c1_462 = arith.constant 1 : index
    %c0_463 = arith.constant 0 : index
    %494 = vector.load %arg9[%c10_461, %c1_462, %c0_463] : memref<18x18x8xf32, #tpu.memory_space<vmem>>, vector<1x16x8xf32>
    %495 = vector.shape_cast %494 : vector<1x16x8xf32> to vector<16x8xf32>
    %c10_464 = arith.constant 10 : index
    %c2_465 = arith.constant 2 : index
    %c0_466 = arith.constant 0 : index
    %496 = vector.load %arg9[%c10_464, %c2_465, %c0_466] : memref<18x18x8xf32, #tpu.memory_space<vmem>>, vector<1x16x8xf32>
    %497 = vector.shape_cast %496 : vector<1x16x8xf32> to vector<16x8xf32>
    %498 = tpu.concatenate %481, %483, %485, %487, %489, %491, %493, %495, %497 in 1 : vector<16x8xf32>, vector<16x8xf32>, vector<16x8xf32>, vector<16x8xf32>, vector<16x8xf32>, vector<16x8xf32>, vector<16x8xf32>, vector<16x8xf32>, vector<16x8xf32> -> vector<16x72xf32>
    %499 = arith.truncf %498 : vector<16x72xf32> to vector<16x72xbf16>
    %cst_467 = arith.constant dense<0.000000e+00> : vector<16x8xf32>
    %500 = tpu.matmul %499, %2, %cst_467 {dimension_numbers = #tpu.dot_dimension_numbers<[1], [0], [0], [1], [0, 0, 1, 1], [], []>} : vector<16x72xbf16>, vector<72x8xbf16>, vector<16x8xf32> -> vector<16x8xf32>
    %501 = vector.broadcast %3 : vector<1x8xf32> to vector<16x8xf32>
    %502 = arith.addf %500, %501 : vector<16x8xf32>
    %cst_468 = arith.constant 0.000000e+00 : f32
    %503 = vector.broadcast %cst_468 : f32 to vector<16x8xf32>
    %504 = arith.maximumf %502, %503 : vector<16x8xf32>
    %505 = arith.truncf %504 : vector<16x8xf32> to vector<16x8xbf16>
    %cst_469 = arith.constant dense<0.000000e+00> : vector<16x32xf32>
    %506 = tpu.matmul %505, %4, %cst_469 {dimension_numbers = #tpu.dot_dimension_numbers<[1], [0], [0], [1], [0, 0, 1, 1], [], []>} : vector<16x8xbf16>, vector<8x32xbf16>, vector<16x32xf32> -> vector<16x32xf32>
    %507 = vector.broadcast %5 : vector<1x32xf32> to vector<16x32xf32>
    %508 = arith.addf %506, %507 : vector<16x32xf32>
    %c0_470 = arith.constant 0 : index
    %c8_471 = arith.constant 8 : index
    %c0_472 = arith.constant 0 : index
    %c0_473 = arith.constant 0 : index
    %509 = vector.load %arg1[%c0_470, %c8_471, %c0_472, %c0_473] : memref<1x16x16x32xbf16, #tpu.memory_space<vmem>>, vector<1x1x16x32xbf16>
    %510 = vector.shape_cast %509 : vector<1x1x16x32xbf16> to vector<16x32xbf16>
    %511 = arith.extf %510 : vector<16x32xbf16> to vector<16x32xf32>
    %512 = arith.addf %508, %511 : vector<16x32xf32>
    %cst_474 = arith.constant 0.000000e+00 : f32
    %513 = vector.broadcast %cst_474 : f32 to vector<16x32xf32>
    %514 = arith.maximumf %512, %513 : vector<16x32xf32>
    %515 = arith.truncf %514 : vector<16x32xf32> to vector<16x32xbf16>
    %c0_475 = arith.constant 0 : index
    %c128 = arith.constant 128 : index
    %c0_476 = arith.constant 0 : index
    %516 = vector.load %arg8[%c0_475, %c128, %c0_476] : memref<1x256x32xbf16, #tpu.memory_space<vmem>>, vector<1x16x32xbf16>
    %517 = vector.shape_cast %516 : vector<1x16x32xbf16> to vector<16x32xbf16>
    %518 = vector.shape_cast %515 : vector<16x32xbf16> to vector<1x16x32xbf16>
    tpu.vector_store %arg8[%c0_475, %c128, %c0_476], %518 {strides = array<i32>} : memref<1x256x32xbf16, #tpu.memory_space<vmem>>, vector<1x16x32xbf16>,
    %c9_477 = arith.constant 9 : index
    %c0_478 = arith.constant 0 : index
    %c0_479 = arith.constant 0 : index
    %519 = vector.load %arg9[%c9_477, %c0_478, %c0_479] : memref<18x18x8xf32, #tpu.memory_space<vmem>>, vector<1x16x8xf32>
    %520 = vector.shape_cast %519 : vector<1x16x8xf32> to vector<16x8xf32>
    %c9_480 = arith.constant 9 : index
    %c1_481 = arith.constant 1 : index
    %c0_482 = arith.constant 0 : index
    %521 = vector.load %arg9[%c9_480, %c1_481, %c0_482] : memref<18x18x8xf32, #tpu.memory_space<vmem>>, vector<1x16x8xf32>
    %522 = vector.shape_cast %521 : vector<1x16x8xf32> to vector<16x8xf32>
    %c9_483 = arith.constant 9 : index
    %c2_484 = arith.constant 2 : index
    %c0_485 = arith.constant 0 : index
    %523 = vector.load %arg9[%c9_483, %c2_484, %c0_485] : memref<18x18x8xf32, #tpu.memory_space<vmem>>, vector<1x16x8xf32>
    %524 = vector.shape_cast %523 : vector<1x16x8xf32> to vector<16x8xf32>
    %c10_486 = arith.constant 10 : index
    %c0_487 = arith.constant 0 : index
    %c0_488 = arith.constant 0 : index
    %525 = vector.load %arg9[%c10_486, %c0_487, %c0_488] : memref<18x18x8xf32, #tpu.memory_space<vmem>>, vector<1x16x8xf32>
    %526 = vector.shape_cast %525 : vector<1x16x8xf32> to vector<16x8xf32>
    %c10_489 = arith.constant 10 : index
    %c1_490 = arith.constant 1 : index
    %c0_491 = arith.constant 0 : index
    %527 = vector.load %arg9[%c10_489, %c1_490, %c0_491] : memref<18x18x8xf32, #tpu.memory_space<vmem>>, vector<1x16x8xf32>
    %528 = vector.shape_cast %527 : vector<1x16x8xf32> to vector<16x8xf32>
    %c10_492 = arith.constant 10 : index
    %c2_493 = arith.constant 2 : index
    %c0_494 = arith.constant 0 : index
    %529 = vector.load %arg9[%c10_492, %c2_493, %c0_494] : memref<18x18x8xf32, #tpu.memory_space<vmem>>, vector<1x16x8xf32>
    %530 = vector.shape_cast %529 : vector<1x16x8xf32> to vector<16x8xf32>
    %c11_495 = arith.constant 11 : index
    %c0_496 = arith.constant 0 : index
    %c0_497 = arith.constant 0 : index
    %531 = vector.load %arg9[%c11_495, %c0_496, %c0_497] : memref<18x18x8xf32, #tpu.memory_space<vmem>>, vector<1x16x8xf32>
    %532 = vector.shape_cast %531 : vector<1x16x8xf32> to vector<16x8xf32>
    %c11_498 = arith.constant 11 : index
    %c1_499 = arith.constant 1 : index
    %c0_500 = arith.constant 0 : index
    %533 = vector.load %arg9[%c11_498, %c1_499, %c0_500] : memref<18x18x8xf32, #tpu.memory_space<vmem>>, vector<1x16x8xf32>
    %534 = vector.shape_cast %533 : vector<1x16x8xf32> to vector<16x8xf32>
    %c11_501 = arith.constant 11 : index
    %c2_502 = arith.constant 2 : index
    %c0_503 = arith.constant 0 : index
    %535 = vector.load %arg9[%c11_501, %c2_502, %c0_503] : memref<18x18x8xf32, #tpu.memory_space<vmem>>, vector<1x16x8xf32>
    %536 = vector.shape_cast %535 : vector<1x16x8xf32> to vector<16x8xf32>
    %537 = tpu.concatenate %520, %522, %524, %526, %528, %530, %532, %534, %536 in 1 : vector<16x8xf32>, vector<16x8xf32>, vector<16x8xf32>, vector<16x8xf32>, vector<16x8xf32>, vector<16x8xf32>, vector<16x8xf32>, vector<16x8xf32>, vector<16x8xf32> -> vector<16x72xf32>
    %538 = arith.truncf %537 : vector<16x72xf32> to vector<16x72xbf16>
    %cst_504 = arith.constant dense<0.000000e+00> : vector<16x8xf32>
    %539 = tpu.matmul %538, %2, %cst_504 {dimension_numbers = #tpu.dot_dimension_numbers<[1], [0], [0], [1], [0, 0, 1, 1], [], []>} : vector<16x72xbf16>, vector<72x8xbf16>, vector<16x8xf32> -> vector<16x8xf32>
    %540 = vector.broadcast %3 : vector<1x8xf32> to vector<16x8xf32>
    %541 = arith.addf %539, %540 : vector<16x8xf32>
    %cst_505 = arith.constant 0.000000e+00 : f32
    %542 = vector.broadcast %cst_505 : f32 to vector<16x8xf32>
    %543 = arith.maximumf %541, %542 : vector<16x8xf32>
    %544 = arith.truncf %543 : vector<16x8xf32> to vector<16x8xbf16>
    %cst_506 = arith.constant dense<0.000000e+00> : vector<16x32xf32>
    %545 = tpu.matmul %544, %4, %cst_506 {dimension_numbers = #tpu.dot_dimension_numbers<[1], [0], [0], [1], [0, 0, 1, 1], [], []>} : vector<16x8xbf16>, vector<8x32xbf16>, vector<16x32xf32> -> vector<16x32xf32>
    %546 = vector.broadcast %5 : vector<1x32xf32> to vector<16x32xf32>
    %547 = arith.addf %545, %546 : vector<16x32xf32>
    %c0_507 = arith.constant 0 : index
    %c9_508 = arith.constant 9 : index
    %c0_509 = arith.constant 0 : index
    %c0_510 = arith.constant 0 : index
    %548 = vector.load %arg1[%c0_507, %c9_508, %c0_509, %c0_510] : memref<1x16x16x32xbf16, #tpu.memory_space<vmem>>, vector<1x1x16x32xbf16>
    %549 = vector.shape_cast %548 : vector<1x1x16x32xbf16> to vector<16x32xbf16>
    %550 = arith.extf %549 : vector<16x32xbf16> to vector<16x32xf32>
    %551 = arith.addf %547, %550 : vector<16x32xf32>
    %cst_511 = arith.constant 0.000000e+00 : f32
    %552 = vector.broadcast %cst_511 : f32 to vector<16x32xf32>
    %553 = arith.maximumf %551, %552 : vector<16x32xf32>
    %554 = arith.truncf %553 : vector<16x32xf32> to vector<16x32xbf16>
    %c0_512 = arith.constant 0 : index
    %c144 = arith.constant 144 : index
    %c0_513 = arith.constant 0 : index
    %555 = vector.load %arg8[%c0_512, %c144, %c0_513] : memref<1x256x32xbf16, #tpu.memory_space<vmem>>, vector<1x16x32xbf16>
    %556 = vector.shape_cast %555 : vector<1x16x32xbf16> to vector<16x32xbf16>
    %557 = vector.shape_cast %554 : vector<16x32xbf16> to vector<1x16x32xbf16>
    tpu.vector_store %arg8[%c0_512, %c144, %c0_513], %557 {strides = array<i32>} : memref<1x256x32xbf16, #tpu.memory_space<vmem>>, vector<1x16x32xbf16>,
    %c10_514 = arith.constant 10 : index
    %c0_515 = arith.constant 0 : index
    %c0_516 = arith.constant 0 : index
    %558 = vector.load %arg9[%c10_514, %c0_515, %c0_516] : memref<18x18x8xf32, #tpu.memory_space<vmem>>, vector<1x16x8xf32>
    %559 = vector.shape_cast %558 : vector<1x16x8xf32> to vector<16x8xf32>
    %c10_517 = arith.constant 10 : index
    %c1_518 = arith.constant 1 : index
    %c0_519 = arith.constant 0 : index
    %560 = vector.load %arg9[%c10_517, %c1_518, %c0_519] : memref<18x18x8xf32, #tpu.memory_space<vmem>>, vector<1x16x8xf32>
    %561 = vector.shape_cast %560 : vector<1x16x8xf32> to vector<16x8xf32>
    %c10_520 = arith.constant 10 : index
    %c2_521 = arith.constant 2 : index
    %c0_522 = arith.constant 0 : index
    %562 = vector.load %arg9[%c10_520, %c2_521, %c0_522] : memref<18x18x8xf32, #tpu.memory_space<vmem>>, vector<1x16x8xf32>
    %563 = vector.shape_cast %562 : vector<1x16x8xf32> to vector<16x8xf32>
    %c11_523 = arith.constant 11 : index
    %c0_524 = arith.constant 0 : index
    %c0_525 = arith.constant 0 : index
    %564 = vector.load %arg9[%c11_523, %c0_524, %c0_525] : memref<18x18x8xf32, #tpu.memory_space<vmem>>, vector<1x16x8xf32>
    %565 = vector.shape_cast %564 : vector<1x16x8xf32> to vector<16x8xf32>
    %c11_526 = arith.constant 11 : index
    %c1_527 = arith.constant 1 : index
    %c0_528 = arith.constant 0 : index
    %566 = vector.load %arg9[%c11_526, %c1_527, %c0_528] : memref<18x18x8xf32, #tpu.memory_space<vmem>>, vector<1x16x8xf32>
    %567 = vector.shape_cast %566 : vector<1x16x8xf32> to vector<16x8xf32>
    %c11_529 = arith.constant 11 : index
    %c2_530 = arith.constant 2 : index
    %c0_531 = arith.constant 0 : index
    %568 = vector.load %arg9[%c11_529, %c2_530, %c0_531] : memref<18x18x8xf32, #tpu.memory_space<vmem>>, vector<1x16x8xf32>
    %569 = vector.shape_cast %568 : vector<1x16x8xf32> to vector<16x8xf32>
    %c12_532 = arith.constant 12 : index
    %c0_533 = arith.constant 0 : index
    %c0_534 = arith.constant 0 : index
    %570 = vector.load %arg9[%c12_532, %c0_533, %c0_534] : memref<18x18x8xf32, #tpu.memory_space<vmem>>, vector<1x16x8xf32>
    %571 = vector.shape_cast %570 : vector<1x16x8xf32> to vector<16x8xf32>
    %c12_535 = arith.constant 12 : index
    %c1_536 = arith.constant 1 : index
    %c0_537 = arith.constant 0 : index
    %572 = vector.load %arg9[%c12_535, %c1_536, %c0_537] : memref<18x18x8xf32, #tpu.memory_space<vmem>>, vector<1x16x8xf32>
    %573 = vector.shape_cast %572 : vector<1x16x8xf32> to vector<16x8xf32>
    %c12_538 = arith.constant 12 : index
    %c2_539 = arith.constant 2 : index
    %c0_540 = arith.constant 0 : index
    %574 = vector.load %arg9[%c12_538, %c2_539, %c0_540] : memref<18x18x8xf32, #tpu.memory_space<vmem>>, vector<1x16x8xf32>
    %575 = vector.shape_cast %574 : vector<1x16x8xf32> to vector<16x8xf32>
    %576 = tpu.concatenate %559, %561, %563, %565, %567, %569, %571, %573, %575 in 1 : vector<16x8xf32>, vector<16x8xf32>, vector<16x8xf32>, vector<16x8xf32>, vector<16x8xf32>, vector<16x8xf32>, vector<16x8xf32>, vector<16x8xf32>, vector<16x8xf32> -> vector<16x72xf32>
    %577 = arith.truncf %576 : vector<16x72xf32> to vector<16x72xbf16>
    %cst_541 = arith.constant dense<0.000000e+00> : vector<16x8xf32>
    %578 = tpu.matmul %577, %2, %cst_541 {dimension_numbers = #tpu.dot_dimension_numbers<[1], [0], [0], [1], [0, 0, 1, 1], [], []>} : vector<16x72xbf16>, vector<72x8xbf16>, vector<16x8xf32> -> vector<16x8xf32>
    %579 = vector.broadcast %3 : vector<1x8xf32> to vector<16x8xf32>
    %580 = arith.addf %578, %579 : vector<16x8xf32>
    %cst_542 = arith.constant 0.000000e+00 : f32
    %581 = vector.broadcast %cst_542 : f32 to vector<16x8xf32>
    %582 = arith.maximumf %580, %581 : vector<16x8xf32>
    %583 = arith.truncf %582 : vector<16x8xf32> to vector<16x8xbf16>
    %cst_543 = arith.constant dense<0.000000e+00> : vector<16x32xf32>
    %584 = tpu.matmul %583, %4, %cst_543 {dimension_numbers = #tpu.dot_dimension_numbers<[1], [0], [0], [1], [0, 0, 1, 1], [], []>} : vector<16x8xbf16>, vector<8x32xbf16>, vector<16x32xf32> -> vector<16x32xf32>
    %585 = vector.broadcast %5 : vector<1x32xf32> to vector<16x32xf32>
    %586 = arith.addf %584, %585 : vector<16x32xf32>
    %c0_544 = arith.constant 0 : index
    %c10_545 = arith.constant 10 : index
    %c0_546 = arith.constant 0 : index
    %c0_547 = arith.constant 0 : index
    %587 = vector.load %arg1[%c0_544, %c10_545, %c0_546, %c0_547] : memref<1x16x16x32xbf16, #tpu.memory_space<vmem>>, vector<1x1x16x32xbf16>
    %588 = vector.shape_cast %587 : vector<1x1x16x32xbf16> to vector<16x32xbf16>
    %589 = arith.extf %588 : vector<16x32xbf16> to vector<16x32xf32>
    %590 = arith.addf %586, %589 : vector<16x32xf32>
    %cst_548 = arith.constant 0.000000e+00 : f32
    %591 = vector.broadcast %cst_548 : f32 to vector<16x32xf32>
    %592 = arith.maximumf %590, %591 : vector<16x32xf32>
    %593 = arith.truncf %592 : vector<16x32xf32> to vector<16x32xbf16>
    %c0_549 = arith.constant 0 : index
    %c160 = arith.constant 160 : index
    %c0_550 = arith.constant 0 : index
    %594 = vector.load %arg8[%c0_549, %c160, %c0_550] : memref<1x256x32xbf16, #tpu.memory_space<vmem>>, vector<1x16x32xbf16>
    %595 = vector.shape_cast %594 : vector<1x16x32xbf16> to vector<16x32xbf16>
    %596 = vector.shape_cast %593 : vector<16x32xbf16> to vector<1x16x32xbf16>
    tpu.vector_store %arg8[%c0_549, %c160, %c0_550], %596 {strides = array<i32>} : memref<1x256x32xbf16, #tpu.memory_space<vmem>>, vector<1x16x32xbf16>,
    %c11_551 = arith.constant 11 : index
    %c0_552 = arith.constant 0 : index
    %c0_553 = arith.constant 0 : index
    %597 = vector.load %arg9[%c11_551, %c0_552, %c0_553] : memref<18x18x8xf32, #tpu.memory_space<vmem>>, vector<1x16x8xf32>
    %598 = vector.shape_cast %597 : vector<1x16x8xf32> to vector<16x8xf32>
    %c11_554 = arith.constant 11 : index
    %c1_555 = arith.constant 1 : index
    %c0_556 = arith.constant 0 : index
    %599 = vector.load %arg9[%c11_554, %c1_555, %c0_556] : memref<18x18x8xf32, #tpu.memory_space<vmem>>, vector<1x16x8xf32>
    %600 = vector.shape_cast %599 : vector<1x16x8xf32> to vector<16x8xf32>
    %c11_557 = arith.constant 11 : index
    %c2_558 = arith.constant 2 : index
    %c0_559 = arith.constant 0 : index
    %601 = vector.load %arg9[%c11_557, %c2_558, %c0_559] : memref<18x18x8xf32, #tpu.memory_space<vmem>>, vector<1x16x8xf32>
    %602 = vector.shape_cast %601 : vector<1x16x8xf32> to vector<16x8xf32>
    %c12_560 = arith.constant 12 : index
    %c0_561 = arith.constant 0 : index
    %c0_562 = arith.constant 0 : index
    %603 = vector.load %arg9[%c12_560, %c0_561, %c0_562] : memref<18x18x8xf32, #tpu.memory_space<vmem>>, vector<1x16x8xf32>
    %604 = vector.shape_cast %603 : vector<1x16x8xf32> to vector<16x8xf32>
    %c12_563 = arith.constant 12 : index
    %c1_564 = arith.constant 1 : index
    %c0_565 = arith.constant 0 : index
    %605 = vector.load %arg9[%c12_563, %c1_564, %c0_565] : memref<18x18x8xf32, #tpu.memory_space<vmem>>, vector<1x16x8xf32>
    %606 = vector.shape_cast %605 : vector<1x16x8xf32> to vector<16x8xf32>
    %c12_566 = arith.constant 12 : index
    %c2_567 = arith.constant 2 : index
    %c0_568 = arith.constant 0 : index
    %607 = vector.load %arg9[%c12_566, %c2_567, %c0_568] : memref<18x18x8xf32, #tpu.memory_space<vmem>>, vector<1x16x8xf32>
    %608 = vector.shape_cast %607 : vector<1x16x8xf32> to vector<16x8xf32>
    %c13_569 = arith.constant 13 : index
    %c0_570 = arith.constant 0 : index
    %c0_571 = arith.constant 0 : index
    %609 = vector.load %arg9[%c13_569, %c0_570, %c0_571] : memref<18x18x8xf32, #tpu.memory_space<vmem>>, vector<1x16x8xf32>
    %610 = vector.shape_cast %609 : vector<1x16x8xf32> to vector<16x8xf32>
    %c13_572 = arith.constant 13 : index
    %c1_573 = arith.constant 1 : index
    %c0_574 = arith.constant 0 : index
    %611 = vector.load %arg9[%c13_572, %c1_573, %c0_574] : memref<18x18x8xf32, #tpu.memory_space<vmem>>, vector<1x16x8xf32>
    %612 = vector.shape_cast %611 : vector<1x16x8xf32> to vector<16x8xf32>
    %c13_575 = arith.constant 13 : index
    %c2_576 = arith.constant 2 : index
    %c0_577 = arith.constant 0 : index
    %613 = vector.load %arg9[%c13_575, %c2_576, %c0_577] : memref<18x18x8xf32, #tpu.memory_space<vmem>>, vector<1x16x8xf32>
    %614 = vector.shape_cast %613 : vector<1x16x8xf32> to vector<16x8xf32>
    %615 = tpu.concatenate %598, %600, %602, %604, %606, %608, %610, %612, %614 in 1 : vector<16x8xf32>, vector<16x8xf32>, vector<16x8xf32>, vector<16x8xf32>, vector<16x8xf32>, vector<16x8xf32>, vector<16x8xf32>, vector<16x8xf32>, vector<16x8xf32> -> vector<16x72xf32>
    %616 = arith.truncf %615 : vector<16x72xf32> to vector<16x72xbf16>
    %cst_578 = arith.constant dense<0.000000e+00> : vector<16x8xf32>
    %617 = tpu.matmul %616, %2, %cst_578 {dimension_numbers = #tpu.dot_dimension_numbers<[1], [0], [0], [1], [0, 0, 1, 1], [], []>} : vector<16x72xbf16>, vector<72x8xbf16>, vector<16x8xf32> -> vector<16x8xf32>
    %618 = vector.broadcast %3 : vector<1x8xf32> to vector<16x8xf32>
    %619 = arith.addf %617, %618 : vector<16x8xf32>
    %cst_579 = arith.constant 0.000000e+00 : f32
    %620 = vector.broadcast %cst_579 : f32 to vector<16x8xf32>
    %621 = arith.maximumf %619, %620 : vector<16x8xf32>
    %622 = arith.truncf %621 : vector<16x8xf32> to vector<16x8xbf16>
    %cst_580 = arith.constant dense<0.000000e+00> : vector<16x32xf32>
    %623 = tpu.matmul %622, %4, %cst_580 {dimension_numbers = #tpu.dot_dimension_numbers<[1], [0], [0], [1], [0, 0, 1, 1], [], []>} : vector<16x8xbf16>, vector<8x32xbf16>, vector<16x32xf32> -> vector<16x32xf32>
    %624 = vector.broadcast %5 : vector<1x32xf32> to vector<16x32xf32>
    %625 = arith.addf %623, %624 : vector<16x32xf32>
    %c0_581 = arith.constant 0 : index
    %c11_582 = arith.constant 11 : index
    %c0_583 = arith.constant 0 : index
    %c0_584 = arith.constant 0 : index
    %626 = vector.load %arg1[%c0_581, %c11_582, %c0_583, %c0_584] : memref<1x16x16x32xbf16, #tpu.memory_space<vmem>>, vector<1x1x16x32xbf16>
    %627 = vector.shape_cast %626 : vector<1x1x16x32xbf16> to vector<16x32xbf16>
    %628 = arith.extf %627 : vector<16x32xbf16> to vector<16x32xf32>
    %629 = arith.addf %625, %628 : vector<16x32xf32>
    %cst_585 = arith.constant 0.000000e+00 : f32
    %630 = vector.broadcast %cst_585 : f32 to vector<16x32xf32>
    %631 = arith.maximumf %629, %630 : vector<16x32xf32>
    %632 = arith.truncf %631 : vector<16x32xf32> to vector<16x32xbf16>
    %c0_586 = arith.constant 0 : index
    %c176 = arith.constant 176 : index
    %c0_587 = arith.constant 0 : index
    %633 = vector.load %arg8[%c0_586, %c176, %c0_587] : memref<1x256x32xbf16, #tpu.memory_space<vmem>>, vector<1x16x32xbf16>
    %634 = vector.shape_cast %633 : vector<1x16x32xbf16> to vector<16x32xbf16>
    %635 = vector.shape_cast %632 : vector<16x32xbf16> to vector<1x16x32xbf16>
    tpu.vector_store %arg8[%c0_586, %c176, %c0_587], %635 {strides = array<i32>} : memref<1x256x32xbf16, #tpu.memory_space<vmem>>, vector<1x16x32xbf16>,
    %c12_588 = arith.constant 12 : index
    %c0_589 = arith.constant 0 : index
    %c0_590 = arith.constant 0 : index
    %636 = vector.load %arg9[%c12_588, %c0_589, %c0_590] : memref<18x18x8xf32, #tpu.memory_space<vmem>>, vector<1x16x8xf32>
    %637 = vector.shape_cast %636 : vector<1x16x8xf32> to vector<16x8xf32>
    %c12_591 = arith.constant 12 : index
    %c1_592 = arith.constant 1 : index
    %c0_593 = arith.constant 0 : index
    %638 = vector.load %arg9[%c12_591, %c1_592, %c0_593] : memref<18x18x8xf32, #tpu.memory_space<vmem>>, vector<1x16x8xf32>
    %639 = vector.shape_cast %638 : vector<1x16x8xf32> to vector<16x8xf32>
    %c12_594 = arith.constant 12 : index
    %c2_595 = arith.constant 2 : index
    %c0_596 = arith.constant 0 : index
    %640 = vector.load %arg9[%c12_594, %c2_595, %c0_596] : memref<18x18x8xf32, #tpu.memory_space<vmem>>, vector<1x16x8xf32>
    %641 = vector.shape_cast %640 : vector<1x16x8xf32> to vector<16x8xf32>
    %c13_597 = arith.constant 13 : index
    %c0_598 = arith.constant 0 : index
    %c0_599 = arith.constant 0 : index
    %642 = vector.load %arg9[%c13_597, %c0_598, %c0_599] : memref<18x18x8xf32, #tpu.memory_space<vmem>>, vector<1x16x8xf32>
    %643 = vector.shape_cast %642 : vector<1x16x8xf32> to vector<16x8xf32>
    %c13_600 = arith.constant 13 : index
    %c1_601 = arith.constant 1 : index
    %c0_602 = arith.constant 0 : index
    %644 = vector.load %arg9[%c13_600, %c1_601, %c0_602] : memref<18x18x8xf32, #tpu.memory_space<vmem>>, vector<1x16x8xf32>
    %645 = vector.shape_cast %644 : vector<1x16x8xf32> to vector<16x8xf32>
    %c13_603 = arith.constant 13 : index
    %c2_604 = arith.constant 2 : index
    %c0_605 = arith.constant 0 : index
    %646 = vector.load %arg9[%c13_603, %c2_604, %c0_605] : memref<18x18x8xf32, #tpu.memory_space<vmem>>, vector<1x16x8xf32>
    %647 = vector.shape_cast %646 : vector<1x16x8xf32> to vector<16x8xf32>
    %c14_606 = arith.constant 14 : index
    %c0_607 = arith.constant 0 : index
    %c0_608 = arith.constant 0 : index
    %648 = vector.load %arg9[%c14_606, %c0_607, %c0_608] : memref<18x18x8xf32, #tpu.memory_space<vmem>>, vector<1x16x8xf32>
    %649 = vector.shape_cast %648 : vector<1x16x8xf32> to vector<16x8xf32>
    %c14_609 = arith.constant 14 : index
    %c1_610 = arith.constant 1 : index
    %c0_611 = arith.constant 0 : index
    %650 = vector.load %arg9[%c14_609, %c1_610, %c0_611] : memref<18x18x8xf32, #tpu.memory_space<vmem>>, vector<1x16x8xf32>
    %651 = vector.shape_cast %650 : vector<1x16x8xf32> to vector<16x8xf32>
    %c14_612 = arith.constant 14 : index
    %c2_613 = arith.constant 2 : index
    %c0_614 = arith.constant 0 : index
    %652 = vector.load %arg9[%c14_612, %c2_613, %c0_614] : memref<18x18x8xf32, #tpu.memory_space<vmem>>, vector<1x16x8xf32>
    %653 = vector.shape_cast %652 : vector<1x16x8xf32> to vector<16x8xf32>
    %654 = tpu.concatenate %637, %639, %641, %643, %645, %647, %649, %651, %653 in 1 : vector<16x8xf32>, vector<16x8xf32>, vector<16x8xf32>, vector<16x8xf32>, vector<16x8xf32>, vector<16x8xf32>, vector<16x8xf32>, vector<16x8xf32>, vector<16x8xf32> -> vector<16x72xf32>
    %655 = arith.truncf %654 : vector<16x72xf32> to vector<16x72xbf16>
    %cst_615 = arith.constant dense<0.000000e+00> : vector<16x8xf32>
    %656 = tpu.matmul %655, %2, %cst_615 {dimension_numbers = #tpu.dot_dimension_numbers<[1], [0], [0], [1], [0, 0, 1, 1], [], []>} : vector<16x72xbf16>, vector<72x8xbf16>, vector<16x8xf32> -> vector<16x8xf32>
    %657 = vector.broadcast %3 : vector<1x8xf32> to vector<16x8xf32>
    %658 = arith.addf %656, %657 : vector<16x8xf32>
    %cst_616 = arith.constant 0.000000e+00 : f32
    %659 = vector.broadcast %cst_616 : f32 to vector<16x8xf32>
    %660 = arith.maximumf %658, %659 : vector<16x8xf32>
    %661 = arith.truncf %660 : vector<16x8xf32> to vector<16x8xbf16>
    %cst_617 = arith.constant dense<0.000000e+00> : vector<16x32xf32>
    %662 = tpu.matmul %661, %4, %cst_617 {dimension_numbers = #tpu.dot_dimension_numbers<[1], [0], [0], [1], [0, 0, 1, 1], [], []>} : vector<16x8xbf16>, vector<8x32xbf16>, vector<16x32xf32> -> vector<16x32xf32>
    %663 = vector.broadcast %5 : vector<1x32xf32> to vector<16x32xf32>
    %664 = arith.addf %662, %663 : vector<16x32xf32>
    %c0_618 = arith.constant 0 : index
    %c12_619 = arith.constant 12 : index
    %c0_620 = arith.constant 0 : index
    %c0_621 = arith.constant 0 : index
    %665 = vector.load %arg1[%c0_618, %c12_619, %c0_620, %c0_621] : memref<1x16x16x32xbf16, #tpu.memory_space<vmem>>, vector<1x1x16x32xbf16>
    %666 = vector.shape_cast %665 : vector<1x1x16x32xbf16> to vector<16x32xbf16>
    %667 = arith.extf %666 : vector<16x32xbf16> to vector<16x32xf32>
    %668 = arith.addf %664, %667 : vector<16x32xf32>
    %cst_622 = arith.constant 0.000000e+00 : f32
    %669 = vector.broadcast %cst_622 : f32 to vector<16x32xf32>
    %670 = arith.maximumf %668, %669 : vector<16x32xf32>
    %671 = arith.truncf %670 : vector<16x32xf32> to vector<16x32xbf16>
    %c0_623 = arith.constant 0 : index
    %c192 = arith.constant 192 : index
    %c0_624 = arith.constant 0 : index
    %672 = vector.load %arg8[%c0_623, %c192, %c0_624] : memref<1x256x32xbf16, #tpu.memory_space<vmem>>, vector<1x16x32xbf16>
    %673 = vector.shape_cast %672 : vector<1x16x32xbf16> to vector<16x32xbf16>
    %674 = vector.shape_cast %671 : vector<16x32xbf16> to vector<1x16x32xbf16>
    tpu.vector_store %arg8[%c0_623, %c192, %c0_624], %674 {strides = array<i32>} : memref<1x256x32xbf16, #tpu.memory_space<vmem>>, vector<1x16x32xbf16>,
    %c13_625 = arith.constant 13 : index
    %c0_626 = arith.constant 0 : index
    %c0_627 = arith.constant 0 : index
    %675 = vector.load %arg9[%c13_625, %c0_626, %c0_627] : memref<18x18x8xf32, #tpu.memory_space<vmem>>, vector<1x16x8xf32>
    %676 = vector.shape_cast %675 : vector<1x16x8xf32> to vector<16x8xf32>
    %c13_628 = arith.constant 13 : index
    %c1_629 = arith.constant 1 : index
    %c0_630 = arith.constant 0 : index
    %677 = vector.load %arg9[%c13_628, %c1_629, %c0_630] : memref<18x18x8xf32, #tpu.memory_space<vmem>>, vector<1x16x8xf32>
    %678 = vector.shape_cast %677 : vector<1x16x8xf32> to vector<16x8xf32>
    %c13_631 = arith.constant 13 : index
    %c2_632 = arith.constant 2 : index
    %c0_633 = arith.constant 0 : index
    %679 = vector.load %arg9[%c13_631, %c2_632, %c0_633] : memref<18x18x8xf32, #tpu.memory_space<vmem>>, vector<1x16x8xf32>
    %680 = vector.shape_cast %679 : vector<1x16x8xf32> to vector<16x8xf32>
    %c14_634 = arith.constant 14 : index
    %c0_635 = arith.constant 0 : index
    %c0_636 = arith.constant 0 : index
    %681 = vector.load %arg9[%c14_634, %c0_635, %c0_636] : memref<18x18x8xf32, #tpu.memory_space<vmem>>, vector<1x16x8xf32>
    %682 = vector.shape_cast %681 : vector<1x16x8xf32> to vector<16x8xf32>
    %c14_637 = arith.constant 14 : index
    %c1_638 = arith.constant 1 : index
    %c0_639 = arith.constant 0 : index
    %683 = vector.load %arg9[%c14_637, %c1_638, %c0_639] : memref<18x18x8xf32, #tpu.memory_space<vmem>>, vector<1x16x8xf32>
    %684 = vector.shape_cast %683 : vector<1x16x8xf32> to vector<16x8xf32>
    %c14_640 = arith.constant 14 : index
    %c2_641 = arith.constant 2 : index
    %c0_642 = arith.constant 0 : index
    %685 = vector.load %arg9[%c14_640, %c2_641, %c0_642] : memref<18x18x8xf32, #tpu.memory_space<vmem>>, vector<1x16x8xf32>
    %686 = vector.shape_cast %685 : vector<1x16x8xf32> to vector<16x8xf32>
    %c15_643 = arith.constant 15 : index
    %c0_644 = arith.constant 0 : index
    %c0_645 = arith.constant 0 : index
    %687 = vector.load %arg9[%c15_643, %c0_644, %c0_645] : memref<18x18x8xf32, #tpu.memory_space<vmem>>, vector<1x16x8xf32>
    %688 = vector.shape_cast %687 : vector<1x16x8xf32> to vector<16x8xf32>
    %c15_646 = arith.constant 15 : index
    %c1_647 = arith.constant 1 : index
    %c0_648 = arith.constant 0 : index
    %689 = vector.load %arg9[%c15_646, %c1_647, %c0_648] : memref<18x18x8xf32, #tpu.memory_space<vmem>>, vector<1x16x8xf32>
    %690 = vector.shape_cast %689 : vector<1x16x8xf32> to vector<16x8xf32>
    %c15_649 = arith.constant 15 : index
    %c2_650 = arith.constant 2 : index
    %c0_651 = arith.constant 0 : index
    %691 = vector.load %arg9[%c15_649, %c2_650, %c0_651] : memref<18x18x8xf32, #tpu.memory_space<vmem>>, vector<1x16x8xf32>
    %692 = vector.shape_cast %691 : vector<1x16x8xf32> to vector<16x8xf32>
    %693 = tpu.concatenate %676, %678, %680, %682, %684, %686, %688, %690, %692 in 1 : vector<16x8xf32>, vector<16x8xf32>, vector<16x8xf32>, vector<16x8xf32>, vector<16x8xf32>, vector<16x8xf32>, vector<16x8xf32>, vector<16x8xf32>, vector<16x8xf32> -> vector<16x72xf32>
    %694 = arith.truncf %693 : vector<16x72xf32> to vector<16x72xbf16>
    %cst_652 = arith.constant dense<0.000000e+00> : vector<16x8xf32>
    %695 = tpu.matmul %694, %2, %cst_652 {dimension_numbers = #tpu.dot_dimension_numbers<[1], [0], [0], [1], [0, 0, 1, 1], [], []>} : vector<16x72xbf16>, vector<72x8xbf16>, vector<16x8xf32> -> vector<16x8xf32>
    %696 = vector.broadcast %3 : vector<1x8xf32> to vector<16x8xf32>
    %697 = arith.addf %695, %696 : vector<16x8xf32>
    %cst_653 = arith.constant 0.000000e+00 : f32
    %698 = vector.broadcast %cst_653 : f32 to vector<16x8xf32>
    %699 = arith.maximumf %697, %698 : vector<16x8xf32>
    %700 = arith.truncf %699 : vector<16x8xf32> to vector<16x8xbf16>
    %cst_654 = arith.constant dense<0.000000e+00> : vector<16x32xf32>
    %701 = tpu.matmul %700, %4, %cst_654 {dimension_numbers = #tpu.dot_dimension_numbers<[1], [0], [0], [1], [0, 0, 1, 1], [], []>} : vector<16x8xbf16>, vector<8x32xbf16>, vector<16x32xf32> -> vector<16x32xf32>
    %702 = vector.broadcast %5 : vector<1x32xf32> to vector<16x32xf32>
    %703 = arith.addf %701, %702 : vector<16x32xf32>
    %c0_655 = arith.constant 0 : index
    %c13_656 = arith.constant 13 : index
    %c0_657 = arith.constant 0 : index
    %c0_658 = arith.constant 0 : index
    %704 = vector.load %arg1[%c0_655, %c13_656, %c0_657, %c0_658] : memref<1x16x16x32xbf16, #tpu.memory_space<vmem>>, vector<1x1x16x32xbf16>
    %705 = vector.shape_cast %704 : vector<1x1x16x32xbf16> to vector<16x32xbf16>
    %706 = arith.extf %705 : vector<16x32xbf16> to vector<16x32xf32>
    %707 = arith.addf %703, %706 : vector<16x32xf32>
    %cst_659 = arith.constant 0.000000e+00 : f32
    %708 = vector.broadcast %cst_659 : f32 to vector<16x32xf32>
    %709 = arith.maximumf %707, %708 : vector<16x32xf32>
    %710 = arith.truncf %709 : vector<16x32xf32> to vector<16x32xbf16>
    %c0_660 = arith.constant 0 : index
    %c208 = arith.constant 208 : index
    %c0_661 = arith.constant 0 : index
    %711 = vector.load %arg8[%c0_660, %c208, %c0_661] : memref<1x256x32xbf16, #tpu.memory_space<vmem>>, vector<1x16x32xbf16>
    %712 = vector.shape_cast %711 : vector<1x16x32xbf16> to vector<16x32xbf16>
    %713 = vector.shape_cast %710 : vector<16x32xbf16> to vector<1x16x32xbf16>
    tpu.vector_store %arg8[%c0_660, %c208, %c0_661], %713 {strides = array<i32>} : memref<1x256x32xbf16, #tpu.memory_space<vmem>>, vector<1x16x32xbf16>,
    %c14_662 = arith.constant 14 : index
    %c0_663 = arith.constant 0 : index
    %c0_664 = arith.constant 0 : index
    %714 = vector.load %arg9[%c14_662, %c0_663, %c0_664] : memref<18x18x8xf32, #tpu.memory_space<vmem>>, vector<1x16x8xf32>
    %715 = vector.shape_cast %714 : vector<1x16x8xf32> to vector<16x8xf32>
    %c14_665 = arith.constant 14 : index
    %c1_666 = arith.constant 1 : index
    %c0_667 = arith.constant 0 : index
    %716 = vector.load %arg9[%c14_665, %c1_666, %c0_667] : memref<18x18x8xf32, #tpu.memory_space<vmem>>, vector<1x16x8xf32>
    %717 = vector.shape_cast %716 : vector<1x16x8xf32> to vector<16x8xf32>
    %c14_668 = arith.constant 14 : index
    %c2_669 = arith.constant 2 : index
    %c0_670 = arith.constant 0 : index
    %718 = vector.load %arg9[%c14_668, %c2_669, %c0_670] : memref<18x18x8xf32, #tpu.memory_space<vmem>>, vector<1x16x8xf32>
    %719 = vector.shape_cast %718 : vector<1x16x8xf32> to vector<16x8xf32>
    %c15_671 = arith.constant 15 : index
    %c0_672 = arith.constant 0 : index
    %c0_673 = arith.constant 0 : index
    %720 = vector.load %arg9[%c15_671, %c0_672, %c0_673] : memref<18x18x8xf32, #tpu.memory_space<vmem>>, vector<1x16x8xf32>
    %721 = vector.shape_cast %720 : vector<1x16x8xf32> to vector<16x8xf32>
    %c15_674 = arith.constant 15 : index
    %c1_675 = arith.constant 1 : index
    %c0_676 = arith.constant 0 : index
    %722 = vector.load %arg9[%c15_674, %c1_675, %c0_676] : memref<18x18x8xf32, #tpu.memory_space<vmem>>, vector<1x16x8xf32>
    %723 = vector.shape_cast %722 : vector<1x16x8xf32> to vector<16x8xf32>
    %c15_677 = arith.constant 15 : index
    %c2_678 = arith.constant 2 : index
    %c0_679 = arith.constant 0 : index
    %724 = vector.load %arg9[%c15_677, %c2_678, %c0_679] : memref<18x18x8xf32, #tpu.memory_space<vmem>>, vector<1x16x8xf32>
    %725 = vector.shape_cast %724 : vector<1x16x8xf32> to vector<16x8xf32>
    %c16_680 = arith.constant 16 : index
    %c0_681 = arith.constant 0 : index
    %c0_682 = arith.constant 0 : index
    %726 = vector.load %arg9[%c16_680, %c0_681, %c0_682] : memref<18x18x8xf32, #tpu.memory_space<vmem>>, vector<1x16x8xf32>
    %727 = vector.shape_cast %726 : vector<1x16x8xf32> to vector<16x8xf32>
    %c16_683 = arith.constant 16 : index
    %c1_684 = arith.constant 1 : index
    %c0_685 = arith.constant 0 : index
    %728 = vector.load %arg9[%c16_683, %c1_684, %c0_685] : memref<18x18x8xf32, #tpu.memory_space<vmem>>, vector<1x16x8xf32>
    %729 = vector.shape_cast %728 : vector<1x16x8xf32> to vector<16x8xf32>
    %c16_686 = arith.constant 16 : index
    %c2_687 = arith.constant 2 : index
    %c0_688 = arith.constant 0 : index
    %730 = vector.load %arg9[%c16_686, %c2_687, %c0_688] : memref<18x18x8xf32, #tpu.memory_space<vmem>>, vector<1x16x8xf32>
    %731 = vector.shape_cast %730 : vector<1x16x8xf32> to vector<16x8xf32>
    %732 = tpu.concatenate %715, %717, %719, %721, %723, %725, %727, %729, %731 in 1 : vector<16x8xf32>, vector<16x8xf32>, vector<16x8xf32>, vector<16x8xf32>, vector<16x8xf32>, vector<16x8xf32>, vector<16x8xf32>, vector<16x8xf32>, vector<16x8xf32> -> vector<16x72xf32>
    %733 = arith.truncf %732 : vector<16x72xf32> to vector<16x72xbf16>
    %cst_689 = arith.constant dense<0.000000e+00> : vector<16x8xf32>
    %734 = tpu.matmul %733, %2, %cst_689 {dimension_numbers = #tpu.dot_dimension_numbers<[1], [0], [0], [1], [0, 0, 1, 1], [], []>} : vector<16x72xbf16>, vector<72x8xbf16>, vector<16x8xf32> -> vector<16x8xf32>
    %735 = vector.broadcast %3 : vector<1x8xf32> to vector<16x8xf32>
    %736 = arith.addf %734, %735 : vector<16x8xf32>
    %cst_690 = arith.constant 0.000000e+00 : f32
    %737 = vector.broadcast %cst_690 : f32 to vector<16x8xf32>
    %738 = arith.maximumf %736, %737 : vector<16x8xf32>
    %739 = arith.truncf %738 : vector<16x8xf32> to vector<16x8xbf16>
    %cst_691 = arith.constant dense<0.000000e+00> : vector<16x32xf32>
    %740 = tpu.matmul %739, %4, %cst_691 {dimension_numbers = #tpu.dot_dimension_numbers<[1], [0], [0], [1], [0, 0, 1, 1], [], []>} : vector<16x8xbf16>, vector<8x32xbf16>, vector<16x32xf32> -> vector<16x32xf32>
    %741 = vector.broadcast %5 : vector<1x32xf32> to vector<16x32xf32>
    %742 = arith.addf %740, %741 : vector<16x32xf32>
    %c0_692 = arith.constant 0 : index
    %c14_693 = arith.constant 14 : index
    %c0_694 = arith.constant 0 : index
    %c0_695 = arith.constant 0 : index
    %743 = vector.load %arg1[%c0_692, %c14_693, %c0_694, %c0_695] : memref<1x16x16x32xbf16, #tpu.memory_space<vmem>>, vector<1x1x16x32xbf16>
    %744 = vector.shape_cast %743 : vector<1x1x16x32xbf16> to vector<16x32xbf16>
    %745 = arith.extf %744 : vector<16x32xbf16> to vector<16x32xf32>
    %746 = arith.addf %742, %745 : vector<16x32xf32>
    %cst_696 = arith.constant 0.000000e+00 : f32
    %747 = vector.broadcast %cst_696 : f32 to vector<16x32xf32>
    %748 = arith.maximumf %746, %747 : vector<16x32xf32>
    %749 = arith.truncf %748 : vector<16x32xf32> to vector<16x32xbf16>
    %c0_697 = arith.constant 0 : index
    %c224 = arith.constant 224 : index
    %c0_698 = arith.constant 0 : index
    %750 = vector.load %arg8[%c0_697, %c224, %c0_698] : memref<1x256x32xbf16, #tpu.memory_space<vmem>>, vector<1x16x32xbf16>
    %751 = vector.shape_cast %750 : vector<1x16x32xbf16> to vector<16x32xbf16>
    %752 = vector.shape_cast %749 : vector<16x32xbf16> to vector<1x16x32xbf16>
    tpu.vector_store %arg8[%c0_697, %c224, %c0_698], %752 {strides = array<i32>} : memref<1x256x32xbf16, #tpu.memory_space<vmem>>, vector<1x16x32xbf16>,
    %c15_699 = arith.constant 15 : index
    %c0_700 = arith.constant 0 : index
    %c0_701 = arith.constant 0 : index
    %753 = vector.load %arg9[%c15_699, %c0_700, %c0_701] : memref<18x18x8xf32, #tpu.memory_space<vmem>>, vector<1x16x8xf32>
    %754 = vector.shape_cast %753 : vector<1x16x8xf32> to vector<16x8xf32>
    %c15_702 = arith.constant 15 : index
    %c1_703 = arith.constant 1 : index
    %c0_704 = arith.constant 0 : index
    %755 = vector.load %arg9[%c15_702, %c1_703, %c0_704] : memref<18x18x8xf32, #tpu.memory_space<vmem>>, vector<1x16x8xf32>
    %756 = vector.shape_cast %755 : vector<1x16x8xf32> to vector<16x8xf32>
    %c15_705 = arith.constant 15 : index
    %c2_706 = arith.constant 2 : index
    %c0_707 = arith.constant 0 : index
    %757 = vector.load %arg9[%c15_705, %c2_706, %c0_707] : memref<18x18x8xf32, #tpu.memory_space<vmem>>, vector<1x16x8xf32>
    %758 = vector.shape_cast %757 : vector<1x16x8xf32> to vector<16x8xf32>
    %c16_708 = arith.constant 16 : index
    %c0_709 = arith.constant 0 : index
    %c0_710 = arith.constant 0 : index
    %759 = vector.load %arg9[%c16_708, %c0_709, %c0_710] : memref<18x18x8xf32, #tpu.memory_space<vmem>>, vector<1x16x8xf32>
    %760 = vector.shape_cast %759 : vector<1x16x8xf32> to vector<16x8xf32>
    %c16_711 = arith.constant 16 : index
    %c1_712 = arith.constant 1 : index
    %c0_713 = arith.constant 0 : index
    %761 = vector.load %arg9[%c16_711, %c1_712, %c0_713] : memref<18x18x8xf32, #tpu.memory_space<vmem>>, vector<1x16x8xf32>
    %762 = vector.shape_cast %761 : vector<1x16x8xf32> to vector<16x8xf32>
    %c16_714 = arith.constant 16 : index
    %c2_715 = arith.constant 2 : index
    %c0_716 = arith.constant 0 : index
    %763 = vector.load %arg9[%c16_714, %c2_715, %c0_716] : memref<18x18x8xf32, #tpu.memory_space<vmem>>, vector<1x16x8xf32>
    %764 = vector.shape_cast %763 : vector<1x16x8xf32> to vector<16x8xf32>
    %c17 = arith.constant 17 : index
    %c0_717 = arith.constant 0 : index
    %c0_718 = arith.constant 0 : index
    %765 = vector.load %arg9[%c17, %c0_717, %c0_718] : memref<18x18x8xf32, #tpu.memory_space<vmem>>, vector<1x16x8xf32>
    %766 = vector.shape_cast %765 : vector<1x16x8xf32> to vector<16x8xf32>
    %c17_719 = arith.constant 17 : index
    %c1_720 = arith.constant 1 : index
    %c0_721 = arith.constant 0 : index
    %767 = vector.load %arg9[%c17_719, %c1_720, %c0_721] : memref<18x18x8xf32, #tpu.memory_space<vmem>>, vector<1x16x8xf32>
    %768 = vector.shape_cast %767 : vector<1x16x8xf32> to vector<16x8xf32>
    %c17_722 = arith.constant 17 : index
    %c2_723 = arith.constant 2 : index
    %c0_724 = arith.constant 0 : index
    %769 = vector.load %arg9[%c17_722, %c2_723, %c0_724] : memref<18x18x8xf32, #tpu.memory_space<vmem>>, vector<1x16x8xf32>
    %770 = vector.shape_cast %769 : vector<1x16x8xf32> to vector<16x8xf32>
    %771 = tpu.concatenate %754, %756, %758, %760, %762, %764, %766, %768, %770 in 1 : vector<16x8xf32>, vector<16x8xf32>, vector<16x8xf32>, vector<16x8xf32>, vector<16x8xf32>, vector<16x8xf32>, vector<16x8xf32>, vector<16x8xf32>, vector<16x8xf32> -> vector<16x72xf32>
    %772 = arith.truncf %771 : vector<16x72xf32> to vector<16x72xbf16>
    %cst_725 = arith.constant dense<0.000000e+00> : vector<16x8xf32>
    %773 = tpu.matmul %772, %2, %cst_725 {dimension_numbers = #tpu.dot_dimension_numbers<[1], [0], [0], [1], [0, 0, 1, 1], [], []>} : vector<16x72xbf16>, vector<72x8xbf16>, vector<16x8xf32> -> vector<16x8xf32>
    %774 = vector.broadcast %3 : vector<1x8xf32> to vector<16x8xf32>
    %775 = arith.addf %773, %774 : vector<16x8xf32>
    %cst_726 = arith.constant 0.000000e+00 : f32
    %776 = vector.broadcast %cst_726 : f32 to vector<16x8xf32>
    %777 = arith.maximumf %775, %776 : vector<16x8xf32>
    %778 = arith.truncf %777 : vector<16x8xf32> to vector<16x8xbf16>
    %cst_727 = arith.constant dense<0.000000e+00> : vector<16x32xf32>
    %779 = tpu.matmul %778, %4, %cst_727 {dimension_numbers = #tpu.dot_dimension_numbers<[1], [0], [0], [1], [0, 0, 1, 1], [], []>} : vector<16x8xbf16>, vector<8x32xbf16>, vector<16x32xf32> -> vector<16x32xf32>
    %780 = vector.broadcast %5 : vector<1x32xf32> to vector<16x32xf32>
    %781 = arith.addf %779, %780 : vector<16x32xf32>
    %c0_728 = arith.constant 0 : index
    %c15_729 = arith.constant 15 : index
    %c0_730 = arith.constant 0 : index
    %c0_731 = arith.constant 0 : index
    %782 = vector.load %arg1[%c0_728, %c15_729, %c0_730, %c0_731] : memref<1x16x16x32xbf16, #tpu.memory_space<vmem>>, vector<1x1x16x32xbf16>
    %783 = vector.shape_cast %782 : vector<1x1x16x32xbf16> to vector<16x32xbf16>
    %784 = arith.extf %783 : vector<16x32xbf16> to vector<16x32xf32>
    %785 = arith.addf %781, %784 : vector<16x32xf32>
    %cst_732 = arith.constant 0.000000e+00 : f32
    %786 = vector.broadcast %cst_732 : f32 to vector<16x32xf32>
    %787 = arith.maximumf %785, %786 : vector<16x32xf32>
    %788 = arith.truncf %787 : vector<16x32xf32> to vector<16x32xbf16>
    %c0_733 = arith.constant 0 : index
    %c240 = arith.constant 240 : index
    %c0_734 = arith.constant 0 : index
    %789 = vector.load %arg8[%c0_733, %c240, %c0_734] : memref<1x256x32xbf16, #tpu.memory_space<vmem>>, vector<1x16x32xbf16>
    %790 = vector.shape_cast %789 : vector<1x16x32xbf16> to vector<16x32xbf16>
    %791 = vector.shape_cast %788 : vector<16x32xbf16> to vector<1x16x32xbf16>
    tpu.vector_store %arg8[%c0_733, %c240, %c0_734], %791 {strides = array<i32>} : memref<1x256x32xbf16, #tpu.memory_space<vmem>>, vector<1x16x32xbf16>,
    return
  }
  func.func @transform_0(%arg0: i32) -> (i32, i32, i32, i32) {
    %c0_i32 = arith.constant 0 : i32
    %c0_i32_0 = arith.constant 0 : i32
    %c0_i32_1 = arith.constant 0 : i32
    %c0_i32_2 = arith.constant 0 : i32
    return %arg0, %c0_i32, %c0_i32_0, %c0_i32_1 : i32, i32, i32, i32
  }
  func.func @transform_1(%arg0: i32) -> (i32, i32) {
    %c0_i32 = arith.constant 0 : i32
    %c0_i32_0 = arith.constant 0 : i32
    %c0_i32_1 = arith.constant 0 : i32
    return %c0_i32, %c0_i32_0 : i32, i32
  }
  func.func @transform_2(%arg0: i32) -> (i32, i32) {
    %c0_i32 = arith.constant 0 : i32
    %c0_i32_0 = arith.constant 0 : i32
    %c0_i32_1 = arith.constant 0 : i32
    return %c0_i32, %c0_i32_0 : i32, i32
  }
  func.func @transform_3(%arg0: i32) -> (i32, i32) {
    %c0_i32 = arith.constant 0 : i32
    %c0_i32_0 = arith.constant 0 : i32
    %c0_i32_1 = arith.constant 0 : i32
    return %c0_i32, %c0_i32_0 : i32, i32
  }
  func.func @transform_4(%arg0: i32) -> (i32, i32) {
    %c0_i32 = arith.constant 0 : i32
    %c0_i32_0 = arith.constant 0 : i32
    %c0_i32_1 = arith.constant 0 : i32
    return %c0_i32, %c0_i32_0 : i32, i32
  }
  func.func @transform_5(%arg0: i32) -> (i32, i32) {
    %c0_i32 = arith.constant 0 : i32
    %c0_i32_0 = arith.constant 0 : i32
    %c0_i32_1 = arith.constant 0 : i32
    return %c0_i32, %c0_i32_0 : i32, i32
  }
  func.func @transform_6(%arg0: i32) -> (i32, i32) {
    %c0_i32 = arith.constant 0 : i32
    %c0_i32_0 = arith.constant 0 : i32
    %c0_i32_1 = arith.constant 0 : i32
    return %c0_i32, %c0_i32_0 : i32, i32
  }
  func.func @transform_7(%arg0: i32) -> (i32, i32, i32) {
    %c0_i32 = arith.constant 0 : i32
    %c0_i32_0 = arith.constant 0 : i32
    %c0_i32_1 = arith.constant 0 : i32
    return %arg0, %c0_i32, %c0_i32_0 : i32, i32, i32
  }
}

</mosaic_0001>

<bundles_post_ra>
// kernel: tpu_custom_call.1
= control target key start
LH: loop header
LB: loop body
LE: loop exit
PB: predicated region body
PF: predicated region fallthrough
CT: control target
= control target key end

     0   :  { %12 = vsyncpa [#allocation4], 0  ;;  %s7975_s0 = inlined_call_operand.hbm [shape: bf16[2,16,16,32], index: 0, kind: input, shape index: {}]   ;;  %s7976_s1 = inlined_call_operand.vmem [shape: bf16[32,8], index: 1, kind: input, shape index: {}]   ;;  %s7977_s2 = inlined_call_operand.vmem [shape: f32[1,8], index: 2, kind: input, shape index: {}]   ;;  %s7978_s3 = inlined_call_operand.vmem [shape: bf16[72,8], index: 3, kind: input, shape index: {}]   ;;  %s7979_s4 = inlined_call_operand.vmem [shape: f32[1,8], index: 4, kind: input, shape index: {}]   ;;  %s7980_s5 = inlined_call_operand.vmem [shape: bf16[8,32], index: 5, kind: input, shape index: {}]   ;;  %s7981_s6 = inlined_call_operand.vmem [shape: f32[1,32], index: 6, kind: input, shape index: {}]   ;;  %s7982_s7 = inlined_call_operand.vmem [shape: bf16[2,256,32], index: 7, kind: output, shape index: {}]  }
   0x1   :  { %14 = vsyncpa [#allocation4 + $0x1], 0  ;;  %s6526_s24 = smov 0   ;;  %s6528_s25 = smov 0  }
   0x2   :  { %s6530_s26 = smov 0   ;;  %s6532_s27 = smov 0  }
   0x3 LB: > { %s6545_s28 = sadd.s32 4294967295, %s6471_s27   ;;  %s6548_s29 = sadd.s32 1, %s6471_s27   ;;  %s6471_s27 = sphi %s6532_s27, %s7991_s27   ;;  %s6467_s26 = sphi %s6530_s26, %s7990_s26   ;;  %s6463_s25 = sphi %s6528_s25, %s7989_s25   ;;  %s6459_s24 = sphi %s6526_s24, %s7988_s24  }
   0x4   : > { %s24_s30 = ssub.s32 %s6471_s27, %s6548_s29  ;;  %s27_s8 = sadd.s32 1, %s6467_s26 }
   0x5   : > { %p25_p0 = scmp.eq.s32.totalorder %s24_s30, 0  ;;  %p34_p1 = scmp.ne.s32.totalorder %s6467_s26, %s6463_s25 }
   0x6   : > { %p35_p2 = scmp.eq.s32.totalorder %s6471_s27, 0  ;;  %p40_p3 = scmp.ne.s32.totalorder %s6463_s25, %s6459_s24 }
   0x7   : > { %s6558_s9 = scalar_select %p25_p0, %s6467_s26, %s27_s8  }
   0x8   : > { %p36_p4 = por %p35_p2, %p34_p1  ;;  %p41_p5 = scmp.eq.s32.totalorder %s6545_s28, 0 }
   0x9   : > { %p5674_p6 = scmp.lt.s32.totalorder %s6471_s27, 2  ;;  %s234_s11 = sand.u32 1, %s6467_s26  }
   0xa   : > { %p6562_p7 = por %p41_p5, %p40_p3  ;;  %s4756_s12 = sshll.u32 %s234_s11, 7 }
   0xb   : > { %s4931_s13 = sshll.u32 %s6471_s27, 11  ;;  %s238_s17 = scalar_lea.vmem [#allocation3], %s4756_s12 }
   0xc   : > { %s7984_s10 = scalar_select %p6562_p7, 1, 0 }
   0xd   : > { %s6571_s16 = scalar_lea.hbm %s7975_s0, %s4931_s13  ;;  %s245_s18 = sshll.u32 %s238_s17, 4  ;;  %s6573_s18 = int_to_ptr.vmem [resolvable:$true] %s245_s18 }
   0xe   : > { %p6575_p8 = pnand %p5674_p6, %p36_p4  ;;  %s6580_s20 = scalar_lea.sflag [#allocation4], %s234_s11 }
   0xf   : > { %s6409_s21 = scalar_lea.hbm %s6571_s16, 2048  ;;  %s6414_s24 = scalar_lea.hbm %s7975_s0, 4096 }
  0x10   : > { %p6410_p10 = scmp.ne.s32.totalorder %s6571_s16, %s6409_s21  ;;  %p6411_p11 = pneg %p6575_p8 }
  0x11   : > { %p6415_p0 = scmp.lt.s32.totalorder %s6571_s16, %s7975_s0  ;;  %p6416_p1 = scmp.lt.s32.totalorder %s6414_s24, %s6409_s21 }
  0x12   : > { %p6412_p12 = pnand %p6411_p11, %p6410_p10 }
  0x13   : > { %p6417_p2 = por %p6416_p1, %p6415_p0 }
  0x14   : > { %p6413_p13 = pneg %p6412_p12 }
  0x16   : > { %p6418_p3 = pnand %p6417_p2, %p6413_p13 }
  0x18   : > { %6421 = shalt.err (!%p6418_p3)
}
  0x19   : > { %s6422_s11 = scalar_lea.vmem %s6573_s18, 2048  ;;  %s6473_s12 = smov [#allocation3]  }
  0x1a   : > { %p6423_p4 = scmp.ne.s32.totalorder %s6573_s18, %s6422_s11  ;;  %s6427_s13 = sshll.u32 %s6473_s12, 4  ;;  %s6428_s13 = int_to_ptr.vmem [resolvable:$false] %s6427_s13 }
  0x1b   : > { %s6429_s14 = scalar_lea.vmem %s6428_s13, 4096  ;;  %p6430_p10 = scmp.lt.s32.totalorder %s6573_s18, %s6428_s13 }
  0x1c   : > { %p6425_p5 = pnand %p6423_p4, %p6411_p11  ;;  %p6431_p12 = scmp.lt.s32.totalorder %s6429_s14, %s6422_s11 }
  0x1e   : > { %p6426_p6 = pneg %p6425_p5  ;;  %p6432_p9 = por %p6431_p12, %p6430_p10 }
  0x20   : > { %p6433_p7 = pnand %p6432_p9, %p6426_p6 }
  0x22   : > { %6436 = shalt.err (!%p6433_p7)
}
  0x23   : > { %s6474_s15 = smov 64   ;;  %s6475_s17 = smov 4  }
  0x24   : > { %5673 = dma.hbm_to_vmem [thread:$0]  (!%p6575_p8), %s6571_s16, 2048, %s6573_s18, %s6580_s20, %s6474_s15, %s6474_s15, %s6475_s17  }
  0x25   : > { %p253_p11 = scmp.lt.s32.totalorder %s6471_s27, 3  ;;  %p7986_p13 = scmp.ge.s32.totalorder %s6471_s27, 1 }
  0x27   : > { %p254_p0 = pnand %p7986_p13, %p253_p11 }
  0x28   : > { %s259_s21 = sand.u32 (!%p254_p0), 1, %s6463_s25   ;;  %p7987_p7 = scmp.ne.s32.totalorder (!%p254_p0), %s7984_s10, 0 }
  0x29   : > { %257 = sbr.rel (%p254_p0) target bundleno = 4155 (0x103b), region = 48  ;;  %s4760_s22 = sshll.u32 (!%p254_p0), %s259_s21, 7 }
  0x2a   : > { %s260_s23 = scalar_lea.sflag (!%p254_p0), [#allocation4], %s259_s21  ;;  %s6605_s24 = scalar_lea.vmem (!%p254_p0), [#allocation3], %s4760_s22 }
  0x2e   : > { %6454 = dma.done.wait (%p7987_p7), %s260_s23, 2048  }
  0x2f   : > { %6456 = vsyncadd (%p7987_p7), %s260_s23, 4294965248  ;;  %vm317_vm0 = vcmask 64512   ;;  %v6476_v0 = vmov 0.0   ;;  %vm6477_vm1 = vmmov 0   ;;  %v6692_v1 = vld [vmem:[%s7976_s1 + $0x8] sm:$0xff]   ;;  %v6699_v2 = vld [vmem:[%s7976_s1] sm:$0xff]  }
  0x30   : > { %5220 = vmatprep.subr.bf16.mxu0 %v6476_v0  ;;  %5228 = vmatprep.subr.bf16.mxu1 %v6476_v0  ;;  %322 = vst.msk [vmem:[#allocation2 + $0x18] sm:$0xff] %vm317_vm0, %v6476_v0  ;;  %323 = vst.msk [vmem:[#allocation2 + $0x20] sm:$0xff] %vm317_vm0, %v6476_v0  ;;  %v6361_v3 = vld [vmem:[%s6605_s24] sm:$0xff]   ;;  %v6362_v4 = vld [vmem:[%s6605_s24 + $0x8] sm:$0xff]   ;;  %vm398_vm2 = vcmask 261120   ;;  %vm320_vm3 = vcmask 58368  }
  0x31   : > { %318 = vst.msk [vmem:[#allocation2] sm:$0xff] %vm317_vm0, %v6476_v0  ;;  %319 = vst.msk [vmem:[#allocation2 + $0x8] sm:$0xff] %vm317_vm0, %v6476_v0  ;;  %5224 = vmatprep.mubr.msk.bf16.mxu0 %vm6477_vm1, %v6476_v0  ;;  %5232 = vmatprep.mubr.msk.bf16.mxu1 %vm6477_vm1, %v6476_v0  ;;  %v6363_v5 = vld [vmem:[%s6605_s24 + $0x10] sm:$0xff]   ;;  %v6364_v6 = vld [vmem:[%s6605_s24 + $0x18] sm:$0xff]   ;;  %s6478_s19 = smov 8   ;;  %s6479_s20 = smov 16  }
  0x32   : > { %325 = vst.msk [vmem:[#allocation2 + $0x30] sm:$0xff] %vm317_vm0, %v6476_v0  ;;  %326 = vst.msk [vmem:[#allocation2 + $0x38] sm:$0xff] %vm317_vm0, %v6476_v0  ;;  %5221 = vmatpush3.bf16.msra.mxu0 %v6692_v1  ;;  %5229 = vmatpush3.bf16.msra.mxu1 %v6692_v1  ;;  %v6365_v7 = vld [vmem:[%s6605_s24 + $0x20] sm:$0xff]   ;;  %v6366_v8 = vld [vmem:[%s6605_s24 + $0x28] sm:$0xff]   ;;  %vm1445_vm4 = vcmask 1043456   ;;  %s6480_s23 = smov 40  }
  0x33   : > { %328 = vst.msk [vmem:[#allocation2 + $0x48] sm:$0xff] %vm317_vm0, %v6476_v0  ;;  %329 = vst.msk [vmem:[#allocation2 + $0x50] sm:$0xff] %vm317_vm0, %v6476_v0  ;;  %5222 = vmatprep.subr.bf16.mxu0 %v6476_v0  ;;  %5230 = vmatprep.subr.bf16.mxu1 %v6476_v0  ;;  %v6367_v9 = vld [vmem:[%s6605_s24 + $0x30] sm:$0xff]   ;;  %v6368_v10 = vld [vmem:[%s6605_s24 + $0x38] sm:$0xff]   ;;  %s6481_s27 = smov 24   ;;  %s6482_s18 = smov 56  }
  0x34   : > { %331 = vst.msk [vmem:[#allocation2 + $0x60] sm:$0xff] %vm317_vm0, %v6476_v0  ;;  %332 = vst.msk [vmem:[#allocation2 + $0x68] sm:$0xff] %vm317_vm0, %v6476_v0  ;;  %v6369_v11 = vld [vmem:[%s6605_s24 + $0x40] sm:$0xff]   ;;  %v6370_v12 = vld [vmem:[%s6605_s24 + $0x48] sm:$0xff]   ;;  %s6483_s30 = smov 32   ;;  %s6484_s8 = smov 48  }
  0x35   : > { %334 = vst.msk [vmem:[#allocation2 + $0x78] sm:$0xff] %vm317_vm0, %v6476_v0  ;;  %335 = vst.msk [vmem:[#allocation2 + $0x80] sm:$0xff] %vm317_vm0, %v6476_v0  ;;  %v6371_v13 = vld [vmem:[%s6605_s24 + $0x50] sm:$0xff]   ;;  %v6372_v14 = vld [vmem:[%s6605_s24 + $0x58] sm:$0xff]   ;;  %s6485_s11 = smov 64   ;;  %vm1387_vm5 = vcmask 130048  }
  0x36   : > { %337 = vst.msk [vmem:[#allocation2 + $0x90] sm:$0xff] %vm317_vm0, %v6476_v0  ;;  %338 = vst.msk [vmem:[#allocation2 + $0x98] sm:$0xff] %vm317_vm0, %v6476_v0  ;;  %5223 = vmatpush3.bf16.msra.mxu0 %v6699_v2  ;;  %5231 = vmatpush3.bf16.msra.mxu1 %v6699_v2  ;;  %v6373_v15 = vld [vmem:[%s6605_s24 + $0x60] sm:$0xff]   ;;  %v6374_v16 = vld [vmem:[%s6605_s24 + $0x68] sm:$0xff]   ;;  %vm1390_vm6 = vcmask 195584   ;;  %vm1395_vm7 = vcmask 326656  }
  0x37   : > { %340 = vst.msk [vmem:[#allocation2 + $0xa8] sm:$0xff] %vm317_vm0, %v6476_v0  ;;  %341 = vst.msk [vmem:[#allocation2 + $0xb0] sm:$0xff] %vm317_vm0, %v6476_v0  ;;  %5236 = vmatprep.subr.bf16.mxu0 %v6476_v0  ;;  %5244 = vmatprep.subr.bf16.mxu1 %v6476_v0  ;;  %v6375_v23 = vld [vmem:[%s6605_s24 + $0x70] sm:$0xff]   ;;  %v6376_v24 = vld [vmem:[%s6605_s24 + $0x78] sm:$0xff]   ;;  %vm1398_vm8 = vcmask 392192   ;;  %vm1401_vm9 = vcmask 457728  }
  0x38   : > { %343 = vst.msk [vmem:[#allocation2 + $0xc0] sm:$0xff] %vm317_vm0, %v6476_v0  ;;  %344 = vst.msk [vmem:[#allocation2 + $0xc8] sm:$0xff] %vm317_vm0, %v6476_v0  ;;  %v1305_v17 = vld [vmem:[#allocation2 + $0x1] sm:$0xff]  ;;  %v6868_v25 = vld [vmem:[%s7977_s2] ss:$0 sm:$0xff]  ;;  %vm1404_vm10 = vcmask 523264  }
  0x39   : > { %346 = vst.msk [vmem:[#allocation2 + $0xd8] sm:$0xff] %vm317_vm0, %v6476_v0  ;;  %347 = vst.msk [vmem:[#allocation2 + $0xe0] sm:$0xff] %vm317_vm0, %v6476_v0  ;;  %5225 = vmatmul.mubr.msk.bf16.vlgmr.msra.gmra.mxu0 %vm398_vm2, %v6361_v3  ;;  %5233 = vmatmul.mubr.msk.bf16.vlgmr.msra.gmra.mxu1 %vm398_vm2, %v6362_v4  ;;  %v1307_v20 = vld [vmem:[#allocation2 + $0x2] sm:$0xff]  ;;  %v6377_v32 = vld [vmem:[%s7978_s3 + $0x20] ss:$0 sps:$4 sm:$0xff]   ;;  %vm1441_vm11 = vcmask 588800  }
  0x3a   : > { %349 = vst.msk [vmem:[#allocation2 + $0xf0] sm:$0xff] %vm317_vm0, %v6476_v0  ;;  %350 = vst.msk [vmem:[#allocation2 + $0xf8] sm:$0xff] %vm317_vm0, %v6476_v0  ;;  %5237 = vmatpush3.bf16.msra.mxu0 %v6692_v1  ;;  %5240 = vmatprep.mubr.msk.bf16.mxu0 %vm6477_vm1, %v6476_v0  ;;  %v6876_v37 = vsel %vm1445_vm4, %v6377_v32, 0  ;;  %v6378_v44 = vld [vmem:[%s7978_s3 + $0x18] sm:$0xff]   ;;  %v6379_v52 = vld [vmem:[%s7978_s3 + $0x10] sm:$0xff]   ;;  %p294_p8 = scmp.lt.s32.totalorder %s6545_s28, 1 }
  0x3b   : > { %352 = vst.msk [vmem:[#allocation2 + $0x108] sm:$0xff] %vm317_vm0, %v6476_v0  ;;  %353 = vst.msk [vmem:[#allocation2 + $0x110] sm:$0xff] %vm317_vm0, %v6476_v0  ;;  %5238 = vmatprep.subr.bf16.mxu0 %v6476_v0  ;;  %5245 = vmatpush3.bf16.msra.mxu1 %v6692_v1  ;;  %v6380_v63 = vld [vmem:[%s7978_s3 + $0x8] sm:$0xff]   ;;  %vm1562_vm12 = vcmask 257024  }
  0x3c   : > { %355 = vst.msk [vmem:[#allocation2 + $0x120] sm:$0xff] %vm317_vm0, %v6476_v0  ;;  %356 = vst.msk [vmem:[#allocation2 + $0x128] sm:$0xff] %vm317_vm0, %v6476_v0  ;;  %5246 = vmatprep.subr.bf16.mxu1 %v6476_v0  ;;  %5248 = vmatprep.mubr.msk.bf16.mxu1 %vm6477_vm1, %v6476_v0  ;;  %s7993_s28 = smov (!%p294_p8, %s6545_s28), 1 }
  0x3d   : > { %358 = vst.msk [vmem:[#allocation2 + $0x138] sm:$0xff] %vm317_vm0, %v6476_v0  ;;  %359 = vst.msk [vmem:[#allocation2 + $0x140] sm:$0xff] %vm317_vm0, %v6476_v0 }
  0x3e   : > { %361 = vst.msk [vmem:[#allocation2 + $0x150] sm:$0xff] %vm317_vm0, %v6476_v0  ;;  %362 = vst.msk [vmem:[#allocation2 + $0x158] sm:$0xff] %vm317_vm0, %v6476_v0  ;;  %5239 = vmatpush3.bf16.msra.mxu0 %v6699_v2 }
  0x3f   : > { %364 = vst.msk [vmem:[#allocation2 + $0x168] sm:$0xff] %vm317_vm0, %v6476_v0  ;;  %365 = vst.msk [vmem:[#allocation2 + $0x170] sm:$0xff] %vm317_vm0, %v6476_v0  ;;  %5247 = vmatpush3.bf16.msra.mxu1 %v6699_v2  ;;  %5252 = vmatprep.subr.bf16.mxu0 %v6476_v0 }
  0x40   : > { %367 = vst.msk [vmem:[#allocation2 + $0x180] sm:$0xff] %vm317_vm0, %v6476_v0  ;;  %368 = vst.msk [vmem:[#allocation2 + $0x188] sm:$0xff] %vm317_vm0, %v6476_v0  ;;  %5260 = vmatprep.subr.bf16.mxu1 %v6476_v0 }
  0x41   : > { %370 = vst.msk [vmem:[#allocation2 + $0x198] sm:$0xff] %vm317_vm0, %v6476_v0  ;;  %371 = vst.msk [vmem:[#allocation2 + $0x1a0] sm:$0xff] %vm317_vm0, %v6476_v0  ;;  %5241 = vmatmul.mubr.msk.bf16.vlgmr.msra.gmra.mxu0 %vm398_vm2, %v6363_v5 }
  0x42   : > { %5249 = vmatmul.mubr.msk.bf16.vlgmr.msra.gmra.mxu1 %vm398_vm2, %v6364_v6  ;;  %5253 = vmatpush3.bf16.msra.mxu0 %v6692_v1  ;;  %324 = vst.msk [vmem:[#allocation2 + $0x28] sm:$0x3] %vm320_vm3, %v6476_v0  ;;  %321 = vst.msk [vmem:[#allocation2 + $0x10] sm:$0x3] %vm320_vm3, %v6476_v0 }
  0x43   : > { %5254 = vmatprep.subr.bf16.mxu0 %v6476_v0  ;;  %5256 = vmatprep.mubr.msk.bf16.mxu0 %vm6477_vm1, %v6476_v0  ;;  %327 = vst.msk [vmem:[#allocation2 + $0x40] sm:$0x3] %vm320_vm3, %v6476_v0  ;;  %330 = vst.msk [vmem:[#allocation2 + $0x58] sm:$0x3] %vm320_vm3, %v6476_v0 }
  0x44   : > { %5261 = vmatpush3.bf16.msra.mxu1 %v6692_v1  ;;  %5264 = vmatprep.mubr.msk.bf16.mxu1 %vm6477_vm1, %v6476_v0  ;;  %333 = vst.msk [vmem:[#allocation2 + $0x70] sm:$0x3] %vm320_vm3, %v6476_v0  ;;  %336 = vst.msk [vmem:[#allocation2 + $0x88] sm:$0x3] %vm320_vm3, %v6476_v0 }
  0x45   : > { %5262 = vmatprep.subr.bf16.mxu1 %v6476_v0  ;;  %339 = vst.msk [vmem:[#allocation2 + $0xa0] sm:$0x3] %vm320_vm3, %v6476_v0  ;;  %342 = vst.msk [vmem:[#allocation2 + $0xb8] sm:$0x3] %vm320_vm3, %v6476_v0 }
  0x46   : > { %5255 = vmatpush3.bf16.msra.mxu0 %v6699_v2  ;;  %345 = vst.msk [vmem:[#allocation2 + $0xd0] sm:$0x3] %vm320_vm3, %v6476_v0  ;;  %348 = vst.msk [vmem:[#allocation2 + $0xe8] sm:$0x3] %vm320_vm3, %v6476_v0 }
  0x47   : > { %5268 = vmatprep.subr.bf16.mxu0 %v6476_v0  ;;  %351 = vst.msk [vmem:[#allocation2 + $0x100] sm:$0x3] %vm320_vm3, %v6476_v0  ;;  %354 = vst.msk [vmem:[#allocation2 + $0x118] sm:$0x3] %vm320_vm3, %v6476_v0 }
  0x48   : > { %5263 = vmatpush3.bf16.msra.mxu1 %v6699_v2  ;;  %357 = vst.msk [vmem:[#allocation2 + $0x130] sm:$0x3] %vm320_vm3, %v6476_v0  ;;  %360 = vst.msk [vmem:[#allocation2 + $0x148] sm:$0x3] %vm320_vm3, %v6476_v0 }
  0x49   : > { %5257 = vmatmul.mubr.msk.bf16.vlgmr.msra.gmra.mxu0 %vm398_vm2, %v6365_v7  ;;  %5276 = vmatprep.subr.bf16.mxu1 %v6476_v0  ;;  %363 = vst.msk [vmem:[#allocation2 + $0x160] sm:$0x3] %vm320_vm3, %v6476_v0  ;;  %366 = vst.msk [vmem:[#allocation2 + $0x178] sm:$0x3] %vm320_vm3, %v6476_v0  ;;  %v1306_v18 = vld [vmem:[#allocation2 + $0x9] sm:$0xff] }
  0x4a   : > { %5269 = vmatpush3.bf16.msra.mxu0 %v6692_v1  ;;  %5272 = vmatprep.mubr.msk.bf16.mxu0 %vm6477_vm1, %v6476_v0  ;;  %369 = vst.msk [vmem:[#allocation2 + $0x190] sm:$0x3] %vm320_vm3, %v6476_v0  ;;  %372 = vst.msk [vmem:[#allocation2 + $0x1a8] sm:$0x3] %vm320_vm3, %v6476_v0  ;;  %v5719_v19 = vpack.i.bf16 %v1306_v18, %v1305_v17  ;;  %v1308_v21 = vld [vmem:[#allocation2 + $0xa] sm:$0xff] }
  0x4b   : > { %5265 = vmatmul.mubr.msk.bf16.vlgmr.msra.gmra.mxu1 %vm398_vm2, %v6366_v8  ;;  %5270 = vmatprep.subr.bf16.mxu0 %v6476_v0  ;;  %v5724_v22 = vpack.i.bf16 %v1308_v21, %v1307_v20 }
  0x4c   : > { %5277 = vmatpush3.bf16.msra.mxu1 %v6692_v1  ;;  %5280 = vmatprep.mubr.msk.bf16.mxu1 %vm6477_vm1, %v6476_v0 }
  0x4d   : > { %5278 = vmatprep.subr.bf16.mxu1 %v6476_v0  ;;  %5720 = vrot.lane.b32.xlu0 %v5719_v19, %s6478_s19 }
  0x4e   : > { %5271 = vmatpush3.bf16.msra.mxu0 %v6699_v2 }
  0x4f   : > { %5284 = vmatprep.subr.bf16.mxu0 %v6476_v0 }
  0x50   : > { %5279 = vmatpush3.bf16.msra.mxu1 %v6699_v2 }
  0x51   : > { %5273 = vmatmul.mubr.msk.bf16.vlgmr.msra.gmra.mxu0 %vm398_vm2, %v6367_v9  ;;  %5292 = vmatprep.subr.bf16.mxu1 %v6476_v0 }
  0x52   : > { %5285 = vmatpush3.bf16.msra.mxu0 %v6692_v1  ;;  %5288 = vmatprep.mubr.msk.bf16.mxu0 %vm6477_vm1, %v6476_v0 }
  0x53   : > { %5281 = vmatmul.mubr.msk.bf16.vlgmr.msra.gmra.mxu1 %vm398_vm2, %v6368_v10  ;;  %5286 = vmatprep.subr.bf16.mxu0 %v6476_v0 }
  0x54   : > { %5293 = vmatpush3.bf16.msra.mxu1 %v6692_v1  ;;  %5296 = vmatprep.mubr.msk.bf16.mxu1 %vm6477_vm1, %v6476_v0 }
  0x55   : > { %5294 = vmatprep.subr.bf16.mxu1 %v6476_v0  ;;  %5725 = vrot.lane.b32.xlu0 %v5724_v22, %s6479_s20 }
  0x56   : > { %5287 = vmatpush3.bf16.msra.mxu0 %v6699_v2 }
  0x57   : > { %5300 = vmatprep.subr.bf16.mxu0 %v6476_v0 }
  0x58   : > { %5295 = vmatpush3.bf16.msra.mxu1 %v6699_v2 }
  0x59   : > { %5289 = vmatmul.mubr.msk.bf16.vlgmr.msra.gmra.mxu0 %vm398_vm2, %v6369_v11  ;;  %5308 = vmatprep.subr.bf16.mxu1 %v6476_v0 }
  0x5a   : > { %5301 = vmatpush3.bf16.msra.mxu0 %v6692_v1  ;;  %5304 = vmatprep.mubr.msk.bf16.mxu0 %vm6477_vm1, %v6476_v0 }
  0x5b   : > { %5297 = vmatmul.mubr.msk.bf16.vlgmr.msra.gmra.mxu1 %vm398_vm2, %v6370_v12  ;;  %5302 = vmatprep.subr.bf16.mxu0 %v6476_v0 }
  0x5c   : > { %5309 = vmatpush3.bf16.msra.mxu1 %v6692_v1  ;;  %5312 = vmatprep.mubr.msk.bf16.mxu1 %vm6477_vm1, %v6476_v0 }
  0x5d   : > { %5310 = vmatprep.subr.bf16.mxu1 %v6476_v0 }
  0x5e   : > { %5303 = vmatpush3.bf16.msra.mxu0 %v6699_v2 }
  0x5f   : > { %5316 = vmatprep.subr.bf16.mxu0 %v6476_v0 }
  0x60   : > { %5311 = vmatpush3.bf16.msra.mxu1 %v6699_v2 }
  0x61   : > { %5305 = vmatmul.mubr.msk.bf16.vlgmr.msra.gmra.mxu0 %vm398_vm2, %v6371_v13  ;;  %5324 = vmatprep.subr.bf16.mxu1 %v6476_v0 }
  0x62   : > { %5317 = vmatpush3.bf16.msra.mxu0 %v6692_v1  ;;  %5320 = vmatprep.mubr.msk.bf16.mxu0 %vm6477_vm1, %v6476_v0 }
  0x63   : > { %5313 = vmatmul.mubr.msk.bf16.vlgmr.msra.gmra.mxu1 %vm398_vm2, %v6372_v14  ;;  %5318 = vmatprep.subr.bf16.mxu0 %v6476_v0 }
  0x64   : > { %5325 = vmatpush3.bf16.msra.mxu1 %v6692_v1  ;;  %5328 = vmatprep.mubr.msk.bf16.mxu1 %vm6477_vm1, %v6476_v0 }
  0x65   : > { %5326 = vmatprep.subr.bf16.mxu1 %v6476_v0 }
  0x66   : > { %5319 = vmatpush3.bf16.msra.mxu0 %v6699_v2 }
  0x67   : > { %5332 = vmatprep.subr.bf16.mxu0 %v6476_v0 }
  0x68   : > { %5327 = vmatpush3.bf16.msra.mxu1 %v6699_v2 }
  0x69   : > { %5321 = vmatmul.mubr.msk.bf16.vlgmr.msra.gmra.mxu0 %vm398_vm2, %v6373_v15  ;;  %5340 = vmatprep.subr.bf16.mxu1 %v6476_v0 }
  0x6a   : > { %5333 = vmatpush3.bf16.msra.mxu0 %v6692_v1  ;;  %5336 = vmatprep.mubr.msk.bf16.mxu0 %vm6477_vm1, %v6476_v0 }
  0x6b   : > { %5334 = vmatprep.subr.bf16.mxu0 %v6476_v0  ;;  %5329 = vmatmul.mubr.msk.bf16.vlgmr.msra.gmra.mxu1 %vm398_vm2, %v6374_v16  ;;  %v6381_v16 = vld [vmem:[%s7978_s3] sm:$0xff]  }
  0x6c   : > { %5341 = vmatpush3.bf16.msra.mxu1 %v6692_v1  ;;  %5344 = vmatprep.mubr.msk.bf16.mxu1 %vm6477_vm1, %v6476_v0 }
  0x6d   : > { %5342 = vmatprep.subr.bf16.mxu1 %v6476_v0 }
  0x6e   : > { %5335 = vmatpush3.bf16.msra.mxu0 %v6699_v2 }
  0x6f   : > { %5348 = vmatprep.subr.bf16.mxu0 %v6476_v0 }
  0x70   : > { %5343 = vmatpush3.bf16.msra.mxu1 %v6699_v2 }
  0x71   : > { %5362 = vmatprep.subr.bf16.mxu1 %v6476_v0  ;;  %5337 = vmatmul.mubr.msk.bf16.vlgmr.msra.gmra.mxu0 %vm398_vm2, %v6375_v23 }
  0x72   : > { %5358 = vmatprep.mubr.msk.bf16.mxu0 %vm6477_vm1, %v6476_v0  ;;  %5349 = vmatpush3.bf16.msra.mxu0 %v6876_v37 }
  0x73   : > { %5345 = vmatmul.mubr.msk.bf16.vlgmr.msra.gmra.mxu1 %vm398_vm2, %v6376_v24  ;;  %5350 = vmatprep.subr.bf16.mxu0 %v6476_v0 }
  0x74   : > { %5364 = vmatprep.mubr.msk.bf16.mxu1 %vm6477_vm1, %v6476_v0 }
  0x76   : > { %5351 = vmatpush3.bf16.msra.mxu0 %v6378_v44 }
  0x77   : > { %5352 = vmatprep.subr.bf16.mxu0 %v6476_v0 }
  0x7a   : > { %5353 = vmatpush3.bf16.msra.mxu0 %v6379_v52 }
  0x7b   : > { %5354 = vmatprep.subr.bf16.mxu0 %v6476_v0 }
  0x7e   : > { %5355 = vmatpush3.bf16.msra.mxu0 %v6380_v63 }
  0x7f   : > { %5356 = vmatprep.subr.bf16.mxu0 %v6476_v0 }
  0x82   : > { %5357 = vmatpush3.bf16.msra.mxu0 %v6381_v16 }
  0x83   : > { %5382 = vmatprep.subr.bf16.mxu0 %v6476_v0 }
  0xf9   : > { %v436_v26 = vpop.f32.mrf.mxu0  ;;  %v493_v27 = vpop.f32.mrf.mxu1 }
  0xfa   : > { %v437_v28 = vadd.f32 %v6868_v25, %v436_v26  ;;  %v494_v29 = vadd.f32 %v6868_v25, %v493_v27 }
  0xfb   : > { %v5226_v30 = vpop.f32.mrf.mxu0  ;;  %v5234_v31 = vpop.f32.mrf.mxu1 }
  0xfc   : > { %v443_v33 = vmax.f32 %v437_v28, 0.0  ;;  %v500_v34 = vmax.f32 %v494_v29, 0.0 }
  0xfd   : > { %v439_v35 = vpop.f32.mrf.mxu0  ;;  %v496_v36 = vpop.f32.mrf.mxu1 }
  0xfe   : > { %446 = vst.msk [vmem:[#allocation2 + $0x19] sm:$0xff] %vm317_vm0, %v443_v33  ;;  %503 = vst.msk [vmem:[#allocation2 + $0x31] sm:$0xff] %vm317_vm0, %v500_v34  ;;  %v440_v38 = vadd.f32 %v6868_v25, %v439_v35  ;;  %v497_v39 = vadd.f32 %v6868_v25, %v496_v36 }
  0xff   : > { %v5227_v40 = vpop.f32.mrf.mxu0  ;;  %v5235_v41 = vpop.f32.mrf.mxu1 }
 0x100   : > { %v444_v42 = vmax.f32 %v440_v38, 0.0  ;;  %v501_v43 = vmax.f32 %v497_v39, 0.0 }
 0x101   : > { %v550_v45 = vpop.f32.mrf.mxu0 }
 0x102   : > { %447 = vst.msk [vmem:[#allocation2 + $0x21] sm:$0xff] %vm317_vm0, %v444_v42  ;;  %504 = vst.msk [vmem:[#allocation2 + $0x39] sm:$0xff] %vm317_vm0, %v501_v43  ;;  %v551_v46 = vadd.f32 %v6868_v25, %v550_v45  ;;  %v607_v47 = vpop.f32.mrf.mxu1 }
 0x103   : > { %v5242_v48 = vpop.f32.mrf.mxu0  ;;  %v608_v49 = vadd.f32 %v6868_v25, %v607_v47 }
 0x104   : > { %v557_v50 = vmax.f32 %v551_v46, 0.0  ;;  %v5250_v51 = vpop.f32.mrf.mxu1 }
 0x105   : > { %v553_v53 = vpop.f32.mrf.mxu0  ;;  %v614_v54 = vmax.f32 %v608_v49, 0.0  ;;  %v1309_v59 = vld [vmem:[#allocation2 + $0x18] sm:$0xff]  ;;  %v1315_v23 = vld [vmem:[#allocation2 + $0x30] sm:$0xff] }
 0x106   : > { %560 = vst.msk [vmem:[#allocation2 + $0x49] sm:$0xff] %vm317_vm0, %v557_v50  ;;  %v554_v55 = vadd.f32 %v6868_v25, %v553_v53  ;;  %v610_v56 = vpop.f32.mrf.mxu1  ;;  %v1317_v60 = vld [vmem:[#allocation2 + $0x31] sm:$0xff]  ;;  %v1311_v17 = vld [vmem:[#allocation2 + $0x19] sm:$0xff] }
 0x107   : > { %617 = vst.msk [vmem:[#allocation2 + $0x61] sm:$0xff] %vm317_vm0, %v614_v54  ;;  %v611_v57 = vadd.f32 %v6868_v25, %v610_v56  ;;  %v5243_v58 = vpop.f32.mrf.mxu0 }
 0x108   : > { %v558_v61 = vmax.f32 %v554_v55, 0.0  ;;  %v5251_v62 = vpop.f32.mrf.mxu1 }
 0x109   : > { %v1313_v1 = vld [vmem:[#allocation2 + $0x1a] sm:$0xff]  ;;  %v1314_v2 = vld [vmem:[#allocation2 + $0x22] sm:$0xff]  ;;  %v615_v4 = vmax.f32 %v611_v57, 0.0  ;;  %v664_v5 = vpop.f32.mrf.mxu0  ;;  %v1319_v35 = vld [vmem:[#allocation2 + $0x32] sm:$0xff] }
 0x10a   : > { %v6903_v3 = vld [vmem:[#allocation2 + $0x20] sm:$0xff]  ;;  %v6905_v6 = vpack.i.bf16 %v1314_v2, %v1313_v1  ;;  %561 = vst.msk [vmem:[#allocation2 + $0x51] sm:$0xff] %vm317_vm0, %v558_v61  ;;  %v665_v9 = vadd.f32 %v6868_v25, %v664_v5  ;;  %v1316_v24 = vld [vmem:[#allocation2 + $0x38] sm:$0xff] }
 0x10b   : > { %v5729_v7 = vpack.i.bf16 %v6903_v3, %v1309_v59  ;;  %v1318_v8 = vld [vmem:[#allocation2 + $0x39] sm:$0xff]  ;;  %v1312_v10 = vld [vmem:[#allocation2 + $0x21] sm:$0xff]  ;;  %618 = vst.msk [vmem:[#allocation2 + $0x69] sm:$0xff] %vm317_vm0, %v615_v4  ;;  %v5258_v11 = vpop.f32.mrf.mxu0  ;;  %v721_v12 = vpop.f32.mrf.mxu1  ;;  %v5744_v32 = vpack.i.bf16 %v1316_v24, %v1315_v23 }
 0x10c   : > { %5740 = vrot.lane.b32.xlu0 %v6905_v6, %s6480_s23  ;;  %v6915_v13 = vpack.i.bf16 %v1318_v8, %v1317_v60  ;;  %v671_v14 = vmax.f32 %v665_v9, 0.0  ;;  %v722_v15 = vadd.f32 %v6868_v25, %v721_v12  ;;  %v5734_v20 = vpack.i.bf16 %v1312_v10, %v1311_v17  ;;  %v1320_v36 = vld [vmem:[#allocation2 + $0x3a] sm:$0xff] }
 0x10d   : > { %5730 = vrot.lane.b32.xlu1 %v5729_v7, %s6481_s27  ;;  %v667_v18 = vpop.f32.mrf.mxu0  ;;  %v5266_v19 = vpop.f32.mrf.mxu1  ;;  %v6935_v44 = vpack.i.bf16 %v1320_v36, %v1319_v35  ;;  %v1579_v51 = vld [vmem:[#allocation2 + $0x49] sm:$0xff] }
 0x10e   : > { %674 = vst.msk [vmem:[#allocation2 + $0x79] sm:$0xff] %vm317_vm0, %v671_v14  ;;  %v668_v21 = vadd.f32 %v6868_v25, %v667_v18  ;;  %v728_v22 = vmax.f32 %v722_v15, 0.0  ;;  %v1577_v62 = vld [vmem:[#allocation2 + $0x48] sm:$0xff]  ;;  %v1785_v36 = vld [vmem:[#allocation2 + $0x60] sm:$0xff] }
 0x10f   : > { %v724_v26 = vpop.f32.mrf.mxu1  ;;  %v5259_v27 = vpop.f32.mrf.mxu0 }
 0x110   : > { %5750 = vrot.lane.b32.xlu0 %v6915_v13, %s6482_s18  ;;  %v672_v28 = vmax.f32 %v668_v21, 0.0  ;;  %731 = vst.msk [vmem:[#allocation2 + $0x91] sm:$0xff] %vm317_vm0, %v728_v22  ;;  %v725_v29 = vadd.f32 %v6868_v25, %v724_v26 }
 0x111   : > { %5735 = vrot.lane.b32.xlu1 %v5734_v20, %s6483_s30  ;;  %v778_v30 = vpop.f32.mrf.mxu0  ;;  %v5267_v31 = vpop.f32.mrf.mxu1  ;;  %v1580_v52 = vld [vmem:[#allocation2 + $0x51] sm:$0xff] }
 0x112   : > { %675 = vst.msk [vmem:[#allocation2 + $0x81] sm:$0xff] %vm317_vm0, %v672_v28  ;;  %v729_v33 = vmax.f32 %v725_v29, 0.0  ;;  %v779_v34 = vadd.f32 %v6868_v25, %v778_v30  ;;  %v6950_v59 = vpack.i.bf16 %v1580_v52, %v1579_v51  ;;  %v1578_v63 = vld [vmem:[#allocation2 + $0x50] sm:$0xff]  ;;  %v1787_v31 = vld [vmem:[#allocation2 + $0x61] sm:$0xff] }
 0x113   : > { %v5274_v38 = vpop.f32.mrf.mxu0  ;;  %v835_v39 = vpop.f32.mrf.mxu1  ;;  %v1581_v11 = vld [vmem:[#allocation2 + $0x4a] sm:$0xff]  ;;  %v1582_v12 = vld [vmem:[#allocation2 + $0x52] sm:$0xff] }
 0x114   : > { %5760 = vrot.lane.b32.xlu0 %v5734_v20, %s6478_s19  ;;  %732 = vst.msk [vmem:[#allocation2 + $0x99] sm:$0xff] %vm317_vm0, %v729_v33  ;;  %v785_v40 = vmax.f32 %v779_v34, 0.0  ;;  %v836_v41 = vadd.f32 %v6868_v25, %v835_v39  ;;  %v5794_v20 = vpack.i.bf16 %v1582_v12, %v1581_v11  ;;  %v1786_v38 = vld [vmem:[#allocation2 + $0x68] sm:$0xff] }
 0x115   : > { %5745 = vrot.lane.b32.xlu1 %v5744_v32, %s6484_s8  ;;  %v781_v42 = vpop.f32.mrf.mxu0  ;;  %v5282_v43 = vpop.f32.mrf.mxu1  ;;  %v1995_v51 = vld [vmem:[#allocation2 + $0x79] sm:$0xff] }
 0x116   : > { %788 = vst.msk [vmem:[#allocation2 + $0xa9] sm:$0xff] %vm317_vm0, %v785_v40  ;;  %v782_v45 = vadd.f32 %v6868_v25, %v781_v42  ;;  %v842_v46 = vmax.f32 %v836_v41, 0.0  ;;  %v5824_v41 = vpack.i.bf16 %v1786_v38, %v1785_v36  ;;  %v1789_v43 = vld [vmem:[#allocation2 + $0x62] sm:$0xff] }
 0x117   : > { %v838_v47 = vpop.f32.mrf.mxu1  ;;  %v5275_v48 = vpop.f32.mrf.mxu0 }
 0x118   : > { %5770 = vrot.lane.b32.xlu0 %v5744_v32, %s6481_s27  ;;  %v786_v49 = vmax.f32 %v782_v45, 0.0  ;;  %845 = vst.msk [vmem:[#allocation2 + $0xc1] sm:$0xff] %vm317_vm0, %v842_v46  ;;  %v839_v50 = vadd.f32 %v6868_v25, %v838_v47  ;;  %v1788_v32 = vld [vmem:[#allocation2 + $0x69] sm:$0xff] }
 0x119   : > { %5755 = vrot.lane.b32.xlu1 %v6935_v44, %s6485_s11  ;;  %v892_v53 = vpop.f32.mrf.mxu0  ;;  %v5283_v54 = vpop.f32.mrf.mxu1  ;;  %v5829_v35 = vpack.i.bf16 %v1788_v32, %v1787_v31  ;;  %v1790_v45 = vld [vmem:[#allocation2 + $0x6a] sm:$0xff]  ;;  %v1996_v52 = vld [vmem:[#allocation2 + $0x81] sm:$0xff] }
 0x11a   : > { %789 = vst.msk [vmem:[#allocation2 + $0xb1] sm:$0xff] %vm317_vm0, %v786_v49  ;;  %v843_v55 = vmax.f32 %v839_v50, 0.0  ;;  %v893_v56 = vadd.f32 %v6868_v25, %v892_v53  ;;  %v5834_v48 = vpack.i.bf16 %v1790_v45, %v1789_v43  ;;  %v5869_v53 = vpack.i.bf16 %v1996_v52, %v1995_v51  ;;  %v1993_v54 = vld [vmem:[#allocation2 + $0x78] sm:$0xff] }
 0x11b   : > { %v5290_v57 = vpop.f32.mrf.mxu0  ;;  %v949_v58 = vpop.f32.mrf.mxu1 }
 0x11c   : > { %5780 = vrot.lane.b32.xlu0 %v6935_v44, %s6480_s23  ;;  %846 = vst.msk [vmem:[#allocation2 + $0xc9] sm:$0xff] %vm317_vm0, %v843_v55  ;;  %v899_v60 = vmax.f32 %v893_v56, 0.0  ;;  %v950_v61 = vadd.f32 %v6868_v25, %v949_v58  ;;  %v1994_v55 = vld [vmem:[#allocation2 + $0x80] sm:$0xff] }
 0x11d   : > { %5765 = vrot.lane.b32.xlu1 %v6905_v6, %s6479_s20  ;;  %v895_v1 = vpop.f32.mrf.mxu0  ;;  %v5298_v2 = vpop.f32.mrf.mxu1  ;;  %v5784_v6 = vpack.i.bf16 %v1578_v63, %v1577_v62  ;;  %v5864_v58 = vpack.i.bf16 %v1994_v55, %v1993_v54  ;;  %v1304_v55 = vld [vmem:[#allocation2 + $0x8] sm:$0xff] }
 0x11e   : > { %902 = vst.msk [vmem:[#allocation2 + $0xd9] sm:$0xff] %vm317_vm0, %v899_v60  ;;  %v896_v4 = vadd.f32 %v6868_v25, %v895_v1  ;;  %v956_v5 = vmax.f32 %v950_v61, 0.0  ;;  %v1997_v60 = vld [vmem:[#allocation2 + $0x7a] sm:$0xff]  ;;  %v1998_v61 = vld [vmem:[#allocation2 + $0x82] sm:$0xff] }
 0x11f   : > { %v952_v7 = vpop.f32.mrf.mxu1  ;;  %v5291_v8 = vpop.f32.mrf.mxu0  ;;  %v5874_v2 = vpack.i.bf16 %v1998_v61, %v1997_v60  ;;  %v2617_v45 = vld [vmem:[#allocation2 + $0xc0] sm:$0xff] }
 0x120   : > { %5790 = vrot.lane.b32.xlu0 %v6950_v59, %s6482_s18  ;;  %v900_v9 = vmax.f32 %v896_v4, 0.0  ;;  %959 = vst.msk [vmem:[#allocation2 + $0xf1] sm:$0xff] %vm317_vm0, %v956_v5  ;;  %v953_v10 = vadd.f32 %v6868_v25, %v952_v7  ;;  %v2203_v7 = vld [vmem:[#allocation2 + $0x91] sm:$0xff]  ;;  %v2204_v8 = vld [vmem:[#allocation2 + $0x99] sm:$0xff] }
 0x121   : > { %5775 = vrot.lane.b32.xlu1 %v6915_v13, %s6483_s30  ;;  %v1006_v14 = vpop.f32.mrf.mxu0  ;;  %v5299_v15 = vpop.f32.mrf.mxu1 }
 0x122   : > { %903 = vst.msk [vmem:[#allocation2 + $0xe1] sm:$0xff] %vm317_vm0, %v900_v9  ;;  %v957_v16 = vmax.f32 %v953_v10, 0.0  ;;  %v1007_v17 = vadd.f32 %v6868_v25, %v1006_v14  ;;  %v2201_v9 = vld [vmem:[#allocation2 + $0x90] sm:$0xff]  ;;  %v2202_v10 = vld [vmem:[#allocation2 + $0x98] sm:$0xff] }
 0x123   : > { %v5306_v18 = vpop.f32.mrf.mxu0  ;;  %v1063_v19 = vpop.f32.mrf.mxu1  ;;  %v5904_v14 = vpack.i.bf16 %v2202_v10, %v2201_v9  ;;  %v2620_v43 = vld [vmem:[#allocation2 + $0xc9] sm:$0xff] }
 0x124   : > { %5800 = vrot.lane.b32.xlu0 %v6915_v13, %s6478_s19  ;;  %960 = vst.msk [vmem:[#allocation2 + $0xf9] sm:$0xff] %vm317_vm0, %v957_v16  ;;  %v1013_v21 = vmax.f32 %v1007_v17, 0.0  ;;  %v1064_v22 = vadd.f32 %v6868_v25, %v1063_v19  ;;  %v2205_v16 = vld [vmem:[#allocation2 + $0x92] sm:$0xff]  ;;  %v2206_v17 = vld [vmem:[#allocation2 + $0x9a] sm:$0xff] }
 0x125   : > { %5785 = vrot.lane.b32.xlu1 %v5784_v6, %s6484_s8  ;;  %v1009_v23 = vpop.f32.mrf.mxu0  ;;  %v5314_v24 = vpop.f32.mrf.mxu1  ;;  %v2827_v51 = vld [vmem:[#allocation2 + $0xd9] sm:$0xff] }
 0x126   : > { %1016 = vst.msk [vmem:[#allocation2 + $0x109] sm:$0xff] %vm317_vm0, %v1013_v21  ;;  %v1010_v26 = vadd.f32 %v6868_v25, %v1009_v23  ;;  %v1070_v27 = vmax.f32 %v1064_v22, 0.0  ;;  %v5914_v21 = vpack.i.bf16 %v2206_v17, %v2205_v16  ;;  %v2411_v24 = vld [vmem:[#allocation2 + $0xa9] sm:$0xff]  ;;  %v2825_v61 = vld [vmem:[#allocation2 + $0xd8] sm:$0xff] }
 0x127   : > { %v1066_v28 = vpop.f32.mrf.mxu1  ;;  %v5307_v29 = vpop.f32.mrf.mxu0 }
 0x128   : > { %5810 = vrot.lane.b32.xlu0 %v5784_v6, %s6481_s27  ;;  %v1014_v13 = vmax.f32 %v1010_v26, 0.0  ;;  %1073 = vst.msk [vmem:[#allocation2 + $0x121] sm:$0xff] %vm317_vm0, %v1070_v27  ;;  %v1067_v30 = vadd.f32 %v6868_v25, %v1066_v28  ;;  %v5909_v6 = vpack.i.bf16 %v2204_v8, %v2203_v7  ;;  %v2412_v26 = vld [vmem:[#allocation2 + $0xb1] sm:$0xff]  ;;  %v2409_v28 = vld [vmem:[#allocation2 + $0xa8] sm:$0xff] }
 0x129   : > { %5795 = vrot.lane.b32.xlu1 %v5794_v20, %s6485_s11  ;;  %v5315_v33 = vpop.f32.mrf.mxu1  ;;  %v1120_v39 = vpop.f32.mrf.mxu0  ;;  %v5949_v27 = vpack.i.bf16 %v2412_v26, %v2411_v24  ;;  %v2410_v29 = vld [vmem:[#allocation2 + $0xb0] sm:$0xff]  ;;  %v2828_v52 = vld [vmem:[#allocation2 + $0xe1] sm:$0xff] }
 0x12a   : > { %1017 = vst.msk [vmem:[#allocation2 + $0x111] sm:$0xff] %vm317_vm0, %v1014_v13  ;;  %v1071_v34 = vmax.f32 %v1067_v30, 0.0  ;;  %v1121_v40 = vadd.f32 %v6868_v25, %v1120_v39  ;;  %v5944_v31 = vpack.i.bf16 %v2410_v29, %v2409_v28  ;;  %v2413_v33 = vld [vmem:[#allocation2 + $0xaa] sm:$0xff]  ;;  %v2829_v10 = vld [vmem:[#allocation2 + $0xda] sm:$0xff] }
 0x12b   : > { %v5322_v42 = vpop.f32.mrf.mxu0  ;;  %v1177_v56 = vpop.f32.mrf.mxu1 }
 0x12c   : > { %5820 = vrot.lane.b32.xlu0 %v5794_v20, %s6480_s23  ;;  %1074 = vst.msk [vmem:[#allocation2 + $0x129] sm:$0xff] %vm317_vm0, %v1071_v34  ;;  %v1127_v46 = vmax.f32 %v1121_v40, 0.0  ;;  %v1178_v57 = vadd.f32 %v6868_v25, %v1177_v56  ;;  %v2414_v34 = vld [vmem:[#allocation2 + $0xb2] sm:$0xff]  ;;  %v2619_v42 = vld [vmem:[#allocation2 + $0xc1] sm:$0xff] }
 0x12d   : > { %5805 = vrot.lane.b32.xlu1 %v6935_v44, %s6479_s20  ;;  %v1123_v47 = vpop.f32.mrf.mxu0  ;;  %v5954_v39 = vpack.i.bf16 %v2414_v34, %v2413_v33  ;;  %v1303_v56 = vld [vmem:[#allocation2] sm:$0xff] }
 0x12e   : > { %1130 = vst.msk [vmem:[#allocation2 + $0x139] sm:$0xff] %vm317_vm0, %v1127_v46  ;;  %v1124_v44 = vadd.f32 %v6868_v25, %v1123_v47  ;;  %v1184_v62 = vmax.f32 %v1178_v57, 0.0  ;;  %v2618_v46 = vld [vmem:[#allocation2 + $0xc8] sm:$0xff] }
 0x12f   : > { %v5323_v49 = vpop.f32.mrf.mxu0  ;;  %v5984_v47 = vpack.i.bf16 %v2618_v46, %v2617_v45  ;;  %v3033_v45 = vld [vmem:[#allocation2 + $0xf0] sm:$0xff]  ;;  %v3034_v46 = vld [vmem:[#allocation2 + $0xf8] sm:$0xff] }
 0x130   : > { %5830 = vrot.lane.b32.xlu0 %v5829_v35, %s6482_s18  ;;  %v1128_v50 = vmax.f32 %v1124_v44, 0.0  ;;  %1187 = vst.msk [vmem:[#allocation2 + $0x151] sm:$0xff] %vm317_vm0, %v1184_v62  ;;  %v2621_v44 = vld [vmem:[#allocation2 + $0xc2] sm:$0xff] }
 0x131   : > { %5815 = vrot.lane.b32.xlu1 %v6950_v59, %s6483_s30  ;;  %v1234_v11 = vpop.f32.mrf.mxu0  ;;  %v2826_v62 = vld [vmem:[#allocation2 + $0xe0] sm:$0xff] }
 0x132   : > { %1131 = vst.msk [vmem:[#allocation2 + $0x141] sm:$0xff] %vm317_vm0, %v1128_v50  ;;  %v1235_v12 = vadd.f32 %v6868_v25, %v1234_v11  ;;  %v5721_v50 = vpop.permute.xlu0 %5720  ;;  %v6024_v7 = vpack.i.bf16 %v2826_v62, %v2825_v61  ;;  %v2830_v11 = vld [vmem:[#allocation2 + $0xe2] sm:$0xff] }
 0x133   : > { %v5338_v15 = vpop.f32.mrf.mxu0  ;;  %v5722_v54 = vunpack.i.l.bf16 %v5721_v50  ;;  %v3449_v62 = vld [vmem:[#allocation2 + $0x120] sm:$0xff] }
 0x134   : > { %5840 = vrot.lane.b32.xlu0 %v6950_v59, %s6478_s19  ;;  %v5330_v59 = vpop.f32.mrf.mxu1  ;;  %v1241_v18 = vmax.f32 %v1235_v12, 0.0 }
 0x135   : > { %5825 = vrot.lane.b32.xlu1 %v5824_v41, %s6484_s8  ;;  %v1237_v19 = vpop.f32.mrf.mxu0 }
 0x136   : > { %v1180_v63 = vpop.f32.mrf.mxu1  ;;  %1244 = vst.msk [vmem:[#allocation2 + $0x169] sm:$0xff] %vm317_vm0, %v1241_v18  ;;  %v5726_v57 = vpop.permute.xlu0 %5725  ;;  %v6034_v18 = vpack.i.bf16 %v2830_v11, %v2829_v10 }
 0x137   : > { %v1181_v1 = vadd.f32 %v6868_v25, %v1180_v63  ;;  %v5339_v22 = vpop.f32.mrf.mxu0  ;;  %v5728_v59 = vunpack.i.h.bf16 %v5726_v57  ;;  %v5727_v60 = vunpack.i.l.bf16 %v5726_v57  ;;  %v3246_v57 = vld [vmem:[#allocation2 + $0x112] sm:$0xff] }
 0x138   : > { %5850 = vrot.lane.b32.xlu0 %v5824_v41, %s6481_s27  ;;  %v5331_v4 = vpop.f32.mrf.mxu1 }
 0x139   : > { %5835 = vrot.lane.b32.xlu1 %v5834_v48, %s6485_s11  ;;  %v1185_v5 = vmax.f32 %v1181_v1, 0.0  ;;  %v1385_v1 = vsel %vm317_vm0, %v1303_v56, %v5722_v54  ;;  %v3242_v54 = vld [vmem:[#allocation2 + $0x110] sm:$0xff]  ;;  %v3658_v10 = vld [vmem:[#allocation2 + $0x140] sm:$0xff] }
 0x13a   : > { %v1291_v13 = vpop.f32.mrf.mxu1  ;;  %v1388_v8 = vsel %vm1387_vm5, %v1385_v1, %v5727_v60  ;;  %v3245_v56 = vld [vmem:[#allocation2 + $0x10a] sm:$0xff] }
 0x13b   : > { %1188 = vst.msk [vmem:[#allocation2 + $0x159] sm:$0xff] %vm317_vm0, %v1185_v5  ;;  %v1292_v30 = vadd.f32 %v6868_v25, %v1291_v13  ;;  %v3452_v60 = vld [vmem:[#allocation2 + $0x129] sm:$0xff] }
 0x13c   : > { %5860 = vrot.lane.b32.xlu0 %v5834_v48, %s6480_s23  ;;  %v5346_v32 = vpop.f32.mrf.mxu1 }
 0x13d   : > { %5845 = vrot.lane.b32.xlu1 %v5794_v20, %s6479_s20  ;;  %v1238_v20 = vadd.f32 %v6868_v25, %v1237_v19  ;;  %v3036_v32 = vld [vmem:[#allocation2 + $0xf9] sm:$0xff] }
 0x13e   : > { %v1294_v36 = vpop.f32.mrf.mxu1 }
 0x13f   : > { %v1242_v23 = vmax.f32 %v1238_v20, 0.0  ;;  %v1295_v38 = vadd.f32 %v6868_v25, %v1294_v36  ;;  %v5989_v25 = vpack.i.bf16 %v2620_v43, %v2619_v42 }
 0x140   : > { %5870 = vrot.lane.b32.xlu0 %v5869_v53, %s6482_s18  ;;  %v5347_v40 = vpop.f32.mrf.mxu1 }
 0x141   : > { %5855 = vrot.lane.b32.xlu1 %v5829_v35, %s6483_s30  ;;  %1245 = vst.msk [vmem:[#allocation2 + $0x171] sm:$0xff] %vm317_vm0, %v1242_v23  ;;  %v1299_v41 = vmax.f32 %v1295_v38, 0.0 }
 0x143   : > { %1302 = vst.msk [vmem:[#allocation2 + $0x189] sm:$0xff] %vm317_vm0, %v1299_v41 }
 0x144   : > { %5880 = vrot.lane.b32.xlu0 %v5829_v35, %s6478_s19  ;;  %v1298_v35 = vmax.f32 %v1292_v30, 0.0 }
 0x145   : > { %5865 = vrot.lane.b32.xlu1 %v5864_v58, %s6484_s8 }
 0x146   : > { %1301 = vst.msk [vmem:[#allocation2 + $0x181] sm:$0xff] %vm317_vm0, %v1298_v35 }
 0x148   : > { %5890 = vrot.lane.b32.xlu0 %v5864_v58, %s6481_s27  ;;  %v7042_v58 = vpack.i.bf16 %v2828_v52, %v2827_v51  ;;  %v3244_v51 = vld [vmem:[#allocation2 + $0x111] sm:$0xff] }
 0x149   : > { %5875 = vrot.lane.b32.xlu1 %v5874_v2, %s6485_s11 }
 0x14c   : > { %5900 = vrot.lane.b32.xlu0 %v5874_v2, %s6480_s23 }
 0x14d   : > { %5885 = vrot.lane.b32.xlu1 %v5834_v48, %s6479_s20  ;;  %v2622_v48 = vld [vmem:[#allocation2 + $0xca] sm:$0xff] }
 0x14e   : > { %v7034_v49 = vpack.i.bf16 %v2622_v48, %v2621_v44  ;;  %v3037_v44 = vld [vmem:[#allocation2 + $0xf2] sm:$0xff]  ;;  %v3038_v48 = vld [vmem:[#allocation2 + $0xfa] sm:$0xff] }
 0x150   : > { %5910 = vrot.lane.b32.xlu0 %v5909_v6, %s6482_s18 }
 0x151   : > { %5895 = vrot.lane.b32.xlu1 %v5869_v53, %s6483_s30 }
 0x154   : > { %5920 = vrot.lane.b32.xlu0 %v5869_v53, %s6478_s19  ;;  %v5723_v53 = vunpack.i.h.bf16 %v5721_v50  ;;  %v3243_v50 = vld [vmem:[#allocation2 + $0x109] sm:$0xff] }
 0x155   : > { %5905 = vrot.lane.b32.xlu1 %v5904_v14, %s6484_s8  ;;  %v6109_v52 = vpack.i.bf16 %v3244_v51, %v3243_v50 }
 0x156   : > { %v1386_v63 = vsel %vm317_vm0, %v1304_v55, %v5723_v53  ;;  %v3241_v53 = vld [vmem:[#allocation2 + $0x108] sm:$0xff] }
 0x157   : > { %v6104_v55 = vpack.i.bf16 %v3242_v54, %v3241_v53  ;;  %v4281_v53 = vld [vmem:[#allocation2 + $0x180] sm:$0xff]  ;;  %v4282_v54 = vld [vmem:[#allocation2 + $0x188] sm:$0xff] }
 0x158   : > { %5930 = vrot.lane.b32.xlu0 %v5904_v14, %s6481_s27 }
 0x159   : > { %5915 = vrot.lane.b32.xlu1 %v5914_v21, %s6485_s11 }
 0x15c   : > { %5940 = vrot.lane.b32.xlu0 %v5914_v21, %s6480_s23 }
 0x15d   : > { %5925 = vrot.lane.b32.xlu1 %v5874_v2, %s6479_s20 }
 0x160   : > { %5950 = vrot.lane.b32.xlu0 %v5949_v27, %s6482_s18 }
 0x161   : > { %5935 = vrot.lane.b32.xlu1 %v5909_v6, %s6483_s30 }
 0x164   : > { %5960 = vrot.lane.b32.xlu0 %v5909_v6, %s6478_s19  ;;  %v1389_v6 = vsel %vm1387_vm5, %v1386_v63, %v5728_v59  ;;  %v3451_v59 = vld [vmem:[#allocation2 + $0x121] sm:$0xff] }
 0x165   : > { %5945 = vrot.lane.b32.xlu1 %v5944_v31, %s6484_s8  ;;  %v6149_v61 = vpack.i.bf16 %v3452_v60, %v3451_v59  ;;  %v3450_v63 = vld [vmem:[#allocation2 + $0x128] sm:$0xff] }
 0x166   : > { %v6144_v1 = vpack.i.bf16 %v3450_v63, %v3449_v62  ;;  %v4491_v62 = vld [vmem:[#allocation2 + $0x1a0] sm:$0xff] }
 0x168   : > { %5970 = vrot.lane.b32.xlu0 %v5944_v31, %s6481_s27  ;;  %v3035_v31 = vld [vmem:[#allocation2 + $0xf1] sm:$0xff] }
 0x169   : > { %5955 = vrot.lane.b32.xlu1 %v5954_v39, %s6485_s11  ;;  %v6069_v41 = vpack.i.bf16 %v3036_v32, %v3035_v31  ;;  %v315_v31 = vld [vmem:[%s7980_s5] sm:$0xf] }
 0x16a   : > { %v7128_v32 = vsel %vm1445_vm4, %v315_v31, 0 }
 0x16b   : > { %5363 = vmatpush3.bf16.msra.mxu1 %v7128_v32 }
 0x16c   : > { %5980 = vrot.lane.b32.xlu0 %v5954_v39, %s6480_s23  ;;  %5368 = vmatprep.subr.bf16.mxu1 %v6476_v0 }
 0x16d   : > { %5965 = vrot.lane.b32.xlu1 %v5914_v21, %s6479_s20 }
 0x170   : > { %5990 = vrot.lane.b32.xlu0 %v5989_v25, %s6482_s18 }
 0x171   : > { %5975 = vrot.lane.b32.xlu1 %v5949_v27, %s6483_s30 }
 0x174   : > { %6000 = vrot.lane.b32.xlu0 %v5949_v27, %s6478_s19 }
 0x175   : > { %5985 = vrot.lane.b32.xlu1 %v5984_v47, %s6484_s8 }
 0x178   : > { %6010 = vrot.lane.b32.xlu0 %v5984_v47, %s6481_s27  ;;  %v6064_v47 = vpack.i.bf16 %v3034_v46, %v3033_v45  ;;  %v4078_v45 = vld [vmem:[#allocation2 + $0x172] sm:$0xff] }
 0x179   : > { %5995 = vrot.lane.b32.xlu1 %v7034_v49, %s6485_s11 }
 0x17c   : > { %6020 = vrot.lane.b32.xlu0 %v7034_v49, %s6480_s23 }
 0x17d   : > { %6005 = vrot.lane.b32.xlu1 %v5954_v39, %s6479_s20 }
 0x17e   : > { %v5741_v9 = vpop.permute.xlu0 %5740 }
 0x17f   : > { %v5731_v2 = vpop.permute.xlu1 %5730  ;;  %v5743_v21 = vunpack.i.h.bf16 %v5741_v9  ;;  %v5742_v22 = vunpack.i.l.bf16 %v5741_v9  ;;  %v3657_v9 = vld [vmem:[#allocation2 + $0x138] sm:$0xff] }
 0x180   : > { %v5733_v4 = vunpack.i.h.bf16 %v5731_v2  ;;  %v5732_v5 = vunpack.i.l.bf16 %v5731_v2  ;;  %6030 = vrot.lane.b32.xlu0 %v7042_v58, %s6482_s18  ;;  %v3453_v2 = vld [vmem:[#allocation2 + $0x122] sm:$0xff]  ;;  %v6184_v11 = vpack.i.bf16 %v3658_v10, %v3657_v9  ;;  %v4494_v9 = vld [vmem:[#allocation2 + $0x19a] sm:$0xff] }
 0x181   : > { %6015 = vrot.lane.b32.xlu1 %v5989_v25, %s6483_s30  ;;  %v4495_v10 = vld [vmem:[#allocation2 + $0x1a2] sm:$0xff] }
 0x182   : > { %v1392_v16 = vsel %vm1390_vm6, %v1389_v6, %v5733_v4  ;;  %v1391_v17 = vsel %vm1390_vm6, %v1388_v8, %v5732_v5  ;;  %v5751_v24 = vpop.permute.xlu0 %5750  ;;  %v3454_v4 = vld [vmem:[#allocation2 + $0x12a] sm:$0xff]  ;;  %v3660_v8 = vld [vmem:[#allocation2 + $0x141] sm:$0xff] }
 0x183   : > { %v5736_v12 = vpop.permute.xlu1 %5735  ;;  %v5753_v33 = vunpack.i.h.bf16 %v5751_v24  ;;  %v5752_v34 = vunpack.i.l.bf16 %v5751_v24  ;;  %v6154_v5 = vpack.i.bf16 %v3454_v4, %v3453_v2  ;;  %v4492_v2 = vld [vmem:[#allocation2 + $0x199] sm:$0xff]  ;;  %v4493_v4 = vld [vmem:[#allocation2 + $0x1a1] sm:$0xff] }
 0x184   : > { %v5738_v14 = vunpack.i.h.bf16 %v5736_v12  ;;  %v5737_v15 = vunpack.i.l.bf16 %v5736_v12  ;;  %6040 = vrot.lane.b32.xlu0 %v5989_v25, %s6478_s19  ;;  %v3661_v12 = vld [vmem:[#allocation2 + $0x13a] sm:$0xff] }
 0x185   : > { %6025 = vrot.lane.b32.xlu1 %v6024_v7, %s6484_s8 }
 0x186   : > { %v1393_v19 = vsel %vm398_vm2, %v1391_v17, %v5737_v15  ;;  %v1394_v20 = vsel %vm398_vm2, %v1392_v16, %v5738_v14  ;;  %v3662_v14 = vld [vmem:[#allocation2 + $0x142] sm:$0xff]  ;;  %v7101_v15 = vpop.permute.xlu0 %5760  ;;  %v3867_v17 = vld [vmem:[#allocation2 + $0x151] sm:$0xff] }
 0x187   : > { %v5746_v23 = vpop.permute.xlu1 %5745  ;;  %v1396_v28 = vsel %vm1395_vm7, %v1393_v19, %v5742_v22  ;;  %v1397_v29 = vsel %vm1395_vm7, %v1394_v20, %v5743_v21  ;;  %v6194_v16 = vpack.i.bf16 %v3662_v14, %v3661_v12  ;;  %v3865_v22 = vld [vmem:[#allocation2 + $0x150] sm:$0xff]  ;;  %v6354_v12 = vpack.i.bf16 %v4495_v10, %v4494_v9 }
 0x188   : > { %v5748_v26 = vunpack.i.h.bf16 %v5746_v23  ;;  %v5747_v27 = vunpack.i.l.bf16 %v5746_v23  ;;  %6050 = vrot.lane.b32.xlu0 %v6024_v7, %s6481_s27  ;;  %v3659_v7 = vld [vmem:[#allocation2 + $0x139] sm:$0xff]  ;;  %v5762_v31 = vunpack.i.l.bf16 %v7101_v15 }
 0x189   : > { %6035 = vrot.lane.b32.xlu1 %v6034_v18, %s6485_s11  ;;  %v6189_v6 = vpack.i.bf16 %v3660_v8, %v3659_v7  ;;  %v3866_v23 = vld [vmem:[#allocation2 + $0x158] sm:$0xff]  ;;  %v6349_v7 = vpack.i.bf16 %v4493_v4, %v4492_v2 }
 0x18a   : > { %v1399_v13 = vsel %vm1398_vm8, %v1396_v28, %v5747_v27  ;;  %v1400_v30 = vsel %vm1398_vm8, %v1397_v29, %v5748_v26  ;;  %v7107_v19 = vpop.permute.xlu0 %5770  ;;  %v6224_v26 = vpack.i.bf16 %v3866_v23, %v3865_v22  ;;  %v3869_v27 = vld [vmem:[#allocation2 + $0x152] sm:$0xff]  ;;  %v3870_v28 = vld [vmem:[#allocation2 + $0x15a] sm:$0xff] }
 0x18b   : > { %v5756_v35 = vpop.permute.xlu1 %5755  ;;  %v1402_v39 = vsel %vm1401_vm9, %v1399_v13, %v5752_v34  ;;  %v1403_v40 = vsel %vm1401_vm9, %v1400_v30, %v5753_v33  ;;  %v6234_v13 = vpack.i.bf16 %v3870_v28, %v3869_v27  ;;  %v4075_v34 = vld [vmem:[#allocation2 + $0x169] sm:$0xff] }
 0x18c   : > { %v5758_v36 = vunpack.i.h.bf16 %v5756_v35  ;;  %v5757_v38 = vunpack.i.l.bf16 %v5756_v35  ;;  %6060 = vrot.lane.b32.xlu0 %v6034_v18, %s6480_s23  ;;  %v4076_v35 = vld [vmem:[#allocation2 + $0x171] sm:$0xff] }
 0x18d   : > { %6045 = vrot.lane.b32.xlu1 %v7034_v49, %s6479_s20  ;;  %v6074_v49 = vpack.i.bf16 %v3038_v48, %v3037_v44  ;;  %v4283_v48 = vld [vmem:[#allocation2 + $0x181] sm:$0xff] }
 0x18e   : > { %v1405_v42 = vsel %vm1404_vm10, %v1402_v39, %v5757_v38  ;;  %v1406_v43 = vsel %vm1404_vm10, %v1403_v40, %v5758_v36  ;;  %v7113_v24 = vpop.permute.xlu0 %5780  ;;  %v6269_v38 = vpack.i.bf16 %v4076_v35, %v4075_v34  ;;  %v4073_v39 = vld [vmem:[#allocation2 + $0x168] sm:$0xff]  ;;  %v4074_v40 = vld [vmem:[#allocation2 + $0x170] sm:$0xff] }
 0x18f   : > { %v1407_v25 = vpack.c.bf16 %v1406_v43, %v1405_v42  ;;  %v7110_v21 = vpop.permute.xlu1 %5765  ;;  %v6264_v42 = vpack.i.bf16 %v4074_v40, %v4073_v39  ;;  %v6382_v40 = vld [vmem:[#allocation2 + $0x18] sm:$0xff] }
 0x190   : > { %6070 = vrot.lane.b32.xlu0 %v6069_v41, %s6482_s18  ;;  %v5768_v35 = vunpack.i.h.bf16 %v7110_v21 }
 0x191   : > { %5359 = vmatmul.mubr.msk.bf16.vlgmr.msra.gmra.mxu0 %vm1441_vm11, %v1407_v25  ;;  %6055 = vrot.lane.b32.xlu1 %v7042_v58, %s6483_s30  ;;  %v4077_v25 = vld [vmem:[#allocation2 + $0x16a] sm:$0xff] }
 0x192   : > { %5384 = vmatprep.mubr.msk.bf16.mxu0 %vm6477_vm1, %v6476_v0  ;;  %v7121_v30 = vpop.permute.xlu0 %5790  ;;  %5383 = vmatpush3.bf16.msra.mxu0 %v7128_v32 }
 0x193   : > { %v7117_v29 = vpop.permute.xlu1 %5775  ;;  %5388 = vmatprep.subr.bf16.mxu0 %v6476_v0 }
 0x194   : > { %6080 = vrot.lane.b32.xlu0 %v7042_v58, %s6478_s19  ;;  %v6114_v58 = vpack.i.bf16 %v3246_v57, %v3245_v56  ;;  %v6304_v56 = vpack.i.bf16 %v4282_v54, %v4281_v53  ;;  %v4285_v57 = vld [vmem:[#allocation2 + $0x182] sm:$0xff] }
 0x195   : > { %6065 = vrot.lane.b32.xlu1 %v6064_v47, %s6484_s8 }
 0x196   : > { %v7137_v36 = vpop.permute.xlu0 %5800 }
 0x197   : > { %v7130_v33 = vpop.permute.xlu1 %5785 }
 0x198   : > { %6090 = vrot.lane.b32.xlu0 %v6064_v47, %s6481_s27  ;;  %v6274_v47 = vpack.i.bf16 %v4078_v45, %v4077_v25  ;;  %v5777_v45 = vunpack.i.l.bf16 %v7117_v29  ;;  %v5788_v54 = vunpack.i.h.bf16 %v7130_v33 }
 0x199   : > { %6075 = vrot.lane.b32.xlu1 %v6074_v49, %s6485_s11 }
 0x19a   : > { %v7145_v43 = vpop.permute.xlu0 %5810 }
 0x19c   : > { %6100 = vrot.lane.b32.xlu0 %v6074_v49, %s6480_s23 }
 0x19d   : > { %6085 = vrot.lane.b32.xlu1 %v6034_v18, %s6479_s20  ;;  %v3868_v18 = vld [vmem:[#allocation2 + $0x159] sm:$0xff] }
 0x19e   : > { %v6229_v20 = vpack.i.bf16 %v3868_v18, %v3867_v17  ;;  %v7151_v44 = vpop.permute.xlu0 %5820 }
 0x1a0   : > { %6110 = vrot.lane.b32.xlu0 %v6109_v52, %s6482_s18 }
 0x1a1   : > { %6095 = vrot.lane.b32.xlu1 %v6069_v41, %s6483_s30 }
 0x1a4   : > { %6120 = vrot.lane.b32.xlu0 %v6069_v41, %s6478_s19  ;;  %v7141_v41 = vpop.permute.xlu1 %5795 }
 0x1a5   : > { %6105 = vrot.lane.b32.xlu1 %v6104_v55, %s6484_s8  ;;  %v5798_v2 = vunpack.i.h.bf16 %v7141_v41  ;;  %v5797_v4 = vunpack.i.l.bf16 %v7141_v41 }
 0x1a8   : > { %6130 = vrot.lane.b32.xlu0 %v6104_v55, %s6481_s27  ;;  %v7148_v46 = vpop.permute.xlu1 %5805 }
 0x1a9   : > { %6115 = vrot.lane.b32.xlu1 %v6114_v58, %s6485_s11 }
 0x1ac   : > { %6140 = vrot.lane.b32.xlu0 %v6114_v58, %s6480_s23  ;;  %v7155_v50 = vpop.permute.xlu1 %5815 }
 0x1ad   : > { %6125 = vrot.lane.b32.xlu1 %v6074_v49, %s6479_s20  ;;  %v4284_v49 = vld [vmem:[#allocation2 + $0x189] sm:$0xff] }
 0x1ae   : > { %v6309_v51 = vpack.i.bf16 %v4284_v49, %v4283_v48  ;;  %v5772_v48 = vunpack.i.l.bf16 %v7107_v19 }
 0x1b0   : > { %6150 = vrot.lane.b32.xlu0 %v6149_v61, %s6482_s18  ;;  %v7162_v55 = vpop.permute.xlu1 %5825 }
 0x1b1   : > { %6135 = vrot.lane.b32.xlu1 %v6109_v52, %s6483_s30 }
 0x1b4   : > { %6160 = vrot.lane.b32.xlu0 %v6109_v52, %s6478_s19  ;;  %v7159_v52 = vpop.permute.xlu0 %5830  ;;  %v7169_v63 = vpop.permute.xlu1 %5835 }
 0x1b5   : > { %6145 = vrot.lane.b32.xlu1 %v6144_v1, %s6484_s8 }
 0x1b8   : > { %6170 = vrot.lane.b32.xlu0 %v6144_v1, %s6481_s27  ;;  %v7165_v59 = vpop.permute.xlu0 %5840  ;;  %v7176_v8 = vpop.permute.xlu1 %5845 }
 0x1b9   : > { %6155 = vrot.lane.b32.xlu1 %v6154_v5, %s6485_s11 }
 0x1bc   : > { %6180 = vrot.lane.b32.xlu0 %v6154_v5, %s6480_s23 }
 0x1bd   : > { %6165 = vrot.lane.b32.xlu1 %v6114_v58, %s6479_s20  ;;  %v4286_v58 = vld [vmem:[#allocation2 + $0x18a] sm:$0xff] }
 0x1be   : > { %v6314_v60 = vpack.i.bf16 %v4286_v58, %v4285_v57  ;;  %v5782_v57 = vunpack.i.l.bf16 %v7113_v24  ;;  %v7232_v58 = vld [vmem:[%s7978_s3 + $0x10] sm:$0xff]  }
 0x1c0   : > { %6190 = vrot.lane.b32.xlu0 %v6189_v6, %s6482_s18 }
 0x1c1   : > { %6175 = vrot.lane.b32.xlu1 %v6149_v61, %s6483_s30 }
 0x1c4   : > { %6200 = vrot.lane.b32.xlu0 %v6149_v61, %s6478_s19  ;;  %v4490_v61 = vld [vmem:[#allocation2 + $0x198] sm:$0xff] }
 0x1c5   : > { %6185 = vrot.lane.b32.xlu1 %v6184_v11, %s6484_s8  ;;  %v6319_v1 = vpack.i.bf16 %v4491_v62, %v4490_v61  ;;  %v5792_v61 = vunpack.i.l.bf16 %v7121_v30 }
 0x1c8   : > { %6210 = vrot.lane.b32.xlu0 %v6184_v11, %s6481_s27  ;;  %v7183_v11 = vpop.permute.xlu1 %5855 }
 0x1c9   : > { %6195 = vrot.lane.b32.xlu1 %v6194_v16, %s6485_s11 }
 0x1cc   : > { %6220 = vrot.lane.b32.xlu0 %v6194_v16, %s6480_s23  ;;  %v7186_v14 = vpop.permute.xlu1 %5865 }
 0x1cd   : > { %6205 = vrot.lane.b32.xlu1 %v6154_v5, %s6479_s20  ;;  %v7173_v5 = vpop.permute.xlu0 %5850 }
 0x1d0   : > { %6230 = vrot.lane.b32.xlu0 %v6229_v20, %s6482_s18 }
 0x1d1   : > { %6215 = vrot.lane.b32.xlu1 %v6189_v6, %s6483_s30 }
 0x1d4   : > { %6240 = vrot.lane.b32.xlu0 %v6189_v6, %s6478_s19  ;;  %v7179_v6 = vpop.permute.xlu0 %5860 }
 0x1d5   : > { %6225 = vrot.lane.b32.xlu1 %v6224_v26, %s6484_s8 }
 0x1d8   : > { %6250 = vrot.lane.b32.xlu0 %v6224_v26, %s6481_s27 }
 0x1d9   : > { %6235 = vrot.lane.b32.xlu1 %v6234_v13, %s6485_s11 }
 0x1dc   : > { %6260 = vrot.lane.b32.xlu0 %v6234_v13, %s6480_s23 }
 0x1dd   : > { %6245 = vrot.lane.b32.xlu1 %v6194_v16, %s6479_s20  ;;  %v7192_v16 = vld [vmem:[%s7979_s4] ss:$0 sm:$0xff] }
 0x1e0   : > { %6270 = vrot.lane.b32.xlu0 %v6269_v38, %s6482_s18 }
 0x1e1   : > { %6255 = vrot.lane.b32.xlu1 %v6229_v20, %s6483_s30 }
 0x1e4   : > { %6280 = vrot.lane.b32.xlu0 %v6229_v20, %s6478_s19 }
 0x1e5   : > { %6265 = vrot.lane.b32.xlu1 %v6264_v42, %s6484_s8 }
 0x1e8   : > { %6290 = vrot.lane.b32.xlu0 %v6264_v42, %s6481_s27  ;;  %v1647_v42 = vsel %vm317_vm0, %v6382_v40, %v5762_v31 }
 0x1e9   : > { %6275 = vrot.lane.b32.xlu1 %v6274_v47, %s6485_s11 }
 0x1ec   : > { %6300 = vrot.lane.b32.xlu0 %v6274_v47, %s6480_s23 }
 0x1ed   : > { %6285 = vrot.lane.b32.xlu1 %v6234_v13, %s6479_s20  ;;  %v5763_v13 = vunpack.i.h.bf16 %v7101_v15 }
 0x1ef   : > { %v1648_v39 = vsel %vm317_vm0, %v6903_v3, %v5763_v13  ;;  %v7217_v3 = vld [vmem:[%s7978_s3 + $0x18] sm:$0xff]  }
 0x1f0   : > { %6310 = vrot.lane.b32.xlu0 %v6309_v51, %s6482_s18  ;;  %v1650_v15 = vsel %vm1387_vm5, %v1648_v39, %v5768_v35 }
 0x1f1   : > { %6295 = vrot.lane.b32.xlu1 %v6269_v38, %s6483_s30 }
 0x1f4   : > { %6325 = vrot.lane.b32.xlu0 %v6269_v38, %s6478_s19  ;;  %v5767_v38 = vunpack.i.l.bf16 %v7110_v21  ;;  %v5778_v21 = vunpack.i.h.bf16 %v7117_v29 }
 0x1f5   : > { %6305 = vrot.lane.b32.xlu1 %v6304_v56, %s6484_s8 }
 0x1f6   : > { %v1649_v25 = vsel %vm1387_vm5, %v1647_v42, %v5767_v38 }
 0x1f7   : > { %v1651_v49 = vsel %vm1390_vm6, %v1649_v25, %v5772_v48 }
 0x1f8   : > { %6335 = vrot.lane.b32.xlu0 %v6304_v56, %s6481_s27  ;;  %v1653_v53 = vsel %vm398_vm2, %v1651_v49, %v5777_v45  ;;  %v5783_v56 = vunpack.i.h.bf16 %v7113_v24 }
 0x1f9   : > { %6315 = vrot.lane.b32.xlu1 %v6314_v60, %s6485_s11  ;;  %v1655_v62 = vsel %vm1395_vm7, %v1653_v53, %v5782_v57  ;;  %v5807_v57 = vunpack.i.l.bf16 %v7148_v46 }
 0x1fc   : > { %6345 = vrot.lane.b32.xlu0 %v6314_v60, %s6480_s23  ;;  %v5793_v60 = vunpack.i.h.bf16 %v7121_v30 }
 0x1fd   : > { %6320 = vrot.lane.b32.xlu1 %v6319_v1, %s6484_s8 }
 0x200   : > { %6350 = vrot.lane.b32.xlu0 %v6349_v7, %s6482_s18  ;;  %v7247_v7 = vld [vmem:[%s7978_s3 + $0x8] sm:$0xff]  }
 0x201   : > { %6330 = vrot.lane.b32.xlu1 %v6274_v47, %s6479_s20  ;;  %v5773_v47 = vunpack.i.h.bf16 %v7107_v19  ;;  %v5787_v19 = vunpack.i.l.bf16 %v7130_v33 }
 0x203   : > { %v1657_v24 = vsel %vm1398_vm8, %v1655_v62, %v5787_v19  ;;  %v6388_v62 = vld [vmem:[#allocation2 + $0x30] sm:$0xff] }
 0x204   : > { %v1659_v30 = vsel %vm1401_vm9, %v1657_v24, %v5792_v61 }
 0x205   : > { %6340 = vrot.lane.b32.xlu1 %v6309_v51, %s6483_s30  ;;  %v1652_v51 = vsel %vm1390_vm6, %v1650_v15, %v5773_v47  ;;  %v1661_v10 = vsel %vm1404_vm10, %v1659_v30, %v5797_v4  ;;  %s4932_s30 = sshll.u32 %s7993_s28, 7  ;;  %v5817_v4 = vunpack.i.l.bf16 %v7155_v50  ;;  %v5823_v30 = vunpack.i.h.bf16 %v7151_v44 }
 0x206   : > { %v1654_v29 = vsel %vm398_vm2, %v1652_v51, %v5778_v21  ;;  %s7280_s12 = scalar_lea.vmem %s7982_s7, %s4932_s30 }
 0x207   : > { %v1656_v1 = vsel %vm1395_vm7, %v1654_v29, %v5783_v56  ;;  %v5803_v29 = vunpack.i.h.bf16 %v7137_v36  ;;  %v5808_v56 = vunpack.i.h.bf16 %v7148_v46 }
 0x208   : > { %v1658_v33 = vsel %vm1398_vm8, %v1656_v1, %v5788_v54  ;;  %v5802_v54 = vunpack.i.l.bf16 %v7137_v36  ;;  %v5813_v36 = vunpack.i.h.bf16 %v7145_v43 }
 0x209   : > { %6355 = vrot.lane.b32.xlu1 %v6354_v12, %s6485_s11  ;;  %v1660_v9 = vsel %vm1401_vm9, %v1658_v33, %v5793_v60  ;;  %v7258_v12 = vld [vmem:[%s7978_s3] sm:$0xff]   ;;  %v6387_v60 = vld [vmem:[#allocation2 + $0x38] sm:$0xff]  ;;  %v5812_v33 = vunpack.i.l.bf16 %v7145_v43 }
 0x20a   : > { %v1662_v41 = vsel %vm1404_vm10, %v1660_v9, %v5798_v2  ;;  %v1856_v61 = vsel %vm317_vm0, %v6387_v60, %v5803_v29  ;;  %v1855_v1 = vsel %vm317_vm0, %v6388_v62, %v5802_v54  ;;  %v5818_v2 = vunpack.i.h.bf16 %v7155_v50 }
 0x20b   : > { %v1858_v46 = vsel %vm1387_vm5, %v1856_v61, %v5808_v56  ;;  %v1857_v24 = vsel %vm1387_vm5, %v1855_v1, %v5807_v57  ;;  %v5822_v9 = vunpack.i.l.bf16 %v7151_v44  ;;  %v5827_v50 = vunpack.i.l.bf16 %v7162_v55 }
 0x20c   : > { %v1860_v43 = vsel %vm1390_vm6, %v1858_v46, %v5813_v36  ;;  %v5832_v44 = vunpack.i.l.bf16 %v7159_v52  ;;  %v5843_v56 = vunpack.i.h.bf16 %v7165_v59  ;;  %v5842_v57 = vunpack.i.l.bf16 %v7165_v59 }
 0x20d   : > { %v5848_v62 = vunpack.i.h.bf16 %v7176_v8  ;;  %v5847_v1 = vunpack.i.l.bf16 %v7176_v8  ;;  %v5852_v59 = vunpack.i.l.bf16 %v7173_v5 }
 0x251   : > { %v1483_v17 = vpop.f32.mrf.mxu0 }
 0x252   : > { %v1484_v20 = vadd.f32 %v7192_v16, %v1483_v17  ;;  %v1663_v17 = vpack.c.bf16 %v1662_v41, %v1661_v10  ;;  %v1859_v10 = vsel %vm1390_vm6, %v1857_v24, %v5812_v33  ;;  %v6389_v33 = vld [vmem:[#allocation2 + $0x50] sm:$0xff]  ;;  %v6390_v24 = vld [vmem:[#allocation2 + $0x48] sm:$0xff] }
 0x253   : > { %v5360_v18 = vpop.f32.mrf.mxu0  ;;  %v1861_v41 = vsel %vm398_vm2, %v1859_v10, %v5817_v4  ;;  %v2064_v46 = vsel %vm317_vm0, %v6389_v33, %v5843_v56 }
 0x254   : > { %v1490_v27 = vmax.f32 %v1484_v20, 0.0  ;;  %v4966_v18 = vld [vmem:[%s6605_s24] sm:$0xff]   ;;  %v7272_v20 = vld [vmem:[%s7981_s6] ss:$0 sm:$0xff] }
 0x255   : > { %v1486_v22 = vpop.f32.mrf.mxu0  ;;  %v4968_v13 = vunpack.c.h.bf16 %v4966_v18 }
 0x256   : > { %v1487_v23 = vadd.f32 %v7192_v16, %v1486_v22  ;;  %v4967_v22 = vunpack.c.l.bf16 %v4966_v18  ;;  %v5828_v18 = vunpack.i.h.bf16 %v7162_v55  ;;  %v5837_v55 = vunpack.i.l.bf16 %v7169_v63 }
 0x257   : > { %v5361_v26 = vpop.f32.mrf.mxu0 }
 0x258   : > { %v1491_v28 = vmax.f32 %v1487_v23, 0.0 }
 0x25a   : > { %v1492_v34 = vpack.c.bf16 %v1491_v28, %v1490_v27 }
 0x25c   : > { %5365 = vmatmul.mubr.msk.bf16.vlgmr.msra.gmra.mxu1 %vm317_vm0, %v1492_v34 }
 0x25d   : > { %5369 = vmatpush3.bf16.msra.mxu1 %v6876_v37  ;;  %5378 = vmatprep.mubr.msk.bf16.mxu1 %vm6477_vm1, %v6476_v0 }
 0x25e   : > { %5370 = vmatprep.subr.bf16.mxu1 %v6476_v0 }
 0x261   : > { %5371 = vmatpush3.bf16.msra.mxu1 %v7217_v3 }
 0x262   : > { %5372 = vmatprep.subr.bf16.mxu1 %v6476_v0 }
 0x265   : > { %5373 = vmatpush3.bf16.msra.mxu1 %v7232_v58 }
 0x266   : > { %5374 = vmatprep.subr.bf16.mxu1 %v6476_v0 }
 0x269   : > { %5375 = vmatpush3.bf16.msra.mxu1 %v7247_v7 }
 0x26a   : > { %5376 = vmatprep.subr.bf16.mxu1 %v6476_v0 }
 0x26d   : > { %5377 = vmatpush3.bf16.msra.mxu1 %v7258_v12 }
 0x26e   : > { %5402 = vmatprep.subr.bf16.mxu1 %v6476_v0 }
 0x270   : > { %5379 = vmatmul.mubr.msk.bf16.vlgmr.msra.gmra.mxu1 %vm1441_vm11, %v1663_v17  ;;  %v1862_v17 = vsel %vm398_vm2, %v1860_v43, %v5818_v2  ;;  %v2063_v2 = vsel %vm317_vm0, %v6390_v24, %v5842_v57  ;;  %v2189_v24 = vld [vmem:[#allocation2 + $0x60] sm:$0xff] }
 0x271   : > { %5403 = vmatpush3.bf16.msra.mxu1 %v7128_v32  ;;  %5404 = vmatprep.mubr.msk.bf16.mxu1 %vm6477_vm1, %v6476_v0  ;;  %v2065_v8 = vsel %vm1387_vm5, %v2063_v2, %v5847_v1  ;;  %v2190_v2 = vld [vmem:[#allocation2 + $0x68] sm:$0xff] }
 0x272   : > { %5408 = vmatprep.subr.bf16.mxu1 %v6476_v0 }
 0x31c   : > { %v1539_v23 = vpop.f32.mrf.mxu1 }
 0x31d   : > { %v1540_v26 = vadd.f32 %v7272_v20, %v1539_v23  ;;  %v1863_v23 = vsel %vm1395_vm7, %v1861_v41, %v5822_v9  ;;  %v5853_v9 = vunpack.i.h.bf16 %v7173_v5  ;;  %v2066_v41 = vsel %vm1387_vm5, %v2064_v46, %v5848_v62 }
 0x31e   : > { %v5366_v27 = vpop.f32.mrf.mxu1  ;;  %v5863_v5 = vunpack.i.h.bf16 %v7179_v6 }
 0x31f   : > { %v1550_v28 = vadd.f32 %v4967_v22, %v1540_v26  ;;  %v5833_v22 = vunpack.i.h.bf16 %v7159_v52  ;;  %v1864_v26 = vsel %vm1395_vm7, %v1862_v17, %v5823_v30  ;;  %v1865_v27 = vsel %vm1398_vm8, %v1863_v23, %v5827_v50 }
 0x320   : > { %v1542_v31 = vpop.f32.mrf.mxu1  ;;  %v5857_v50 = vunpack.i.l.bf16 %v7183_v11  ;;  %v5862_v23 = vunpack.i.l.bf16 %v7179_v6 }
 0x321   : > { %v1552_v34 = vmax.f32 %v1550_v28, 0.0  ;;  %v1543_v35 = vadd.f32 %v7272_v20, %v1542_v31  ;;  %v1866_v28 = vsel %vm1398_vm8, %v1864_v26, %v5828_v18  ;;  %v1867_v31 = vsel %vm1401_vm9, %v1865_v27, %v5832_v44 }
 0x322   : > { %v5367_v38 = vpop.f32.mrf.mxu1  ;;  %v1868_v52 = vsel %vm1401_vm9, %v1866_v28, %v5833_v22  ;;  %v5858_v18 = vunpack.i.h.bf16 %v7183_v11  ;;  %v2067_v22 = vsel %vm1390_vm6, %v2065_v8, %v5852_v59  ;;  %v2068_v44 = vsel %vm1390_vm6, %v2066_v41, %v5853_v9 }
 0x323   : > { %v4933_v39 = vpack.c.bf16 %v1552_v34, %v1552_v34  ;;  %v1551_v40 = vadd.f32 %v4968_v13, %v1543_v35  ;;  %v5838_v13 = vunpack.i.h.bf16 %v7169_v63  ;;  %v1869_v34 = vsel %vm1404_vm10, %v1867_v31, %v5837_v55  ;;  %v5029_v63 = vld [vmem:[%s6605_s24 + $0x8] sm:$0xff]   ;;  %v5871_v31 = vpop.permute.xlu0 %5870 }
 0x324   : > { %v2069_v26 = vsel %vm398_vm2, %v2067_v22, %v5857_v50  ;;  %v2070_v11 = vsel %vm398_vm2, %v2068_v44, %v5858_v18  ;;  %v5868_v27 = vunpack.i.h.bf16 %v7186_v14  ;;  %v5867_v28 = vunpack.i.l.bf16 %v7186_v14 }
 0x325   : > { %1563 = vst.msk [vmem:[%s7280_s12] sm:$0xf] %vm1562_vm12, %v4933_v39  ;;  %v1553_v42 = vmax.f32 %v1551_v40, 0.0  ;;  %v1870_v35 = vsel %vm1404_vm10, %v1868_v52, %v5838_v13  ;;  %v4971_v39 = vunpack.c.l.bf16 %v5029_v63  ;;  %v2071_v13 = vsel %vm1395_vm7, %v2069_v26, %v5862_v23 }
 0x326   : > { %v1871_v38 = vpack.c.bf16 %v1870_v35, %v1869_v34  ;;  %v2072_v55 = vsel %vm1395_vm7, %v2070_v11, %v5863_v5  ;;  %v5873_v6 = vunpack.i.h.bf16 %v5871_v31  ;;  %v5872_v52 = vunpack.i.l.bf16 %v5871_v31 }
 0x327   : > { %v4934_v15 = vpack.c.bf16 %v1553_v42, %v1553_v42  ;;  %v2074_v34 = vsel %vm1398_vm8, %v2072_v55, %v5868_v27  ;;  %v2073_v35 = vsel %vm1398_vm8, %v2071_v13, %v5867_v28  ;;  %v5881_v1 = vpop.permute.xlu0 %5880 }
 0x328   : > { %v5883_v33 = vunpack.i.h.bf16 %v5881_v1  ;;  %v5882_v46 = vunpack.i.l.bf16 %v5881_v1 }
 0x329   : > { %1564 = vst.msk [vmem:[%s7280_s12 + $0x4] sm:$0xf] %vm1562_vm12, %v4934_v15 }
 0x32a   : > { %v2272_v41 = vsel %vm317_vm0, %v2190_v2, %v5883_v33  ;;  %v2271_v8 = vsel %vm317_vm0, %v2189_v24, %v5882_v46 }
 0x32b   : > { %v5891_v18 = vpop.permute.xlu0 %5890 }
 0x32c   : > { %v5893_v22 = vunpack.i.h.bf16 %v5891_v18  ;;  %v5892_v44 = vunpack.i.l.bf16 %v5891_v18 }
 0x330   : > { %v1701_v25 = vpop.f32.mrf.mxu1 }
 0x331   : > { %v1702_v45 = vadd.f32 %v7192_v16, %v1701_v25 }
 0x332   : > { %v5380_v21 = vpop.f32.mrf.mxu1 }
 0x333   : > { %v1708_v51 = vmax.f32 %v1702_v45, 0.0  ;;  %v4972_v21 = vunpack.c.h.bf16 %v5029_v63 }
 0x334   : > { %v1704_v47 = vpop.f32.mrf.mxu1 }
 0x335   : > { %v1705_v48 = vadd.f32 %v7192_v16, %v1704_v47 }
 0x336   : > { %v5381_v49 = vpop.f32.mrf.mxu1 }
 0x337   : > { %v1709_v53 = vmax.f32 %v1705_v48, 0.0 }
 0x339   : > { %v1710_v19 = vpack.c.bf16 %v1709_v53, %v1708_v51 }
 0x33b   : > { %5385 = vmatmul.mubr.msk.bf16.vlgmr.msra.gmra.mxu0 %vm317_vm0, %v1710_v19 }
 0x33c   : > { %5389 = vmatpush3.bf16.msra.mxu0 %v6876_v37  ;;  %5398 = vmatprep.mubr.msk.bf16.mxu0 %vm6477_vm1, %v6476_v0 }
 0x33d   : > { %5390 = vmatprep.subr.bf16.mxu0 %v6476_v0 }
 0x340   : > { %5391 = vmatpush3.bf16.msra.mxu0 %v7217_v3 }
 0x341   : > { %5392 = vmatprep.subr.bf16.mxu0 %v6476_v0 }
 0x344   : > { %5393 = vmatpush3.bf16.msra.mxu0 %v7232_v58 }
 0x345   : > { %5394 = vmatprep.subr.bf16.mxu0 %v6476_v0 }
 0x348   : > { %5395 = vmatpush3.bf16.msra.mxu0 %v7247_v7 }
 0x349   : > { %5396 = vmatprep.subr.bf16.mxu0 %v6476_v0 }
 0x34c   : > { %5397 = vmatpush3.bf16.msra.mxu0 %v7258_v12 }
 0x34d   : > { %5422 = vmatprep.subr.bf16.mxu0 %v6476_v0 }
 0x34f   : > { %5399 = vmatmul.mubr.msk.bf16.vlgmr.msra.gmra.mxu0 %vm1441_vm11, %v1871_v38  ;;  %v5876_v38 = vpop.permute.xlu1 %5875 }
 0x350   : > { %5423 = vmatpush3.bf16.msra.mxu0 %v7128_v32  ;;  %5424 = vmatprep.mubr.msk.bf16.mxu0 %vm6477_vm1, %v6476_v0  ;;  %v5878_v14 = vunpack.i.h.bf16 %v5876_v38  ;;  %v5877_v63 = vunpack.i.l.bf16 %v5876_v38 }
 0x351   : > { %5428 = vmatprep.subr.bf16.mxu0 %v6476_v0 }
 0x3fb   : > { %v1748_v40 = vpop.f32.mrf.mxu0 }
 0x3fc   : > { %v1749_v42 = vadd.f32 %v7272_v20, %v1748_v40  ;;  %v2076_v40 = vsel %vm1401_vm9, %v2074_v34, %v5873_v6 }
 0x3fd   : > { %v5386_v15 = vpop.f32.mrf.mxu0 }
 0x3fe   : > { %v1759_v25 = vadd.f32 %v4971_v39, %v1749_v42  ;;  %v2075_v39 = vsel %vm1401_vm9, %v2073_v35, %v5872_v52  ;;  %v2078_v15 = vsel %vm1404_vm10, %v2076_v40, %v5878_v14  ;;  %v5901_v52 = vpop.permute.xlu0 %5900 }
 0x3ff   : > { %v1751_v45 = vpop.f32.mrf.mxu0  ;;  %v2077_v42 = vsel %vm1404_vm10, %v2075_v39, %v5877_v63  ;;  %v5903_v34 = vunpack.i.h.bf16 %v5901_v52  ;;  %v5902_v35 = vunpack.i.l.bf16 %v5901_v52 }
 0x400   : > { %v1761_v47 = vmax.f32 %v1759_v25, 0.0  ;;  %v1752_v48 = vadd.f32 %v7272_v20, %v1751_v45  ;;  %v2079_v25 = vpack.c.bf16 %v2078_v15, %v2077_v42 }
 0x401   : > { %v5387_v49 = vpop.f32.mrf.mxu0 }
 0x402   : > { %v4935_v51 = vpack.c.bf16 %v1761_v47, %v1761_v47  ;;  %v1760_v53 = vadd.f32 %v4972_v21, %v1752_v48  ;;  %v5030_v21 = vld [vmem:[%s6605_s24 + $0x10] sm:$0xff]  }
 0x403   : > { %v4975_v45 = vunpack.c.l.bf16 %v5030_v21 }
 0x404   : > { %1771 = vst.msk [vmem:[%s7280_s12 + $0x8] sm:$0xf] %vm1562_vm12, %v4935_v51  ;;  %v1762_v29 = vmax.f32 %v1760_v53, 0.0  ;;  %v4976_v53 = vunpack.c.h.bf16 %v5030_v21 }
 0x406   : > { %v4936_v54 = vpack.c.bf16 %v1762_v29, %v1762_v29 }
 0x408   : > { %1772 = vst.msk [vmem:[%s7280_s12 + $0xc] sm:$0xf] %vm1562_vm12, %v4936_v54 }
 0x40f   : > { %v1909_v19 = vpop.f32.mrf.mxu0 }
 0x410   : > { %v1910_v61 = vadd.f32 %v7192_v16, %v1909_v19 }
 0x411   : > { %v5400_v60 = vpop.f32.mrf.mxu0 }
 0x412   : > { %v1916_v10 = vmax.f32 %v1910_v61, 0.0 }
 0x413   : > { %v1912_v36 = vpop.f32.mrf.mxu0 }
 0x414   : > { %v1913_v4 = vadd.f32 %v7192_v16, %v1912_v36 }
 0x415   : > { %v5401_v30 = vpop.f32.mrf.mxu0 }
 0x416   : > { %v1917_v43 = vmax.f32 %v1913_v4, 0.0  ;;  %v5886_v30 = vpop.permute.xlu1 %5885 }
 0x417   : > { %v5888_v59 = vunpack.i.h.bf16 %v5886_v30 }
 0x418   : > { %v1918_v17 = vpack.c.bf16 %v1917_v43, %v1916_v10  ;;  %v5887_v10 = vunpack.i.l.bf16 %v5886_v30 }
 0x419   : > { %v2274_v26 = vsel %vm1387_vm5, %v2272_v41, %v5888_v59 }
 0x41a   : > { %5405 = vmatmul.mubr.msk.bf16.vlgmr.msra.gmra.mxu1 %vm317_vm0, %v1918_v17  ;;  %v2273_v11 = vsel %vm1387_vm5, %v2271_v8, %v5887_v10  ;;  %v5896_v27 = vpop.permute.xlu1 %5895  ;;  %v2276_v6 = vsel %vm1390_vm6, %v2274_v26, %v5893_v22  ;;  %v2398_v22 = vld [vmem:[#allocation2 + $0x80] sm:$0xff] }
 0x41b   : > { %5409 = vmatpush3.bf16.msra.mxu1 %v6876_v37  ;;  %5418 = vmatprep.mubr.msk.bf16.mxu1 %vm6477_vm1, %v6476_v0  ;;  %v5898_v13 = vunpack.i.h.bf16 %v5896_v27  ;;  %v5897_v55 = vunpack.i.l.bf16 %v5896_v27  ;;  %v2275_v31 = vsel %vm1390_vm6, %v2273_v11, %v5892_v44 }
 0x41c   : > { %5410 = vmatprep.subr.bf16.mxu1 %v6476_v0 }
 0x41d   : > { %v2277_v38 = vsel %vm398_vm2, %v2275_v31, %v5897_v55  ;;  %v2278_v14 = vsel %vm398_vm2, %v2276_v6, %v5898_v13 }
 0x41e   : > { %v5906_v63 = vpop.permute.xlu1 %5905  ;;  %v2279_v42 = vsel %vm1395_vm7, %v2277_v38, %v5902_v35  ;;  %v2280_v15 = vsel %vm1395_vm7, %v2278_v14, %v5903_v34 }
 0x41f   : > { %5411 = vmatpush3.bf16.msra.mxu1 %v7217_v3  ;;  %v5908_v39 = vunpack.i.h.bf16 %v5906_v63  ;;  %v5907_v40 = vunpack.i.l.bf16 %v5906_v63 }
 0x420   : > { %5412 = vmatprep.subr.bf16.mxu1 %v6476_v0 }
 0x423   : > { %5413 = vmatpush3.bf16.msra.mxu1 %v7232_v58 }
 0x424   : > { %5414 = vmatprep.subr.bf16.mxu1 %v6476_v0 }
 0x427   : > { %5415 = vmatpush3.bf16.msra.mxu1 %v7247_v7 }
 0x428   : > { %5416 = vmatprep.subr.bf16.mxu1 %v6476_v0 }
 0x42b   : > { %5417 = vmatpush3.bf16.msra.mxu1 %v7258_v12 }
 0x42c   : > { %5442 = vmatprep.subr.bf16.mxu1 %v6476_v0 }
 0x42e   : > { %5419 = vmatmul.mubr.msk.bf16.vlgmr.msra.gmra.mxu1 %vm1441_vm11, %v2079_v25  ;;  %v5911_v25 = vpop.permute.xlu0 %5910 }
 0x42f   : > { %5443 = vmatpush3.bf16.msra.mxu1 %v7128_v32  ;;  %5444 = vmatprep.mubr.msk.bf16.mxu1 %vm6477_vm1, %v6476_v0  ;;  %v5913_v21 = vunpack.i.h.bf16 %v5911_v25 }
 0x430   : > { %5448 = vmatprep.subr.bf16.mxu1 %v6476_v0 }
 0x432   : > { %v5921_v41 = vpop.permute.xlu0 %5920 }
 0x433   : > { %v5922_v18 = vunpack.i.l.bf16 %v5921_v41 }
 0x436   : > { %v5931_v31 = vpop.permute.xlu0 %5930 }
 0x437   : > { %v5933_v52 = vunpack.i.h.bf16 %v5931_v31  ;;  %v5932_v34 = vunpack.i.l.bf16 %v5931_v31 }
 0x4da   : > { %v1956_v47 = vpop.f32.mrf.mxu1 }
 0x4db   : > { %v1957_v48 = vadd.f32 %v7272_v20, %v1956_v47  ;;  %v2281_v47 = vsel %vm1398_vm8, %v2279_v42, %v5907_v40 }
 0x4dc   : > { %v5406_v49 = vpop.f32.mrf.mxu1 }
 0x4dd   : > { %v1967_v51 = vadd.f32 %v4975_v45, %v1957_v48  ;;  %v5912_v45 = vunpack.i.l.bf16 %v5911_v25  ;;  %v2282_v48 = vsel %vm1398_vm8, %v2280_v15, %v5908_v39  ;;  %v5916_v49 = vpop.permute.xlu1 %5915 }
 0x4de   : > { %v1959_v29 = vpop.f32.mrf.mxu1 }
 0x4df   : > { %v1969_v54 = vmax.f32 %v1967_v51, 0.0  ;;  %v1960_v19 = vadd.f32 %v7272_v20, %v1959_v29  ;;  %v5918_v51 = vunpack.i.h.bf16 %v5916_v49  ;;  %v2283_v29 = vsel %vm1401_vm9, %v2281_v47, %v5912_v45  ;;  %v5941_v45 = vpop.permute.xlu0 %5940 }
 0x4e0   : > { %v5407_v56 = vpop.f32.mrf.mxu1  ;;  %v5943_v47 = vunpack.i.h.bf16 %v5941_v45 }
 0x4e1   : > { %v4937_v57 = vpack.c.bf16 %v1969_v54, %v1969_v54  ;;  %v1968_v60 = vadd.f32 %v4976_v53, %v1960_v19  ;;  %v5917_v53 = vunpack.i.l.bf16 %v5916_v49  ;;  %v2284_v54 = vsel %vm1401_vm9, %v2282_v48, %v5913_v21 }
 0x4e2   : > { %v2286_v56 = vsel %vm1404_vm10, %v2284_v54, %v5918_v51  ;;  %v5942_v48 = vunpack.i.l.bf16 %v5941_v45 }
 0x4e3   : > { %1979 = vst.msk [vmem:[%s7280_s12 + $0x10] sm:$0xf] %vm1562_vm12, %v4937_v57  ;;  %v1970_v61 = vmax.f32 %v1968_v60, 0.0  ;;  %v2285_v19 = vsel %vm1404_vm10, %v2283_v29, %v5917_v53  ;;  %v5031_v60 = vld [vmem:[%s6605_s24 + $0x18] sm:$0xff]  }
 0x4e4   : > { %v2287_v57 = vpack.c.bf16 %v2286_v56, %v2285_v19  ;;  %v4980_v46 = vunpack.c.h.bf16 %v5031_v60 }
 0x4e5   : > { %v4938_v62 = vpack.c.bf16 %v1970_v61, %v1970_v61  ;;  %v4979_v61 = vunpack.c.l.bf16 %v5031_v60 }
 0x4e7   : > { %1980 = vst.msk [vmem:[%s7280_s12 + $0x14] sm:$0xf] %vm1562_vm12, %v4938_v62 }
 0x4ee   : > { %v2117_v36 = vpop.f32.mrf.mxu1 }
 0x4ef   : > { %v2118_v9 = vadd.f32 %v7192_v16, %v2117_v36 }
 0x4f0   : > { %v5420_v4 = vpop.f32.mrf.mxu1 }
 0x4f1   : > { %v2124_v5 = vmax.f32 %v2118_v9, 0.0 }
 0x4f2   : > { %v2120_v43 = vpop.f32.mrf.mxu1 }
 0x4f3   : > { %v2121_v17 = vadd.f32 %v7192_v16, %v2120_v43 }
 0x4f4   : > { %v5421_v50 = vpop.f32.mrf.mxu1 }
 0x4f5   : > { %v2125_v23 = vmax.f32 %v2121_v17, 0.0  ;;  %v5923_v17 = vunpack.i.h.bf16 %v5921_v41  ;;  %v2397_v50 = vld [vmem:[#allocation2 + $0x78] sm:$0xff] }
 0x4f6   : > { %v2479_v13 = vsel %vm317_vm0, %v2397_v50, %v5922_v18 }
 0x4f7   : > { %v2126_v28 = vpack.c.bf16 %v2125_v23, %v2124_v5  ;;  %v5926_v5 = vpop.permute.xlu1 %5925 }
 0x4f8   : > { %v5928_v26 = vunpack.i.h.bf16 %v5926_v5  ;;  %v5927_v11 = vunpack.i.l.bf16 %v5926_v5 }
 0x4f9   : > { %5425 = vmatmul.mubr.msk.bf16.vlgmr.msra.gmra.mxu0 %vm317_vm0, %v2126_v28  ;;  %v2480_v28 = vsel %vm317_vm0, %v2398_v22, %v5923_v17 }
 0x4fa   : > { %5429 = vmatpush3.bf16.msra.mxu0 %v6876_v37  ;;  %5438 = vmatprep.mubr.msk.bf16.mxu0 %vm6477_vm1, %v6476_v0  ;;  %v2482_v14 = vsel %vm1387_vm5, %v2480_v28, %v5928_v26  ;;  %v2481_v63 = vsel %vm1387_vm5, %v2479_v13, %v5927_v11 }
 0x4fb   : > { %5430 = vmatprep.subr.bf16.mxu0 %v6476_v0  ;;  %v5936_v39 = vpop.permute.xlu1 %5935  ;;  %v2483_v25 = vsel %vm1390_vm6, %v2481_v63, %v5932_v34  ;;  %v2484_v21 = vsel %vm1390_vm6, %v2482_v14, %v5933_v52  ;;  %v2606_v52 = vld [vmem:[#allocation2 + $0x98] sm:$0xff] }
 0x4fc   : > { %v5938_v42 = vunpack.i.h.bf16 %v5936_v39  ;;  %v5937_v15 = vunpack.i.l.bf16 %v5936_v39 }
 0x4fe   : > { %5431 = vmatpush3.bf16.msra.mxu0 %v7217_v3  ;;  %v2485_v49 = vsel %vm398_vm2, %v2483_v25, %v5937_v15  ;;  %v2486_v51 = vsel %vm398_vm2, %v2484_v21, %v5938_v42 }
 0x4ff   : > { %5432 = vmatprep.subr.bf16.mxu0 %v6476_v0  ;;  %v5946_v53 = vpop.permute.xlu1 %5945  ;;  %v2487_v19 = vsel %vm1395_vm7, %v2485_v49, %v5942_v48  ;;  %v2488_v56 = vsel %vm1395_vm7, %v2486_v51, %v5943_v47 }
 0x500   : > { %v5948_v29 = vunpack.i.h.bf16 %v5946_v53  ;;  %v5947_v54 = vunpack.i.l.bf16 %v5946_v53 }
 0x502   : > { %5433 = vmatpush3.bf16.msra.mxu0 %v7232_v58 }
 0x503   : > { %5434 = vmatprep.subr.bf16.mxu0 %v6476_v0 }
 0x506   : > { %5435 = vmatpush3.bf16.msra.mxu0 %v7247_v7 }
 0x507   : > { %5436 = vmatprep.subr.bf16.mxu0 %v6476_v0 }
 0x50a   : > { %5437 = vmatpush3.bf16.msra.mxu0 %v7258_v12 }
 0x50b   : > { %5462 = vmatprep.subr.bf16.mxu0 %v6476_v0 }
 0x50d   : > { %5439 = vmatmul.mubr.msk.bf16.vlgmr.msra.gmra.mxu0 %vm1441_vm11, %v2287_v57  ;;  %v5951_v57 = vpop.permute.xlu0 %5950 }
 0x50e   : > { %5463 = vmatpush3.bf16.msra.mxu0 %v7128_v32  ;;  %5464 = vmatprep.mubr.msk.bf16.mxu0 %vm6477_vm1, %v6476_v0  ;;  %v5953_v60 = vunpack.i.h.bf16 %v5951_v57 }
 0x50f   : > { %5468 = vmatprep.subr.bf16.mxu0 %v6476_v0 }
 0x511   : > { %v5961_v28 = vpop.permute.xlu0 %5960 }
 0x512   : > { %v5962_v31 = vunpack.i.l.bf16 %v5961_v28 }
 0x515   : > { %v5971_v25 = vpop.permute.xlu0 %5970 }
 0x516   : > { %v5973_v45 = vunpack.i.h.bf16 %v5971_v25  ;;  %v5972_v47 = vunpack.i.l.bf16 %v5971_v25 }
 0x5b9   : > { %v2164_v62 = vpop.f32.mrf.mxu0 }
 0x5ba   : > { %v2165_v1 = vadd.f32 %v7272_v20, %v2164_v62  ;;  %v2490_v62 = vsel %vm1398_vm8, %v2488_v56, %v5948_v29 }
 0x5bb   : > { %v5426_v36 = vpop.f32.mrf.mxu0 }
 0x5bc   : > { %v2175_v33 = vadd.f32 %v4979_v61, %v2165_v1  ;;  %v5952_v61 = vunpack.i.l.bf16 %v5951_v57  ;;  %v2489_v1 = vsel %vm1398_vm8, %v2487_v19, %v5947_v54  ;;  %v5956_v36 = vpop.permute.xlu1 %5955 }
 0x5bd   : > { %v2167_v24 = vpop.f32.mrf.mxu0 }
 0x5be   : > { %v2177_v2 = vmax.f32 %v2175_v33, 0.0  ;;  %v2168_v4 = vadd.f32 %v7272_v20, %v2167_v24  ;;  %v5958_v33 = vunpack.i.h.bf16 %v5956_v36  ;;  %v2491_v24 = vsel %vm1401_vm9, %v2489_v1, %v5952_v61  ;;  %v5981_v61 = vpop.permute.xlu0 %5980 }
 0x5bf   : > { %v5427_v30 = vpop.f32.mrf.mxu0  ;;  %v5982_v1 = vunpack.i.l.bf16 %v5981_v61 }
 0x5c0   : > { %v4939_v9 = vpack.c.bf16 %v2177_v2, %v2177_v2  ;;  %v2176_v59 = vadd.f32 %v4980_v46, %v2168_v4  ;;  %v5957_v46 = vunpack.i.l.bf16 %v5956_v36  ;;  %v2492_v2 = vsel %vm1401_vm9, %v2490_v62, %v5953_v60 }
 0x5c1   : > { %v2494_v30 = vsel %vm1404_vm10, %v2492_v2, %v5958_v33  ;;  %v5983_v62 = vunpack.i.h.bf16 %v5981_v61 }
 0x5c2   : > { %2187 = vst.msk [vmem:[%s7280_s12 + $0x18] sm:$0xf] %vm1562_vm12, %v4939_v9  ;;  %v2178_v10 = vmax.f32 %v2176_v59, 0.0  ;;  %v2493_v4 = vsel %vm1404_vm10, %v2491_v24, %v5957_v46  ;;  %v5032_v59 = vld [vmem:[%s6605_s24 + $0x20] sm:$0xff]  }
 0x5c3   : > { %v2495_v9 = vpack.c.bf16 %v2494_v30, %v2493_v4  ;;  %v4984_v18 = vunpack.c.h.bf16 %v5032_v59 }
 0x5c4   : > { %v4940_v43 = vpack.c.bf16 %v2178_v10, %v2178_v10  ;;  %v4983_v10 = vunpack.c.l.bf16 %v5032_v59 }
 0x5c6   : > { %2188 = vst.msk [vmem:[%s7280_s12 + $0x1c] sm:$0xf] %vm1562_vm12, %v4940_v43 }
 0x5cd   : > { %v2325_v8 = vpop.f32.mrf.mxu0 }
 0x5ce   : > { %v2326_v23 = vadd.f32 %v7192_v16, %v2325_v8 }
 0x5cf   : > { %v5440_v44 = vpop.f32.mrf.mxu0 }
 0x5d0   : > { %v2332_v35 = vmax.f32 %v2326_v23, 0.0 }
 0x5d1   : > { %v2328_v27 = vpop.f32.mrf.mxu0 }
 0x5d2   : > { %v2329_v55 = vadd.f32 %v7192_v16, %v2328_v27 }
 0x5d3   : > { %v5441_v6 = vpop.f32.mrf.mxu0 }
 0x5d4   : > { %v2333_v38 = vmax.f32 %v2329_v55, 0.0  ;;  %v5963_v55 = vunpack.i.h.bf16 %v5961_v28  ;;  %v2605_v6 = vld [vmem:[#allocation2 + $0x90] sm:$0xff] }
 0x5d5   : > { %v2687_v42 = vsel %vm317_vm0, %v2605_v6, %v5962_v31 }
 0x5d6   : > { %v2334_v40 = vpack.c.bf16 %v2333_v38, %v2332_v35  ;;  %v5966_v35 = vpop.permute.xlu1 %5965 }
 0x5d7   : > { %v5968_v14 = vunpack.i.h.bf16 %v5966_v35  ;;  %v5967_v63 = vunpack.i.l.bf16 %v5966_v35 }
 0x5d8   : > { %5445 = vmatmul.mubr.msk.bf16.vlgmr.msra.gmra.mxu1 %vm317_vm0, %v2334_v40  ;;  %v2688_v40 = vsel %vm317_vm0, %v2606_v52, %v5963_v55 }
 0x5d9   : > { %5449 = vmatpush3.bf16.msra.mxu1 %v6876_v37  ;;  %5458 = vmatprep.mubr.msk.bf16.mxu1 %vm6477_vm1, %v6476_v0  ;;  %v2690_v51 = vsel %vm1387_vm5, %v2688_v40, %v5968_v14  ;;  %v2689_v53 = vsel %vm1387_vm5, %v2687_v42, %v5967_v63 }
 0x5da   : > { %5450 = vmatprep.subr.bf16.mxu1 %v6476_v0  ;;  %v5976_v29 = vpop.permute.xlu1 %5975  ;;  %v2691_v57 = vsel %vm1390_vm6, %v2689_v53, %v5972_v47  ;;  %v2692_v60 = vsel %vm1390_vm6, %v2690_v51, %v5973_v45  ;;  %v2814_v45 = vld [vmem:[#allocation2 + $0xb0] sm:$0xff] }
 0x5db   : > { %v5978_v19 = vunpack.i.h.bf16 %v5976_v29  ;;  %v5977_v56 = vunpack.i.l.bf16 %v5976_v29 }
 0x5dd   : > { %5451 = vmatpush3.bf16.msra.mxu1 %v7217_v3  ;;  %v2693_v36 = vsel %vm398_vm2, %v2691_v57, %v5977_v56  ;;  %v2694_v33 = vsel %vm398_vm2, %v2692_v60, %v5978_v19 }
 0x5de   : > { %5452 = vmatprep.subr.bf16.mxu1 %v6476_v0  ;;  %v5986_v46 = vpop.permute.xlu1 %5985  ;;  %v2695_v4 = vsel %vm1395_vm7, %v2693_v36, %v5982_v1  ;;  %v2696_v30 = vsel %vm1395_vm7, %v2694_v33, %v5983_v62 }
 0x5df   : > { %v5988_v24 = vunpack.i.h.bf16 %v5986_v46  ;;  %v5987_v2 = vunpack.i.l.bf16 %v5986_v46 }
 0x5e1   : > { %5453 = vmatpush3.bf16.msra.mxu1 %v7232_v58 }
 0x5e2   : > { %5454 = vmatprep.subr.bf16.mxu1 %v6476_v0 }
 0x5e5   : > { %5455 = vmatpush3.bf16.msra.mxu1 %v7247_v7 }
 0x5e6   : > { %5456 = vmatprep.subr.bf16.mxu1 %v6476_v0 }
 0x5e9   : > { %5457 = vmatpush3.bf16.msra.mxu1 %v7258_v12 }
 0x5ea   : > { %5482 = vmatprep.subr.bf16.mxu1 %v6476_v0 }
 0x5ec   : > { %5459 = vmatmul.mubr.msk.bf16.vlgmr.msra.gmra.mxu1 %vm1441_vm11, %v2495_v9  ;;  %v5991_v9 = vpop.permute.xlu0 %5990 }
 0x5ed   : > { %5483 = vmatpush3.bf16.msra.mxu1 %v7128_v32  ;;  %5484 = vmatprep.mubr.msk.bf16.mxu1 %vm6477_vm1, %v6476_v0  ;;  %v5993_v59 = vunpack.i.h.bf16 %v5991_v9 }
 0x5ee   : > { %5488 = vmatprep.subr.bf16.mxu1 %v6476_v0 }
 0x5f0   : > { %v6001_v40 = vpop.permute.xlu0 %6000 }
 0x5f1   : > { %v6002_v25 = vunpack.i.l.bf16 %v6001_v40 }
 0x5f4   : > { %v6011_v57 = vpop.permute.xlu0 %6010 }
 0x5f5   : > { %v6013_v61 = vunpack.i.h.bf16 %v6011_v57  ;;  %v6012_v62 = vunpack.i.l.bf16 %v6011_v57 }
 0x698   : > { %v2372_v43 = vpop.f32.mrf.mxu1 }
 0x699   : > { %v2373_v41 = vadd.f32 %v7272_v20, %v2372_v43  ;;  %v2697_v43 = vsel %vm1398_vm8, %v2695_v4, %v5987_v2 }
 0x69a   : > { %v5446_v8 = vpop.f32.mrf.mxu1 }
 0x69b   : > { %v2383_v17 = vadd.f32 %v4983_v10, %v2373_v41  ;;  %v5992_v10 = vunpack.i.l.bf16 %v5991_v9  ;;  %v2698_v41 = vsel %vm1398_vm8, %v2696_v30, %v5988_v24  ;;  %v5996_v8 = vpop.permute.xlu1 %5995 }
 0x69c   : > { %v2375_v50 = vpop.f32.mrf.mxu1 }
 0x69d   : > { %v2385_v22 = vmax.f32 %v2383_v17, 0.0  ;;  %v2376_v44 = vadd.f32 %v7272_v20, %v2375_v50  ;;  %v5998_v17 = vunpack.i.h.bf16 %v5996_v8  ;;  %v2699_v50 = vsel %vm1401_vm9, %v2697_v43, %v5992_v10 }
 0x69e   : > { %v5447_v5 = vpop.f32.mrf.mxu1 }
 0x69f   : > { %v4941_v23 = vpack.c.bf16 %v2385_v22, %v2385_v22  ;;  %v2384_v26 = vadd.f32 %v4984_v18, %v2376_v44  ;;  %v5997_v18 = vunpack.i.l.bf16 %v5996_v8  ;;  %v2700_v22 = vsel %vm1401_vm9, %v2698_v41, %v5993_v59 }
 0x6a0   : > { %v2702_v5 = vsel %vm1404_vm10, %v2700_v22, %v5998_v17 }
 0x6a1   : > { %2395 = vst.msk [vmem:[%s7280_s12 + $0x20] sm:$0xf] %vm1562_vm12, %v4941_v23  ;;  %v2386_v11 = vmax.f32 %v2384_v26, 0.0  ;;  %v2701_v44 = vsel %vm1404_vm10, %v2699_v50, %v5997_v18  ;;  %v5033_v26 = vld [vmem:[%s6605_s24 + $0x28] sm:$0xff]  }
 0x6a2   : > { %v2703_v23 = vpack.c.bf16 %v2702_v5, %v2701_v44  ;;  %v4988_v31 = vunpack.c.h.bf16 %v5033_v26 }
 0x6a3   : > { %v4942_v27 = vpack.c.bf16 %v2386_v11, %v2386_v11  ;;  %v4987_v11 = vunpack.c.l.bf16 %v5033_v26 }
 0x6a5   : > { %2396 = vst.msk [vmem:[%s7280_s12 + $0x24] sm:$0xf] %vm1562_vm12, %v4942_v27 }
 0x6ac   : > { %v2533_v13 = vpop.f32.mrf.mxu1 }
 0x6ad   : > { %v2534_v38 = vadd.f32 %v7192_v16, %v2533_v13 }
 0x6ae   : > { %v5460_v34 = vpop.f32.mrf.mxu1 }
 0x6af   : > { %v2540_v48 = vmax.f32 %v2534_v38, 0.0 }
 0x6b0   : > { %v2536_v39 = vpop.f32.mrf.mxu1 }
 0x6b1   : > { %v2537_v15 = vadd.f32 %v7192_v16, %v2536_v39 }
 0x6b2   : > { %v5461_v21 = vpop.f32.mrf.mxu1 }
 0x6b3   : > { %v2541_v49 = vmax.f32 %v2537_v15, 0.0  ;;  %v6003_v15 = vunpack.i.h.bf16 %v6001_v40  ;;  %v2813_v21 = vld [vmem:[#allocation2 + $0xa8] sm:$0xff] }
 0x6b4   : > { %v2895_v19 = vsel %vm317_vm0, %v2813_v21, %v6002_v25 }
 0x6b5   : > { %v2542_v54 = vpack.c.bf16 %v2541_v49, %v2540_v48  ;;  %v6006_v48 = vpop.permute.xlu1 %6005 }
 0x6b6   : > { %v6008_v51 = vunpack.i.h.bf16 %v6006_v48  ;;  %v6007_v53 = vunpack.i.l.bf16 %v6006_v48 }
 0x6b7   : > { %5465 = vmatmul.mubr.msk.bf16.vlgmr.msra.gmra.mxu0 %vm317_vm0, %v2542_v54  ;;  %v2896_v54 = vsel %vm317_vm0, %v2814_v45, %v6003_v15 }
 0x6b8   : > { %5469 = vmatpush3.bf16.msra.mxu0 %v6876_v37  ;;  %5478 = vmatprep.mubr.msk.bf16.mxu0 %vm6477_vm1, %v6476_v0  ;;  %v2898_v33 = vsel %vm1387_vm5, %v2896_v54, %v6008_v51  ;;  %v2897_v46 = vsel %vm1387_vm5, %v2895_v19, %v6007_v53  ;;  %v3022_v54 = vld [vmem:[#allocation2 + $0xc8] sm:$0xff] }
 0x6b9   : > { %5470 = vmatprep.subr.bf16.mxu0 %v6476_v0  ;;  %v6016_v24 = vpop.permute.xlu1 %6015  ;;  %v2899_v9 = vsel %vm1390_vm6, %v2897_v46, %v6012_v62  ;;  %v2900_v59 = vsel %vm1390_vm6, %v2898_v33, %v6013_v61 }
 0x6ba   : > { %v6018_v4 = vunpack.i.h.bf16 %v6016_v24  ;;  %v6017_v30 = vunpack.i.l.bf16 %v6016_v24 }
 0x6bc   : > { %5471 = vmatpush3.bf16.msra.mxu0 %v7217_v3  ;;  %v2901_v41 = vsel %vm398_vm2, %v2899_v9, %v6017_v30  ;;  %v2902_v8 = vsel %vm398_vm2, %v2900_v59, %v6018_v4 }
 0x6bd   : > { %5472 = vmatprep.subr.bf16.mxu0 %v6476_v0  ;;  %v6026_v17 = vpop.permute.xlu1 %6025 }
 0x6be   : > { %v6028_v18 = vunpack.i.h.bf16 %v6026_v17  ;;  %v6027_v50 = vunpack.i.l.bf16 %v6026_v17 }
 0x6c0   : > { %5473 = vmatpush3.bf16.msra.mxu0 %v7232_v58 }
 0x6c1   : > { %5474 = vmatprep.subr.bf16.mxu0 %v6476_v0 }
 0x6c4   : > { %5475 = vmatpush3.bf16.msra.mxu0 %v7247_v7 }
 0x6c5   : > { %5476 = vmatprep.subr.bf16.mxu0 %v6476_v0 }
 0x6c8   : > { %5477 = vmatpush3.bf16.msra.mxu0 %v7258_v12 }
 0x6c9   : > { %5502 = vmatprep.subr.bf16.mxu0 %v6476_v0 }
 0x6cb   : > { %5479 = vmatmul.mubr.msk.bf16.vlgmr.msra.gmra.mxu0 %vm1441_vm11, %v2703_v23 }
 0x6cc   : > { %5503 = vmatpush3.bf16.msra.mxu0 %v7128_v32  ;;  %5504 = vmatprep.mubr.msk.bf16.mxu0 %vm6477_vm1, %v6476_v0 }
 0x6cd   : > { %5508 = vmatprep.subr.bf16.mxu0 %v6476_v0 }
 0x777   : > { %v2580_v27 = vpop.f32.mrf.mxu0 }
 0x778   : > { %v2581_v28 = vadd.f32 %v7272_v20, %v2580_v27 }
 0x779   : > { %v5466_v13 = vpop.f32.mrf.mxu0 }
 0x77a   : > { %v2591_v55 = vadd.f32 %v4987_v11, %v2581_v28  ;;  %v6036_v28 = vpop.permute.xlu1 %6035 }
 0x77b   : > { %v2583_v6 = vpop.f32.mrf.mxu0  ;;  %v6037_v13 = vunpack.i.l.bf16 %v6036_v28 }
 0x77c   : > { %v2593_v52 = vmax.f32 %v2591_v55, 0.0  ;;  %v2584_v34 = vadd.f32 %v7272_v20, %v2583_v6 }
 0x77d   : > { %v5467_v35 = vpop.f32.mrf.mxu0 }
 0x77e   : > { %v4943_v38 = vpack.c.bf16 %v2593_v52, %v2593_v52  ;;  %v2592_v14 = vadd.f32 %v4988_v31, %v2584_v34 }
 0x780   : > { %2603 = vst.msk [vmem:[%s7280_s12 + $0x28] sm:$0xf] %vm1562_vm12, %v4943_v38  ;;  %v2594_v63 = vmax.f32 %v2592_v14, 0.0 }
 0x782   : > { %v4944_v39 = vpack.c.bf16 %v2594_v63, %v2594_v63 }
 0x784   : > { %2604 = vst.msk [vmem:[%s7280_s12 + $0x2c] sm:$0xf] %vm1562_vm12, %v4944_v39 }
 0x78b   : > { %v2741_v42 = vpop.f32.mrf.mxu0 }
 0x78c   : > { %v2742_v49 = vadd.f32 %v7192_v16, %v2741_v42 }
 0x78d   : > { %v5480_v47 = vpop.f32.mrf.mxu0 }
 0x78e   : > { %v2748_v1 = vmax.f32 %v2742_v49, 0.0 }
 0x78f   : > { %v2744_v29 = vpop.f32.mrf.mxu0 }
 0x790   : > { %v2745_v56 = vadd.f32 %v7192_v16, %v2744_v29  ;;  %v6021_v16 = vpop.permute.xlu0 %6020  ;;  %v3021_v29 = vld [vmem:[#allocation2 + $0xc0] sm:$0xff] }
 0x791   : > { %v5481_v60 = vpop.f32.mrf.mxu0  ;;  %v6023_v10 = vunpack.i.h.bf16 %v6021_v16  ;;  %v6022_v43 = vunpack.i.l.bf16 %v6021_v16 }
 0x792   : > { %v2749_v36 = vmax.f32 %v2745_v56, 0.0  ;;  %v6046_v56 = vpop.permute.xlu1 %6045 }
 0x793   : > { %v2903_v22 = vsel %vm1395_vm7, %v2901_v41, %v6022_v43  ;;  %v2904_v44 = vsel %vm1395_vm7, %v2902_v8, %v6023_v10  ;;  %v6048_v60 = vunpack.i.h.bf16 %v6046_v56  ;;  %v6047_v61 = vunpack.i.l.bf16 %v6046_v56 }
 0x794   : > { %v2750_v2 = vpack.c.bf16 %v2749_v36, %v2748_v1  ;;  %v6031_v5 = vpop.permute.xlu0 %6030  ;;  %v2906_v11 = vsel %vm1398_vm8, %v2904_v44, %v6028_v18  ;;  %v2905_v27 = vsel %vm1398_vm8, %v2903_v22, %v6027_v50 }
 0x795   : > { %v6033_v23 = vunpack.i.h.bf16 %v6031_v5  ;;  %v6032_v26 = vunpack.i.l.bf16 %v6031_v5 }
 0x796   : > { %5485 = vmatmul.mubr.msk.bf16.vlgmr.msra.gmra.mxu1 %vm317_vm0, %v2750_v2  ;;  %v6056_v10 = vpop.permute.xlu1 %6055 }
 0x797   : > { %5489 = vmatpush3.bf16.msra.mxu1 %v6876_v37  ;;  %5498 = vmatprep.mubr.msk.bf16.mxu1 %vm6477_vm1, %v6476_v0  ;;  %v2907_v55 = vsel %vm1401_vm9, %v2905_v27, %v6032_v26  ;;  %v2908_v31 = vsel %vm1401_vm9, %v2906_v11, %v6033_v23  ;;  %v6058_v41 = vunpack.i.h.bf16 %v6056_v10  ;;  %v6057_v8 = vunpack.i.l.bf16 %v6056_v10 }
 0x798   : > { %5490 = vmatprep.subr.bf16.mxu1 %v6476_v0  ;;  %v2909_v6 = vsel %vm1404_vm10, %v2907_v55, %v6037_v13  ;;  %v6041_v48 = vpop.permute.xlu0 %6040 }
 0x799   : > { %v6043_v51 = vunpack.i.h.bf16 %v6041_v48  ;;  %v6042_v53 = vunpack.i.l.bf16 %v6041_v48 }
 0x79a   : > { %v6066_v26 = vpop.permute.xlu1 %6065 }
 0x79b   : > { %5491 = vmatpush3.bf16.msra.mxu1 %v7217_v3  ;;  %v6038_v3 = vunpack.i.h.bf16 %v6036_v28  ;;  %v3104_v1 = vsel %vm317_vm0, %v3022_v54, %v6043_v51  ;;  %v3103_v36 = vsel %vm317_vm0, %v3021_v29, %v6042_v53  ;;  %v6068_v11 = vunpack.i.h.bf16 %v6066_v26  ;;  %v7595_v28 = vld [vmem:[%s7978_s3 + $0x18] sm:$0xff]  }
 0x79c   : > { %5492 = vmatprep.subr.bf16.mxu1 %v6476_v0  ;;  %v6051_v46 = vpop.permute.xlu0 %6050  ;;  %v3106_v59 = vsel %vm1387_vm5, %v3104_v1, %v6048_v60  ;;  %v3105_v16 = vsel %vm1387_vm5, %v3103_v36, %v6047_v61  ;;  %v6067_v27 = vunpack.i.l.bf16 %v6066_v26 }
 0x79d   : > { %v2910_v52 = vsel %vm1404_vm10, %v2908_v31, %v6038_v3  ;;  %v6053_v2 = vunpack.i.h.bf16 %v6051_v46  ;;  %v6052_v4 = vunpack.i.l.bf16 %v6051_v46 }
 0x79f   : > { %5493 = vmatpush3.bf16.msra.mxu1 %v7232_v58  ;;  %v2911_v58 = vpack.c.bf16 %v2910_v52, %v2909_v6  ;;  %v3107_v17 = vsel %vm1390_vm6, %v3105_v16, %v6052_v4  ;;  %v3108_v18 = vsel %vm1390_vm6, %v3106_v59, %v6053_v2  ;;  %v3230_v2 = vld [vmem:[#allocation2 + $0xe0] sm:$0xff] }
 0x7a0   : > { %5494 = vmatprep.subr.bf16.mxu1 %v6476_v0  ;;  %v6061_v50 = vpop.permute.xlu0 %6060  ;;  %v3109_v5 = vsel %vm398_vm2, %v3107_v17, %v6057_v8  ;;  %v3110_v23 = vsel %vm398_vm2, %v3108_v18, %v6058_v41 }
 0x7a1   : > { %v6063_v22 = vunpack.i.h.bf16 %v6061_v50  ;;  %v6062_v44 = vunpack.i.l.bf16 %v6061_v50 }
 0x7a3   : > { %5495 = vmatpush3.bf16.msra.mxu1 %v7247_v7  ;;  %v5034_v7 = vld [vmem:[%s6605_s24 + $0x30] sm:$0xff]   ;;  %v3111_v3 = vsel %vm1395_vm7, %v3109_v5, %v6062_v44  ;;  %v3112_v13 = vsel %vm1395_vm7, %v3110_v23, %v6063_v22 }
 0x7a4   : > { %5496 = vmatprep.subr.bf16.mxu1 %v6476_v0  ;;  %v4991_v34 = vunpack.c.l.bf16 %v5034_v7  ;;  %v4992_v63 = vunpack.c.h.bf16 %v5034_v7  ;;  %v6071_v55 = vpop.permute.xlu0 %6070  ;;  %v3113_v52 = vsel %vm1398_vm8, %v3111_v3, %v6067_v27  ;;  %v7606_v7 = vld [vmem:[%s7978_s3 + $0x10] sm:$0xff]  }
 0x7a5   : > { %v6073_v31 = vunpack.i.h.bf16 %v6071_v55  ;;  %v6072_v6 = vunpack.i.l.bf16 %v6071_v55 }
 0x7a7   : > { %5497 = vmatpush3.bf16.msra.mxu1 %v7258_v12 }
 0x7a8   : > { %5522 = vmatprep.subr.bf16.mxu1 %v6476_v0  ;;  %v6081_v1 = vpop.permute.xlu0 %6080 }
 0x7a9   : > { %v6082_v46 = vunpack.i.l.bf16 %v6081_v1 }
 0x7aa   : > { %5499 = vmatmul.mubr.msk.bf16.vlgmr.msra.gmra.mxu1 %vm1441_vm11, %v2911_v58  ;;  %v3114_v58 = vsel %vm1398_vm8, %v3112_v13, %v6068_v11 }
 0x7ab   : > { %5523 = vmatpush3.bf16.msra.mxu1 %v7128_v32  ;;  %5524 = vmatprep.mubr.msk.bf16.mxu1 %vm6477_vm1, %v6476_v0 }
 0x7ac   : > { %5528 = vmatprep.subr.bf16.mxu1 %v6476_v0  ;;  %v6091_v17 = vpop.permute.xlu0 %6090 }
 0x7ad   : > { %v6093_v50 = vunpack.i.h.bf16 %v6091_v17  ;;  %v6092_v22 = vunpack.i.l.bf16 %v6091_v17 }
 0x856   : > { %v2788_v35 = vpop.f32.mrf.mxu1 }
 0x857   : > { %v2789_v38 = vadd.f32 %v7272_v20, %v2788_v35 }
 0x858   : > { %v5486_v12 = vpop.f32.mrf.mxu1 }
 0x859   : > { %v2799_v14 = vadd.f32 %v4991_v34, %v2789_v38  ;;  %v6076_v34 = vpop.permute.xlu1 %6075  ;;  %v3115_v12 = vsel %vm1401_vm9, %v3113_v52, %v6072_v6  ;;  %v6101_v6 = vpop.permute.xlu0 %6100 }
 0x85a   : > { %v2791_v39 = vpop.f32.mrf.mxu1  ;;  %v6078_v35 = vunpack.i.h.bf16 %v6076_v34  ;;  %v6077_v38 = vunpack.i.l.bf16 %v6076_v34  ;;  %v6103_v52 = vunpack.i.h.bf16 %v6101_v6 }
 0x85b   : > { %v2801_v40 = vmax.f32 %v2799_v14, 0.0  ;;  %v2792_v42 = vadd.f32 %v7272_v20, %v2791_v39  ;;  %v7575_v20 = vld [vmem:[%s7979_s4] ss:$0 sm:$0xff]  ;;  %v3116_v14 = vsel %vm1401_vm9, %v3114_v58, %v6073_v31  ;;  %v6102_v58 = vunpack.i.l.bf16 %v6101_v6 }
 0x85c   : > { %v5487_v15 = vpop.f32.mrf.mxu1  ;;  %v3117_v39 = vsel %vm1404_vm10, %v3115_v12, %v6077_v38 }
 0x85d   : > { %v4945_v25 = vpack.c.bf16 %v2801_v40, %v2801_v40  ;;  %v2800_v21 = vadd.f32 %v4992_v63, %v2792_v42  ;;  %v7615_v63 = vld [vmem:[%s7978_s3 + $0x8] sm:$0xff]   ;;  %v3118_v40 = vsel %vm1404_vm10, %v3116_v14, %v6078_v35  ;;  %v7624_v42 = vld [vmem:[%s7978_s3] sm:$0xff]  }
 0x85e   : > { %v3119_v15 = vpack.c.bf16 %v3118_v40, %v3117_v39 }
 0x85f   : > { %2811 = vst.msk [vmem:[%s7280_s12 + $0x30] sm:$0xf] %vm1562_vm12, %v4945_v25  ;;  %v2802_v45 = vmax.f32 %v2800_v21, 0.0  ;;  %v5035_v25 = vld [vmem:[%s6605_s24 + $0x38] sm:$0xff]  }
 0x860   : > { %v4995_v21 = vunpack.c.l.bf16 %v5035_v25  ;;  %v4996_v53 = vunpack.c.h.bf16 %v5035_v25 }
 0x861   : > { %v4946_v47 = vpack.c.bf16 %v2802_v45, %v2802_v45 }
 0x863   : > { %2812 = vst.msk [vmem:[%s7280_s12 + $0x34] sm:$0xf] %vm1562_vm12, %v4946_v47  ;;  %v7637_v47 = vld [vmem:[%s7981_s6] ss:$0 sm:$0xff] }
 0x86a   : > { %v2949_v49 = vpop.f32.mrf.mxu1 }
 0x86b   : > { %v2950_v57 = vadd.f32 %v7575_v20, %v2949_v49 }
 0x86c   : > { %v5500_v19 = vpop.f32.mrf.mxu1 }
 0x86d   : > { %v2956_v30 = vmax.f32 %v2950_v57, 0.0 }
 0x86e   : > { %v2952_v62 = vpop.f32.mrf.mxu1 }
 0x86f   : > { %v2953_v33 = vadd.f32 %v7575_v20, %v2952_v62 }
 0x870   : > { %v5501_v24 = vpop.f32.mrf.mxu1 }
 0x871   : > { %v2957_v9 = vmax.f32 %v2953_v33, 0.0  ;;  %v6083_v33 = vunpack.i.h.bf16 %v6081_v1  ;;  %v3229_v24 = vld [vmem:[#allocation2 + $0xd8] sm:$0xff] }
 0x872   : > { %v3311_v41 = vsel %vm317_vm0, %v3229_v24, %v6082_v46 }
 0x873   : > { %v2958_v43 = vpack.c.bf16 %v2957_v9, %v2956_v30  ;;  %v6086_v30 = vpop.permute.xlu1 %6085 }
 0x874   : > { %v6088_v59 = vunpack.i.h.bf16 %v6086_v30  ;;  %v6087_v16 = vunpack.i.l.bf16 %v6086_v30 }
 0x875   : > { %5505 = vmatmul.mubr.msk.bf16.vlgmr.msra.gmra.mxu0 %vm317_vm0, %v2958_v43  ;;  %v3312_v43 = vsel %vm317_vm0, %v3230_v2, %v6083_v33 }
 0x876   : > { %5509 = vmatpush3.bf16.msra.mxu0 %v6876_v37  ;;  %5518 = vmatprep.mubr.msk.bf16.mxu0 %vm6477_vm1, %v6476_v0  ;;  %v3314_v23 = vsel %vm1387_vm5, %v3312_v43, %v6088_v59  ;;  %v3313_v26 = vsel %vm1387_vm5, %v3311_v41, %v6087_v16 }
 0x877   : > { %5510 = vmatprep.subr.bf16.mxu0 %v6476_v0  ;;  %v6096_v11 = vpop.permute.xlu1 %6095  ;;  %v3315_v55 = vsel %vm1390_vm6, %v3313_v26, %v6092_v22  ;;  %v3316_v31 = vsel %vm1390_vm6, %v3314_v23, %v6093_v50  ;;  %v3438_v50 = vld [vmem:[#allocation2 + $0xf8] sm:$0xff] }
 0x878   : > { %v6098_v3 = vunpack.i.h.bf16 %v6096_v11  ;;  %v6097_v13 = vunpack.i.l.bf16 %v6096_v11 }
 0x87a   : > { %5511 = vmatpush3.bf16.msra.mxu0 %v7595_v28  ;;  %v3317_v34 = vsel %vm398_vm2, %v3315_v55, %v6097_v13  ;;  %v3318_v35 = vsel %vm398_vm2, %v3316_v31, %v6098_v3 }
 0x87b   : > { %5512 = vmatprep.subr.bf16.mxu0 %v6476_v0  ;;  %v6106_v38 = vpop.permute.xlu1 %6105  ;;  %v3319_v39 = vsel %vm1395_vm7, %v3317_v34, %v6102_v58  ;;  %v3320_v40 = vsel %vm1395_vm7, %v3318_v35, %v6103_v52 }
 0x87c   : > { %v6108_v12 = vunpack.i.h.bf16 %v6106_v38  ;;  %v6107_v14 = vunpack.i.l.bf16 %v6106_v38 }
 0x87e   : > { %5513 = vmatpush3.bf16.msra.mxu0 %v7606_v7 }
 0x87f   : > { %5514 = vmatprep.subr.bf16.mxu0 %v6476_v0 }
 0x882   : > { %5515 = vmatpush3.bf16.msra.mxu0 %v7615_v63 }
 0x883   : > { %5516 = vmatprep.subr.bf16.mxu0 %v6476_v0 }
 0x886   : > { %5517 = vmatpush3.bf16.msra.mxu0 %v7624_v42 }
 0x887   : > { %5542 = vmatprep.subr.bf16.mxu0 %v6476_v0 }
 0x889   : > { %5519 = vmatmul.mubr.msk.bf16.vlgmr.msra.gmra.mxu0 %vm1441_vm11, %v3119_v15  ;;  %v6111_v15 = vpop.permute.xlu0 %6110 }
 0x88a   : > { %5543 = vmatpush3.bf16.msra.mxu0 %v7128_v32  ;;  %5544 = vmatprep.mubr.msk.bf16.mxu0 %vm6477_vm1, %v6476_v0  ;;  %v6113_v25 = vunpack.i.h.bf16 %v6111_v15 }
 0x88b   : > { %5548 = vmatprep.subr.bf16.mxu0 %v6476_v0 }
 0x88d   : > { %v6121_v43 = vpop.permute.xlu0 %6120 }
 0x88e   : > { %v6122_v17 = vunpack.i.l.bf16 %v6121_v43 }
 0x891   : > { %v6131_v55 = vpop.permute.xlu0 %6130 }
 0x892   : > { %v6133_v6 = vunpack.i.h.bf16 %v6131_v55  ;;  %v6132_v52 = vunpack.i.l.bf16 %v6131_v55 }
 0x935   : > { %v2996_v45 = vpop.f32.mrf.mxu0 }
 0x936   : > { %v2997_v48 = vadd.f32 %v7637_v47, %v2996_v45  ;;  %v3322_v45 = vsel %vm1398_vm8, %v3320_v40, %v6108_v12 }
 0x937   : > { %v5506_v49 = vpop.f32.mrf.mxu0 }
 0x938   : > { %v3007_v51 = vadd.f32 %v4995_v21, %v2997_v48  ;;  %v6112_v21 = vunpack.i.l.bf16 %v6111_v15  ;;  %v3321_v48 = vsel %vm1398_vm8, %v3319_v39, %v6107_v14  ;;  %v6116_v49 = vpop.permute.xlu1 %6115 }
 0x939   : > { %v2999_v29 = vpop.f32.mrf.mxu0 }
 0x93a   : > { %v3009_v54 = vmax.f32 %v3007_v51, 0.0  ;;  %v3000_v19 = vadd.f32 %v7637_v47, %v2999_v29  ;;  %v6118_v51 = vunpack.i.h.bf16 %v6116_v49  ;;  %v3323_v29 = vsel %vm1401_vm9, %v3321_v48, %v6112_v21  ;;  %v6141_v21 = vpop.permute.xlu0 %6140 }
 0x93b   : > { %v5507_v56 = vpop.f32.mrf.mxu0  ;;  %v6142_v48 = vunpack.i.l.bf16 %v6141_v21 }
 0x93c   : > { %v4947_v57 = vpack.c.bf16 %v3009_v54, %v3009_v54  ;;  %v3008_v60 = vadd.f32 %v4996_v53, %v3000_v19  ;;  %v6117_v53 = vunpack.i.l.bf16 %v6116_v49  ;;  %v3324_v54 = vsel %vm1401_vm9, %v3322_v45, %v6113_v25 }
 0x93d   : > { %v3326_v56 = vsel %vm1404_vm10, %v3324_v54, %v6118_v51  ;;  %v6143_v45 = vunpack.i.h.bf16 %v6141_v21 }
 0x93e   : > { %3019 = vst.msk [vmem:[%s7280_s12 + $0x38] sm:$0xf] %vm1562_vm12, %v4947_v57  ;;  %v3010_v61 = vmax.f32 %v3008_v60, 0.0  ;;  %v3325_v19 = vsel %vm1404_vm10, %v3323_v29, %v6117_v53  ;;  %v5036_v60 = vld [vmem:[%s6605_s24 + $0x40] sm:$0xff]  }
 0x93f   : > { %v3327_v57 = vpack.c.bf16 %v3326_v56, %v3325_v19  ;;  %v5000_v46 = vunpack.c.h.bf16 %v5036_v60 }
 0x940   : > { %v4948_v62 = vpack.c.bf16 %v3010_v61, %v3010_v61  ;;  %v4999_v61 = vunpack.c.l.bf16 %v5036_v60 }
 0x942   : > { %3020 = vst.msk [vmem:[%s7280_s12 + $0x3c] sm:$0xf] %vm1562_vm12, %v4948_v62 }
 0x949   : > { %v3157_v36 = vpop.f32.mrf.mxu0 }
 0x94a   : > { %v3158_v9 = vadd.f32 %v7575_v20, %v3157_v36 }
 0x94b   : > { %v5520_v4 = vpop.f32.mrf.mxu0 }
 0x94c   : > { %v3164_v44 = vmax.f32 %v3158_v9, 0.0 }
 0x94d   : > { %v3160_v10 = vpop.f32.mrf.mxu0 }
 0x94e   : > { %v3161_v8 = vadd.f32 %v7575_v20, %v3160_v10 }
 0x94f   : > { %v5521_v18 = vpop.f32.mrf.mxu0 }
 0x950   : > { %v3165_v5 = vmax.f32 %v3161_v8, 0.0  ;;  %v6123_v8 = vunpack.i.h.bf16 %v6121_v43  ;;  %v3437_v18 = vld [vmem:[#allocation2 + $0xf0] sm:$0xff] }
 0x951   : > { %v3519_v3 = vsel %vm317_vm0, %v3437_v18, %v6122_v17 }
 0x952   : > { %v3166_v27 = vpack.c.bf16 %v3165_v5, %v3164_v44  ;;  %v6126_v44 = vpop.permute.xlu1 %6125 }
 0x953   : > { %v6128_v23 = vunpack.i.h.bf16 %v6126_v44  ;;  %v6127_v26 = vunpack.i.l.bf16 %v6126_v44 }
 0x954   : > { %5525 = vmatmul.mubr.msk.bf16.vlgmr.msra.gmra.mxu1 %vm317_vm0, %v3166_v27  ;;  %v3520_v27 = vsel %vm317_vm0, %v3438_v50, %v6123_v8 }
 0x955   : > { %5529 = vmatpush3.bf16.msra.mxu1 %v6876_v37  ;;  %5538 = vmatprep.mubr.msk.bf16.mxu1 %vm6477_vm1, %v6476_v0  ;;  %v3522_v35 = vsel %vm1387_vm5, %v3520_v27, %v6128_v23  ;;  %v3521_v38 = vsel %vm1387_vm5, %v3519_v3, %v6127_v26 }
 0x956   : > { %5530 = vmatprep.subr.bf16.mxu1 %v6476_v0  ;;  %v6136_v12 = vpop.permute.xlu1 %6135  ;;  %v3523_v15 = vsel %vm1390_vm6, %v3521_v38, %v6132_v52  ;;  %v3524_v25 = vsel %vm1390_vm6, %v3522_v35, %v6133_v6  ;;  %v3646_v6 = vld [vmem:[#allocation2 + $0x110] sm:$0xff] }
 0x957   : > { %v6138_v39 = vunpack.i.h.bf16 %v6136_v12  ;;  %v6137_v40 = vunpack.i.l.bf16 %v6136_v12 }
 0x959   : > { %5531 = vmatpush3.bf16.msra.mxu1 %v7595_v28  ;;  %v3525_v49 = vsel %vm398_vm2, %v3523_v15, %v6137_v40  ;;  %v3526_v51 = vsel %vm398_vm2, %v3524_v25, %v6138_v39 }
 0x95a   : > { %5532 = vmatprep.subr.bf16.mxu1 %v6476_v0  ;;  %v6146_v53 = vpop.permute.xlu1 %6145  ;;  %v3527_v19 = vsel %vm1395_vm7, %v3525_v49, %v6142_v48  ;;  %v3528_v56 = vsel %vm1395_vm7, %v3526_v51, %v6143_v45 }
 0x95b   : > { %v6148_v29 = vunpack.i.h.bf16 %v6146_v53  ;;  %v6147_v54 = vunpack.i.l.bf16 %v6146_v53 }
 0x95d   : > { %5533 = vmatpush3.bf16.msra.mxu1 %v7606_v7 }
 0x95e   : > { %5534 = vmatprep.subr.bf16.mxu1 %v6476_v0 }
 0x961   : > { %5535 = vmatpush3.bf16.msra.mxu1 %v7615_v63 }
 0x962   : > { %5536 = vmatprep.subr.bf16.mxu1 %v6476_v0 }
 0x965   : > { %5537 = vmatpush3.bf16.msra.mxu1 %v7624_v42 }
 0x966   : > { %5562 = vmatprep.subr.bf16.mxu1 %v6476_v0 }
 0x968   : > { %5539 = vmatmul.mubr.msk.bf16.vlgmr.msra.gmra.mxu1 %vm1441_vm11, %v3327_v57  ;;  %v6151_v57 = vpop.permute.xlu0 %6150 }
 0x969   : > { %5563 = vmatpush3.bf16.msra.mxu1 %v7128_v32  ;;  %5564 = vmatprep.mubr.msk.bf16.mxu1 %vm6477_vm1, %v6476_v0  ;;  %v6153_v60 = vunpack.i.h.bf16 %v6151_v57 }
 0x96a   : > { %5568 = vmatprep.subr.bf16.mxu1 %v6476_v0 }
 0x96c   : > { %v6161_v27 = vpop.permute.xlu0 %6160 }
 0x96d   : > { %v6162_v55 = vunpack.i.l.bf16 %v6161_v27 }
 0x970   : > { %v6171_v15 = vpop.permute.xlu0 %6170 }
 0x971   : > { %v6173_v21 = vunpack.i.h.bf16 %v6171_v15  ;;  %v6172_v45 = vunpack.i.l.bf16 %v6171_v15 }
 0xa14   : > { %v3204_v62 = vpop.f32.mrf.mxu1 }
 0xa15   : > { %v3205_v1 = vadd.f32 %v7637_v47, %v3204_v62  ;;  %v3529_v62 = vsel %vm1398_vm8, %v3527_v19, %v6147_v54 }
 0xa16   : > { %v5526_v36 = vpop.f32.mrf.mxu1 }
 0xa17   : > { %v3215_v33 = vadd.f32 %v4999_v61, %v3205_v1  ;;  %v6152_v61 = vunpack.i.l.bf16 %v6151_v57  ;;  %v3530_v1 = vsel %vm1398_vm8, %v3528_v56, %v6148_v29  ;;  %v6156_v36 = vpop.permute.xlu1 %6155 }
 0xa18   : > { %v3207_v24 = vpop.f32.mrf.mxu1 }
 0xa19   : > { %v3217_v2 = vmax.f32 %v3215_v33, 0.0  ;;  %v3208_v4 = vadd.f32 %v7637_v47, %v3207_v24  ;;  %v6158_v33 = vunpack.i.h.bf16 %v6156_v36  ;;  %v3531_v24 = vsel %vm1401_vm9, %v3529_v62, %v6152_v61  ;;  %v6181_v61 = vpop.permute.xlu0 %6180 }
 0xa1a   : > { %v5527_v30 = vpop.f32.mrf.mxu1  ;;  %v6183_v62 = vunpack.i.h.bf16 %v6181_v61 }
 0xa1b   : > { %v4949_v9 = vpack.c.bf16 %v3217_v2, %v3217_v2  ;;  %v3216_v59 = vadd.f32 %v5000_v46, %v3208_v4  ;;  %v6157_v46 = vunpack.i.l.bf16 %v6156_v36  ;;  %v3532_v2 = vsel %vm1401_vm9, %v3530_v1, %v6153_v60 }
 0xa1c   : > { %v3534_v30 = vsel %vm1404_vm10, %v3532_v2, %v6158_v33  ;;  %v6182_v1 = vunpack.i.l.bf16 %v6181_v61 }
 0xa1d   : > { %3227 = vst.msk [vmem:[%s7280_s12 + $0x40] sm:$0xf] %vm1562_vm12, %v4949_v9  ;;  %v3218_v16 = vmax.f32 %v3216_v59, 0.0  ;;  %v3533_v4 = vsel %vm1404_vm10, %v3531_v24, %v6157_v46  ;;  %v5037_v59 = vld [vmem:[%s6605_s24 + $0x48] sm:$0xff]  }
 0xa1e   : > { %v3535_v9 = vpack.c.bf16 %v3534_v30, %v3533_v4  ;;  %v5004_v17 = vunpack.c.h.bf16 %v5037_v59 }
 0xa1f   : > { %v4950_v10 = vpack.c.bf16 %v3218_v16, %v3218_v16  ;;  %v5003_v16 = vunpack.c.l.bf16 %v5037_v59 }
 0xa21   : > { %3228 = vst.msk [vmem:[%s7280_s12 + $0x44] sm:$0xf] %vm1562_vm12, %v4950_v10 }
 0xa28   : > { %v3365_v41 = vpop.f32.mrf.mxu1 }
 0xa29   : > { %v3366_v5 = vadd.f32 %v7575_v20, %v3365_v41 }
 0xa2a   : > { %v5540_v22 = vpop.f32.mrf.mxu1 }
 0xa2b   : > { %v3372_v58 = vmax.f32 %v3366_v5, 0.0 }
 0xa2c   : > { %v3368_v11 = vpop.f32.mrf.mxu1 }
 0xa2d   : > { %v3369_v13 = vadd.f32 %v7575_v20, %v3368_v11 }
 0xa2e   : > { %v5541_v31 = vpop.f32.mrf.mxu1 }
 0xa2f   : > { %v3373_v34 = vmax.f32 %v3369_v13, 0.0  ;;  %v6163_v13 = vunpack.i.h.bf16 %v6161_v27  ;;  %v3645_v31 = vld [vmem:[#allocation2 + $0x108] sm:$0xff] }
 0xa30   : > { %v3727_v39 = vsel %vm317_vm0, %v3645_v31, %v6162_v55 }
 0xa31   : > { %v3374_v14 = vpack.c.bf16 %v3373_v34, %v3372_v58  ;;  %v6166_v58 = vpop.permute.xlu1 %6165 }
 0xa32   : > { %v6168_v35 = vunpack.i.h.bf16 %v6166_v58  ;;  %v6167_v38 = vunpack.i.l.bf16 %v6166_v58 }
 0xa33   : > { %5545 = vmatmul.mubr.msk.bf16.vlgmr.msra.gmra.mxu0 %vm317_vm0, %v3374_v14  ;;  %v3728_v14 = vsel %vm317_vm0, %v3646_v6, %v6163_v13 }
 0xa34   : > { %5549 = vmatpush3.bf16.msra.mxu0 %v6876_v37  ;;  %5558 = vmatprep.mubr.msk.bf16.mxu0 %vm6477_vm1, %v6476_v0  ;;  %v3730_v51 = vsel %vm1387_vm5, %v3728_v14, %v6168_v35  ;;  %v3729_v53 = vsel %vm1387_vm5, %v3727_v39, %v6167_v38 }
 0xa35   : > { %5550 = vmatprep.subr.bf16.mxu0 %v6476_v0  ;;  %v6176_v29 = vpop.permute.xlu1 %6175  ;;  %v3731_v57 = vsel %vm1390_vm6, %v3729_v53, %v6172_v45  ;;  %v3732_v60 = vsel %vm1390_vm6, %v3730_v51, %v6173_v21  ;;  %v3854_v21 = vld [vmem:[#allocation2 + $0x128] sm:$0xff] }
 0xa36   : > { %v6178_v19 = vunpack.i.h.bf16 %v6176_v29  ;;  %v6177_v56 = vunpack.i.l.bf16 %v6176_v29 }
 0xa38   : > { %5551 = vmatpush3.bf16.msra.mxu0 %v7595_v28  ;;  %v3733_v36 = vsel %vm398_vm2, %v3731_v57, %v6177_v56  ;;  %v3734_v33 = vsel %vm398_vm2, %v3732_v60, %v6178_v19 }
 0xa39   : > { %5552 = vmatprep.subr.bf16.mxu0 %v6476_v0  ;;  %v6186_v46 = vpop.permute.xlu1 %6185  ;;  %v3735_v4 = vsel %vm1395_vm7, %v3733_v36, %v6182_v1  ;;  %v3736_v30 = vsel %vm1395_vm7, %v3734_v33, %v6183_v62 }
 0xa3a   : > { %v6188_v24 = vunpack.i.h.bf16 %v6186_v46  ;;  %v6187_v2 = vunpack.i.l.bf16 %v6186_v46 }
 0xa3c   : > { %5553 = vmatpush3.bf16.msra.mxu0 %v7606_v7 }
 0xa3d   : > { %5554 = vmatprep.subr.bf16.mxu0 %v6476_v0 }
 0xa40   : > { %5555 = vmatpush3.bf16.msra.mxu0 %v7615_v63 }
 0xa41   : > { %5556 = vmatprep.subr.bf16.mxu0 %v6476_v0 }
 0xa44   : > { %5557 = vmatpush3.bf16.msra.mxu0 %v7624_v42 }
 0xa45   : > { %5582 = vmatprep.subr.bf16.mxu0 %v6476_v0 }
 0xa47   : > { %5559 = vmatmul.mubr.msk.bf16.vlgmr.msra.gmra.mxu0 %vm1441_vm11, %v3535_v9  ;;  %v6191_v9 = vpop.permute.xlu0 %6190 }
 0xa48   : > { %5583 = vmatpush3.bf16.msra.mxu0 %v7128_v32  ;;  %5584 = vmatprep.mubr.msk.bf16.mxu0 %vm6477_vm1, %v6476_v0  ;;  %v6193_v59 = vunpack.i.h.bf16 %v6191_v9 }
 0xa49   : > { %5588 = vmatprep.subr.bf16.mxu0 %v6476_v0 }
 0xa4b   : > { %v6201_v14 = vpop.permute.xlu0 %6200 }
 0xa4c   : > { %v6202_v15 = vunpack.i.l.bf16 %v6201_v14 }
 0xa4f   : > { %v6211_v57 = vpop.permute.xlu0 %6210 }
 0xa50   : > { %v6213_v61 = vunpack.i.h.bf16 %v6211_v57  ;;  %v6212_v62 = vunpack.i.l.bf16 %v6211_v57 }
 0xaf3   : > { %v3412_v10 = vpop.f32.mrf.mxu0 }
 0xaf4   : > { %v3413_v43 = vadd.f32 %v7637_v47, %v3412_v10  ;;  %v3738_v10 = vsel %vm1398_vm8, %v3736_v30, %v6188_v24 }
 0xaf5   : > { %v5546_v41 = vpop.f32.mrf.mxu0 }
 0xaf6   : > { %v3423_v8 = vadd.f32 %v5003_v16, %v3413_v43  ;;  %v6192_v16 = vunpack.i.l.bf16 %v6191_v9  ;;  %v3737_v43 = vsel %vm1398_vm8, %v3735_v4, %v6187_v2  ;;  %v6196_v41 = vpop.permute.xlu1 %6195 }
 0xaf7   : > { %v3415_v18 = vpop.f32.mrf.mxu0 }
 0xaf8   : > { %v3425_v50 = vmax.f32 %v3423_v8, 0.0  ;;  %v3416_v22 = vadd.f32 %v7637_v47, %v3415_v18  ;;  %v6198_v8 = vunpack.i.h.bf16 %v6196_v41  ;;  %v3739_v18 = vsel %vm1401_vm9, %v3737_v43, %v6192_v16  ;;  %v6221_v16 = vpop.permute.xlu0 %6220 }
 0xaf9   : > { %v5547_v44 = vpop.f32.mrf.mxu0  ;;  %v6222_v43 = vunpack.i.l.bf16 %v6221_v16 }
 0xafa   : > { %v4951_v5 = vpack.c.bf16 %v3425_v50, %v3425_v50  ;;  %v3424_v23 = vadd.f32 %v5004_v17, %v3416_v22  ;;  %v6197_v17 = vunpack.i.l.bf16 %v6196_v41  ;;  %v3740_v50 = vsel %vm1401_vm9, %v3738_v10, %v6193_v59 }
 0xafb   : > { %v3742_v44 = vsel %vm1404_vm10, %v3740_v50, %v6198_v8  ;;  %v6223_v10 = vunpack.i.h.bf16 %v6221_v16  ;;  %v6397_v16 = vld [vmem:[#allocation2 + $0x140] sm:$0xff] }
 0xafc   : > { %3435 = vst.msk [vmem:[%s7280_s12 + $0x48] sm:$0xf] %vm1562_vm12, %v4951_v5  ;;  %v3426_v26 = vmax.f32 %v3424_v23, 0.0  ;;  %v3741_v22 = vsel %vm1404_vm10, %v3739_v18, %v6197_v17  ;;  %v5038_v23 = vld [vmem:[%s6605_s24 + $0x50] sm:$0xff]  }
 0xafd   : > { %v3743_v5 = vpack.c.bf16 %v3742_v44, %v3741_v22  ;;  %v5008_v55 = vunpack.c.h.bf16 %v5038_v23 }
 0xafe   : > { %v4952_v11 = vpack.c.bf16 %v3426_v26, %v3426_v26  ;;  %v5007_v26 = vunpack.c.l.bf16 %v5038_v23 }
 0xb00   : > { %3436 = vst.msk [vmem:[%s7280_s12 + $0x4c] sm:$0xf] %vm1562_vm12, %v4952_v11 }
 0xb07   : > { %v3573_v3 = vpop.f32.mrf.mxu0 }
 0xb08   : > { %v3574_v34 = vadd.f32 %v7575_v20, %v3573_v3 }
 0xb09   : > { %v5560_v52 = vpop.f32.mrf.mxu0 }
 0xb0a   : > { %v3580_v48 = vmax.f32 %v3574_v34, 0.0 }
 0xb0b   : > { %v3576_v12 = vpop.f32.mrf.mxu0 }
 0xb0c   : > { %v3577_v40 = vadd.f32 %v7575_v20, %v3576_v12 }
 0xb0d   : > { %v5561_v25 = vpop.f32.mrf.mxu0 }
 0xb0e   : > { %v3581_v49 = vmax.f32 %v3577_v40, 0.0  ;;  %v6203_v40 = vunpack.i.h.bf16 %v6201_v14  ;;  %v3853_v25 = vld [vmem:[#allocation2 + $0x120] sm:$0xff] }
 0xb0f   : > { %v3935_v19 = vsel %vm317_vm0, %v3853_v25, %v6202_v15 }
 0xb10   : > { %v3582_v54 = vpack.c.bf16 %v3581_v49, %v3580_v48  ;;  %v6206_v48 = vpop.permute.xlu1 %6205 }
 0xb11   : > { %v6208_v51 = vunpack.i.h.bf16 %v6206_v48  ;;  %v6207_v53 = vunpack.i.l.bf16 %v6206_v48 }
 0xb12   : > { %5565 = vmatmul.mubr.msk.bf16.vlgmr.msra.gmra.mxu1 %vm317_vm0, %v3582_v54  ;;  %v3936_v54 = vsel %vm317_vm0, %v3854_v21, %v6203_v40 }
 0xb13   : > { %5569 = vmatpush3.bf16.msra.mxu1 %v6876_v37  ;;  %5578 = vmatprep.mubr.msk.bf16.mxu1 %vm6477_vm1, %v6476_v0  ;;  %v3938_v33 = vsel %vm1387_vm5, %v3936_v54, %v6208_v51  ;;  %v3937_v46 = vsel %vm1387_vm5, %v3935_v19, %v6207_v53 }
 0xb14   : > { %5570 = vmatprep.subr.bf16.mxu1 %v6476_v0  ;;  %v6216_v24 = vpop.permute.xlu1 %6215  ;;  %v3939_v9 = vsel %vm1390_vm6, %v3937_v46, %v6212_v62  ;;  %v3940_v59 = vsel %vm1390_vm6, %v3938_v33, %v6213_v61 }
 0xb15   : > { %v6218_v4 = vunpack.i.h.bf16 %v6216_v24  ;;  %v6217_v30 = vunpack.i.l.bf16 %v6216_v24 }
 0xb17   : > { %5571 = vmatpush3.bf16.msra.mxu1 %v7595_v28  ;;  %v3941_v41 = vsel %vm398_vm2, %v3939_v9, %v6217_v30  ;;  %v3942_v8 = vsel %vm398_vm2, %v3940_v59, %v6218_v4 }
 0xb18   : > { %5572 = vmatprep.subr.bf16.mxu1 %v6476_v0  ;;  %v6226_v17 = vpop.permute.xlu1 %6225  ;;  %v3943_v22 = vsel %vm1395_vm7, %v3941_v41, %v6222_v43  ;;  %v3944_v44 = vsel %vm1395_vm7, %v3942_v8, %v6223_v10  ;;  %v6398_v43 = vld [vmem:[#allocation2 + $0x138] sm:$0xff] }
 0xb19   : > { %v6228_v18 = vunpack.i.h.bf16 %v6226_v17  ;;  %v6227_v50 = vunpack.i.l.bf16 %v6226_v17 }
 0xb1b   : > { %5573 = vmatpush3.bf16.msra.mxu1 %v7606_v7 }
 0xb1c   : > { %5574 = vmatprep.subr.bf16.mxu1 %v6476_v0 }
 0xb1f   : > { %5575 = vmatpush3.bf16.msra.mxu1 %v7615_v63 }
 0xb20   : > { %5576 = vmatprep.subr.bf16.mxu1 %v6476_v0 }
 0xb23   : > { %5577 = vmatpush3.bf16.msra.mxu1 %v7624_v42 }
 0xb24   : > { %5602 = vmatprep.subr.bf16.mxu1 %v6476_v0 }
 0xb26   : > { %5579 = vmatmul.mubr.msk.bf16.vlgmr.msra.gmra.mxu1 %vm1441_vm11, %v3743_v5  ;;  %v6231_v5 = vpop.permute.xlu0 %6230 }
 0xb27   : > { %5603 = vmatpush3.bf16.msra.mxu1 %v7128_v32  ;;  %5604 = vmatprep.mubr.msk.bf16.mxu1 %vm6477_vm1, %v6476_v0  ;;  %v6233_v23 = vunpack.i.h.bf16 %v6231_v5 }
 0xb28   : > { %5608 = vmatprep.subr.bf16.mxu1 %v6476_v0 }
 0xbd2   : > { %v3620_v11 = vpop.f32.mrf.mxu1 }
 0xbd3   : > { %v3621_v27 = vadd.f32 %v7637_v47, %v3620_v11  ;;  %v3945_v11 = vsel %vm1398_vm8, %v3943_v22, %v6227_v50 }
 0xbd4   : > { %v5566_v3 = vpop.f32.mrf.mxu1 }
 0xbd5   : > { %v3631_v13 = vadd.f32 %v5007_v26, %v3621_v27  ;;  %v6232_v26 = vunpack.i.l.bf16 %v6231_v5  ;;  %v3946_v27 = vsel %vm1398_vm8, %v3944_v44, %v6228_v18  ;;  %v6236_v3 = vpop.permute.xlu1 %6235 }
 0xbd6   : > { %v3623_v31 = vpop.f32.mrf.mxu1 }
 0xbd7   : > { %v3633_v6 = vmax.f32 %v3631_v13, 0.0  ;;  %v3624_v52 = vadd.f32 %v7637_v47, %v3623_v31  ;;  %v6238_v13 = vunpack.i.h.bf16 %v6236_v3  ;;  %v3947_v31 = vsel %vm1401_vm9, %v3945_v11, %v6232_v26 }
 0xbd8   : > { %v5567_v58 = vpop.f32.mrf.mxu1 }
 0xbd9   : > { %v4953_v34 = vpack.c.bf16 %v3633_v6, %v3633_v6  ;;  %v3632_v35 = vadd.f32 %v5008_v55, %v3624_v52  ;;  %v6237_v55 = vunpack.i.l.bf16 %v6236_v3  ;;  %v3948_v6 = vsel %vm1401_vm9, %v3946_v27, %v6233_v23  ;;  %v6246_v19 = vpop.permute.xlu1 %6245 }
 0xbda   : > { %v3950_v58 = vsel %vm1404_vm10, %v3948_v6, %v6238_v13  ;;  %v6248_v9 = vunpack.i.h.bf16 %v6246_v19  ;;  %v6247_v59 = vunpack.i.l.bf16 %v6246_v19 }
 0xbdb   : > { %3643 = vst.msk [vmem:[%s7280_s12 + $0x50] sm:$0xf] %vm1562_vm12, %v4953_v34  ;;  %v3634_v38 = vmax.f32 %v3632_v35, 0.0  ;;  %v3949_v52 = vsel %vm1404_vm10, %v3947_v31, %v6237_v55  ;;  %v5039_v35 = vld [vmem:[%s6605_s24 + $0x58] sm:$0xff]  }
 0xbdc   : > { %v3951_v34 = vpack.c.bf16 %v3950_v58, %v3949_v52  ;;  %v5012_v15 = vunpack.c.h.bf16 %v5039_v35 }
 0xbdd   : > { %v4954_v12 = vpack.c.bf16 %v3634_v38, %v3634_v38  ;;  %v5011_v38 = vunpack.c.l.bf16 %v5039_v35 }
 0xbdf   : > { %3644 = vst.msk [vmem:[%s7280_s12 + $0x54] sm:$0xf] %vm1562_vm12, %v4954_v12 }
 0xbe6   : > { %v3781_v39 = vpop.f32.mrf.mxu1 }
 0xbe7   : > { %v3782_v49 = vadd.f32 %v7575_v20, %v3781_v39 }
 0xbe8   : > { %v5580_v45 = vpop.f32.mrf.mxu1 }
 0xbe9   : > { %v3788_v1 = vmax.f32 %v3782_v49, 0.0 }
 0xbea   : > { %v3784_v29 = vpop.f32.mrf.mxu1 }
 0xbeb   : > { %v3785_v56 = vadd.f32 %v7575_v20, %v3784_v29 }
 0xbec   : > { %v5581_v60 = vpop.f32.mrf.mxu1 }
 0xbed   : > { %v3789_v36 = vmax.f32 %v3785_v56, 0.0  ;;  %v6241_v56 = vpop.permute.xlu0 %6240 }
 0xbee   : > { %v6242_v4 = vunpack.i.l.bf16 %v6241_v56 }
 0xbef   : > { %v3790_v2 = vpack.c.bf16 %v3789_v36, %v3788_v1  ;;  %v6256_v36 = vpop.permute.xlu1 %6255 }
 0xbf0   : > { %v4143_v41 = vsel %vm317_vm0, %v6398_v43, %v6242_v4  ;;  %v6258_v5 = vunpack.i.h.bf16 %v6256_v36  ;;  %v6257_v23 = vunpack.i.l.bf16 %v6256_v36 }
 0xbf1   : > { %5585 = vmatmul.mubr.msk.bf16.vlgmr.msra.gmra.mxu0 %vm317_vm0, %v3790_v2  ;;  %v6251_v24 = vpop.permute.xlu0 %6250  ;;  %v6243_v2 = vunpack.i.h.bf16 %v6241_v56  ;;  %v4145_v44 = vsel %vm1387_vm5, %v4143_v41, %v6247_v59 }
 0xbf2   : > { %5589 = vmatpush3.bf16.msra.mxu0 %v6876_v37  ;;  %5598 = vmatprep.mubr.msk.bf16.mxu0 %vm6477_vm1, %v6476_v0  ;;  %v6253_v8 = vunpack.i.h.bf16 %v6251_v24  ;;  %v6252_v17 = vunpack.i.l.bf16 %v6251_v24 }
 0xbf3   : > { %5590 = vmatprep.subr.bf16.mxu0 %v6476_v0  ;;  %v4144_v10 = vsel %vm317_vm0, %v6397_v16, %v6243_v2  ;;  %v6266_v18 = vpop.permute.xlu1 %6265 }
 0xbf4   : > { %v4146_v22 = vsel %vm1387_vm5, %v4144_v10, %v6248_v9  ;;  %v4147_v27 = vsel %vm1390_vm6, %v4145_v44, %v6252_v17  ;;  %v6268_v31 = vunpack.i.h.bf16 %v6266_v18  ;;  %v6267_v6 = vunpack.i.l.bf16 %v6266_v18  ;;  %v6399_v17 = vld [vmem:[#allocation2 + $0x158] sm:$0xff]  ;;  %v7866_v44 = vld [vmem:[%s7979_s4] ss:$0 sm:$0xff] }
 0xbf5   : > { %v6261_v50 = vpop.permute.xlu0 %6260  ;;  %v4148_v3 = vsel %vm1390_vm6, %v4146_v22, %v6253_v8  ;;  %v4149_v13 = vsel %vm398_vm2, %v4147_v27, %v6257_v23 }
 0xbf6   : > { %5591 = vmatpush3.bf16.msra.mxu0 %v7595_v28  ;;  %v6263_v26 = vunpack.i.h.bf16 %v6261_v50  ;;  %v6262_v11 = vunpack.i.l.bf16 %v6261_v50  ;;  %v4150_v55 = vsel %vm398_vm2, %v4148_v3, %v6258_v5  ;;  %v6400_v50 = vld [vmem:[#allocation2 + $0x150] sm:$0xff] }
 0xbf7   : > { %5592 = vmatprep.subr.bf16.mxu0 %v6476_v0  ;;  %v6276_v52 = vpop.permute.xlu1 %6275 }
 0xbf9   : > { %v6271_v58 = vpop.permute.xlu0 %6270 }
 0xbfa   : > { %5593 = vmatpush3.bf16.msra.mxu0 %v7606_v7  ;;  %v6272_v35 = vunpack.i.l.bf16 %v6271_v58 }
 0xbfb   : > { %5594 = vmatprep.subr.bf16.mxu0 %v6476_v0  ;;  %v6286_v16 = vpop.permute.xlu1 %6285 }
 0xbfc   : > { %v6288_v43 = vunpack.i.h.bf16 %v6286_v16  ;;  %v6287_v41 = vunpack.i.l.bf16 %v6286_v16 }
 0xbfd   : > { %v6281_v2 = vpop.permute.xlu0 %6280 }
 0xbfe   : > { %5595 = vmatpush3.bf16.msra.mxu0 %v7615_v63  ;;  %v6282_v9 = vunpack.i.l.bf16 %v6281_v2 }
 0xbff   : > { %5596 = vmatprep.subr.bf16.mxu0 %v6476_v0 }
 0xc00   : > { %v4351_v22 = vsel %vm317_vm0, %v6400_v50, %v6282_v9 }
 0xc01   : > { %v6291_v23 = vpop.permute.xlu0 %6290 }
 0xc02   : > { %5597 = vmatpush3.bf16.msra.mxu0 %v7624_v42 }
 0xc03   : > { %5622 = vmatprep.subr.bf16.mxu0 %v6476_v0 }
 0xc05   : > { %5599 = vmatmul.mubr.msk.bf16.vlgmr.msra.gmra.mxu0 %vm1441_vm11, %v3951_v34  ;;  %v6273_v34 = vunpack.i.h.bf16 %v6271_v58 }
 0xc06   : > { %5623 = vmatpush3.bf16.msra.mxu0 %v7128_v32  ;;  %5624 = vmatprep.mubr.msk.bf16.mxu0 %vm6477_vm1, %v6476_v0 }
 0xc07   : > { %5628 = vmatprep.subr.bf16.mxu0 %v6476_v0 }
 0xcb1   : > { %v3828_v12 = vpop.f32.mrf.mxu0 }
 0xcb2   : > { %v3829_v14 = vadd.f32 %v7637_v47, %v3828_v12  ;;  %v4152_v12 = vsel %vm1395_vm7, %v4150_v55, %v6263_v26  ;;  %v4353_v55 = vsel %vm1387_vm5, %v4351_v22, %v6287_v41 }
 0xcb3   : > { %v5586_v39 = vpop.f32.mrf.mxu0 }
 0xcb4   : > { %v3839_v40 = vadd.f32 %v5011_v38, %v3829_v14  ;;  %v4151_v38 = vsel %vm1395_vm7, %v4149_v13, %v6262_v11  ;;  %v4154_v14 = vsel %vm1398_vm8, %v4152_v12, %v6268_v31  ;;  %v6293_v11 = vunpack.i.h.bf16 %v6291_v23  ;;  %v6296_v31 = vpop.permute.xlu1 %6295 }
 0xcb5   : > { %v3831_v25 = vpop.f32.mrf.mxu0  ;;  %v4153_v39 = vsel %vm1398_vm8, %v4151_v38, %v6267_v6  ;;  %v6297_v58 = vunpack.i.l.bf16 %v6296_v31  ;;  %v6301_v38 = vpop.permute.xlu0 %6300 }
 0xcb6   : > { %v3841_v21 = vmax.f32 %v3839_v40, 0.0  ;;  %v3832_v45 = vadd.f32 %v7637_v47, %v3831_v25  ;;  %v6278_v40 = vunpack.i.h.bf16 %v6276_v52  ;;  %v4155_v25 = vsel %vm1401_vm9, %v4153_v39, %v6272_v35 }
 0xcb7   : > { %v5587_v48 = vpop.f32.mrf.mxu0  ;;  %v6303_v12 = vunpack.i.h.bf16 %v6301_v38 }
 0xcb8   : > { %v4955_v49 = vpack.c.bf16 %v3841_v21, %v3841_v21  ;;  %v3840_v51 = vadd.f32 %v5012_v15, %v3832_v45  ;;  %v6277_v15 = vunpack.i.l.bf16 %v6276_v52  ;;  %v4156_v21 = vsel %vm1401_vm9, %v4154_v14, %v6273_v34 }
 0xcb9   : > { %v4158_v48 = vsel %vm1404_vm10, %v4156_v21, %v6278_v40  ;;  %v6298_v52 = vunpack.i.h.bf16 %v6296_v31  ;;  %v6302_v14 = vunpack.i.l.bf16 %v6301_v38  ;;  %v6402_v31 = vld [vmem:[#allocation2 + $0x170] sm:$0xff] }
 0xcba   : > { %3851 = vst.msk [vmem:[%s7280_s12 + $0x58] sm:$0xf] %vm1562_vm12, %v4955_v49  ;;  %v3842_v53 = vmax.f32 %v3840_v51, 0.0  ;;  %v4157_v45 = vsel %vm1404_vm10, %v4155_v25, %v6277_v15  ;;  %v5040_v51 = vld [vmem:[%s6605_s24 + $0x60] sm:$0xff]   ;;  %v6306_v15 = vpop.permute.xlu1 %6305 }
 0xcbb   : > { %v4159_v49 = vpack.c.bf16 %v4158_v48, %v4157_v45  ;;  %v6308_v25 = vunpack.i.h.bf16 %v6306_v15  ;;  %v6307_v21 = vunpack.i.l.bf16 %v6306_v15 }
 0xcbc   : > { %v4956_v29 = vpack.c.bf16 %v3842_v53, %v3842_v53  ;;  %v5015_v53 = vunpack.c.l.bf16 %v5040_v51 }
 0xcbe   : > { %3852 = vst.msk [vmem:[%s7280_s12 + $0x5c] sm:$0xf] %vm1562_vm12, %v4956_v29 }
 0xcc5   : > { %v3989_v54 = vpop.f32.mrf.mxu0 }
 0xcc6   : > { %v3990_v60 = vadd.f32 %v7575_v20, %v3989_v54 }
 0xcc7   : > { %v5600_v57 = vpop.f32.mrf.mxu0 }
 0xcc8   : > { %v3996_v33 = vmax.f32 %v3990_v60, 0.0  ;;  %v5016_v57 = vunpack.c.h.bf16 %v5040_v51 }
 0xcc9   : > { %v3992_v61 = vpop.f32.mrf.mxu0 }
 0xcca   : > { %v3993_v62 = vadd.f32 %v7575_v20, %v3992_v61 }
 0xccb   : > { %v5601_v1 = vpop.f32.mrf.mxu0 }
 0xccc   : > { %v3997_v46 = vmax.f32 %v3993_v62, 0.0 }
 0xcce   : > { %v3998_v30 = vpack.c.bf16 %v3997_v46, %v3996_v33 }
 0xcd0   : > { %5605 = vmatmul.mubr.msk.bf16.vlgmr.msra.gmra.mxu1 %vm317_vm0, %v3998_v30  ;;  %v6283_v30 = vunpack.i.h.bf16 %v6281_v2 }
 0xcd1   : > { %5609 = vmatpush3.bf16.msra.mxu1 %v6876_v37  ;;  %5618 = vmatprep.mubr.msk.bf16.mxu1 %vm6477_vm1, %v6476_v0 }
 0xcd2   : > { %5610 = vmatprep.subr.bf16.mxu1 %v6476_v0  ;;  %v4352_v18 = vsel %vm317_vm0, %v6399_v17, %v6283_v30 }
 0xcd3   : > { %v4354_v13 = vsel %vm1387_vm5, %v4352_v18, %v6288_v43 }
 0xcd4   : > { %v4356_v35 = vsel %vm1390_vm6, %v4354_v13, %v6293_v11 }
 0xcd5   : > { %5611 = vmatpush3.bf16.msra.mxu1 %v7595_v28  ;;  %v4358_v40 = vsel %vm398_vm2, %v4356_v35, %v6298_v52  ;;  %v6403_v52 = vld [vmem:[#allocation2 + $0x168] sm:$0xff] }
 0xcd6   : > { %5612 = vmatprep.subr.bf16.mxu1 %v6476_v0  ;;  %v4360_v48 = vsel %vm1395_vm7, %v4358_v40, %v6303_v12 }
 0xcd9   : > { %5613 = vmatpush3.bf16.msra.mxu1 %v7606_v7 }
 0xcda   : > { %5614 = vmatprep.subr.bf16.mxu1 %v6476_v0 }
 0xcdd   : > { %5615 = vmatpush3.bf16.msra.mxu1 %v7615_v63 }
 0xcde   : > { %5616 = vmatprep.subr.bf16.mxu1 %v6476_v0 }
 0xce1   : > { %5617 = vmatpush3.bf16.msra.mxu1 %v7624_v42 }
 0xce2   : > { %5642 = vmatprep.subr.bf16.mxu1 %v6476_v0 }
 0xce4   : > { %5619 = vmatmul.mubr.msk.bf16.vlgmr.msra.gmra.mxu1 %vm1441_vm11, %v4159_v49  ;;  %v6311_v49 = vpop.permute.xlu0 %6310 }
 0xce5   : > { %5643 = vmatpush3.bf16.msra.mxu1 %v7128_v32  ;;  %5644 = vmatprep.mubr.msk.bf16.mxu1 %vm6477_vm1, %v6476_v0  ;;  %v6313_v51 = vunpack.i.h.bf16 %v6311_v49 }
 0xce6   : > { %5648 = vmatprep.subr.bf16.mxu1 %v6476_v0 }
 0xce8   : > { %v6326_v41 = vpop.permute.xlu0 %6325 }
 0xce9   : > { %v6328_v22 = vunpack.i.h.bf16 %v6326_v41 }
 0xd90   : > { %v4036_v29 = vpop.f32.mrf.mxu1 }
 0xd91   : > { %v4037_v54 = vadd.f32 %v7637_v47, %v4036_v29 }
 0xd92   : > { %v5606_v19 = vpop.f32.mrf.mxu1 }
 0xd93   : > { %v4047_v56 = vadd.f32 %v5015_v53, %v4037_v54  ;;  %v6312_v53 = vunpack.i.l.bf16 %v6311_v49  ;;  %v4362_v54 = vsel %vm1398_vm8, %v4360_v48, %v6308_v25  ;;  %v6316_v19 = vpop.permute.xlu1 %6315 }
 0xd94   : > { %v4039_v60 = vpop.f32.mrf.mxu1 }
 0xd95   : > { %v4049_v61 = vmax.f32 %v4047_v56, 0.0  ;;  %v4040_v62 = vadd.f32 %v7637_v47, %v4039_v60  ;;  %v6317_v56 = vunpack.i.l.bf16 %v6316_v19  ;;  %v4364_v60 = vsel %vm1401_vm9, %v4362_v54, %v6313_v51 }
 0xd96   : > { %v5607_v1 = vpop.f32.mrf.mxu1 }
 0xd97   : > { %v4957_v36 = vpack.c.bf16 %v4049_v61, %v4049_v61  ;;  %v4048_v33 = vadd.f32 %v5016_v57, %v4040_v62  ;;  %v6321_v43 = vpop.permute.xlu1 %6320 }
 0xd99   : > { %4059 = vst.msk [vmem:[%s7280_s12 + $0x60] sm:$0xf] %vm1562_vm12, %v4957_v36  ;;  %v4050_v46 = vmax.f32 %v4048_v33, 0.0 }
 0xd9b   : > { %v4958_v24 = vpack.c.bf16 %v4050_v46, %v4050_v46  ;;  %v6331_v17 = vpop.permute.xlu1 %6330 }
 0xd9c   : > { %v6333_v11 = vunpack.i.h.bf16 %v6331_v17 }
 0xd9d   : > { %4060 = vst.msk [vmem:[%s7280_s12 + $0x64] sm:$0xf] %vm1562_vm12, %v4958_v24 }
 0xda4   : > { %v4197_v4 = vpop.f32.mrf.mxu1 }
 0xda5   : > { %v4198_v10 = vadd.f32 %v7575_v20, %v4197_v4  ;;  %v6292_v20 = vunpack.i.l.bf16 %v6291_v23 }
 0xda6   : > { %v5620_v59 = vpop.f32.mrf.mxu1 }
 0xda7   : > { %v4204_v27 = vmax.f32 %v4198_v10, 0.0  ;;  %v4355_v34 = vsel %vm1390_vm6, %v4353_v55, %v6292_v20  ;;  %v6332_v20 = vunpack.i.l.bf16 %v6331_v17 }
 0xda8   : > { %v4200_v8 = vpop.f32.mrf.mxu1  ;;  %v4357_v39 = vsel %vm398_vm2, %v4355_v34, %v6297_v58 }
 0xda9   : > { %v4201_v5 = vadd.f32 %v7866_v44, %v4200_v8  ;;  %v4359_v45 = vsel %vm1395_vm7, %v4357_v39, %v6302_v14 }
 0xdaa   : > { %v5621_v26 = vpop.f32.mrf.mxu1  ;;  %v4361_v29 = vsel %vm1398_vm8, %v4359_v45, %v6307_v21 }
 0xdab   : > { %v4205_v3 = vmax.f32 %v4201_v5, 0.0  ;;  %v4363_v57 = vsel %vm1401_vm9, %v4361_v29, %v6312_v53  ;;  %v6336_v5 = vpop.permute.xlu0 %6335  ;;  %v6323_v53 = vunpack.i.h.bf16 %v6321_v43  ;;  %v6322_v29 = vunpack.i.l.bf16 %v6321_v43 }
 0xdac   : > { %v4365_v61 = vsel %vm1404_vm10, %v4363_v57, %v6317_v56  ;;  %v6338_v34 = vunpack.i.h.bf16 %v6336_v5  ;;  %v6337_v35 = vunpack.i.l.bf16 %v6336_v5 }
 0xdad   : > { %v4206_v6 = vpack.c.bf16 %v4205_v3, %v4204_v27  ;;  %v6341_v3 = vpop.permute.xlu1 %6340 }
 0xdae   : > { %v6343_v40 = vunpack.i.h.bf16 %v6341_v3  ;;  %v6342_v15 = vunpack.i.l.bf16 %v6341_v3 }
 0xdaf   : > { %5625 = vmatmul.mubr.msk.bf16.vlgmr.msra.gmra.mxu0 %vm317_vm0, %v4206_v6  ;;  %v4561_v6 = vsel %vm317_vm0, %v6402_v31, %v6328_v22  ;;  %v6346_v39 = vpop.permute.xlu0 %6345 }
 0xdb0   : > { %5629 = vmatpush3.bf16.msra.mxu0 %v6876_v37  ;;  %5638 = vmatprep.mubr.msk.bf16.mxu0 %vm6477_vm1, %v6476_v0  ;;  %v4563_v12 = vsel %vm1387_vm5, %v4561_v6, %v6333_v11  ;;  %v6348_v25 = vunpack.i.h.bf16 %v6346_v39  ;;  %v6347_v21 = vunpack.i.l.bf16 %v6346_v39  ;;  %v5043_v6 = vld [vmem:[%s6605_s24 + $0x78] sm:$0xff]  }
 0xdb1   : > { %5630 = vmatprep.subr.bf16.mxu0 %v6476_v0  ;;  %v4565_v48 = vsel %vm1390_vm6, %v4563_v12, %v6338_v34  ;;  %v5028_v12 = vunpack.c.h.bf16 %v5043_v6 }
 0xdb2   : > { %v4567_v51 = vsel %vm398_vm2, %v4565_v48, %v6343_v40 }
 0xdb3   : > { %v6351_v54 = vpop.permute.xlu0 %6350 }
 0xdb4   : > { %5631 = vmatpush3.bf16.msra.mxu0 %v7595_v28  ;;  %v6318_v28 = vunpack.i.h.bf16 %v6316_v19  ;;  %v6353_v56 = vunpack.i.h.bf16 %v6351_v54  ;;  %v6352_v57 = vunpack.i.l.bf16 %v6351_v54 }
 0xdb5   : > { %5632 = vmatprep.subr.bf16.mxu0 %v6476_v0 }
 0xdb6   : > { %v4366_v62 = vsel %vm1404_vm10, %v4364_v60, %v6318_v28  ;;  %v4569_v28 = vsel %vm1395_vm7, %v4567_v51, %v6348_v25  ;;  %v6356_v60 = vpop.permute.xlu1 %6355 }
 0xdb8   : > { %5633 = vmatpush3.bf16.msra.mxu0 %v7606_v7  ;;  %v4367_v7 = vpack.c.bf16 %v4366_v62, %v4365_v61  ;;  %v4571_v62 = vsel %vm1398_vm8, %v4569_v28, %v6323_v53 }
 0xdb9   : > { %5634 = vmatprep.subr.bf16.mxu0 %v6476_v0 }
 0xdbc   : > { %5635 = vmatpush3.bf16.msra.mxu0 %v7615_v63  ;;  %v5041_v63 = vld [vmem:[%s6605_s24 + $0x68] sm:$0xff]  }
 0xdbd   : > { %5636 = vmatprep.subr.bf16.mxu0 %v6476_v0  ;;  %v5019_v1 = vunpack.c.l.bf16 %v5041_v63 }
 0xdc0   : > { %5637 = vmatpush3.bf16.msra.mxu0 %v7624_v42  ;;  %v5020_v42 = vunpack.c.h.bf16 %v5041_v63  ;;  %v6358_v63 = vunpack.i.h.bf16 %v6356_v60 }
 0xdc1   : > { %5662 = vmatprep.subr.bf16.mxu0 %v6476_v0 }
 0xdc3   : > { %5639 = vmatmul.mubr.msk.bf16.vlgmr.msra.gmra.mxu0 %vm1441_vm11, %v4367_v7  ;;  %v6405_v7 = vld [vmem:[%s7978_s3 + $0x10] sm:$0xff]  }
 0xdc4   : > { %5663 = vmatpush3.bf16.msra.mxu0 %v7128_v32  ;;  %5664 = vmatprep.mubr.msk.bf16.mxu0 %vm6477_vm1, %v6476_v0 }
 0xe6f   : > { %v4244_v36 = vpop.f32.mrf.mxu0 }
 0xe70   : > { %v4245_v33 = vadd.f32 %v7637_v47, %v4244_v36 }
 0xe71   : > { %v5626_v46 = vpop.f32.mrf.mxu0 }
 0xe72   : > { %v4255_v24 = vadd.f32 %v5019_v1, %v4245_v33  ;;  %v6357_v1 = vunpack.i.l.bf16 %v6356_v60  ;;  %v4573_v33 = vsel %vm1401_vm9, %v4571_v62, %v6353_v56  ;;  %v6406_v46 = vld [vmem:[%s7978_s3 + $0x8] sm:$0xff]  }
 0xe73   : > { %v4247_v2 = vpop.f32.mrf.mxu0 }
 0xe74   : > { %v4257_v4 = vmax.f32 %v4255_v24, 0.0  ;;  %v4248_v30 = vadd.f32 %v7637_v47, %v4247_v2  ;;  %v6327_v47 = vunpack.i.l.bf16 %v6326_v41  ;;  %v6407_v2 = vld [vmem:[%s7978_s3] sm:$0xff]  }
 0xe75   : > { %v5627_v9 = vpop.f32.mrf.mxu0 }
 0xe76   : > { %v4959_v59 = vpack.c.bf16 %v4257_v4, %v4257_v4  ;;  %v4256_v16 = vadd.f32 %v5020_v42, %v4248_v30  ;;  %v4560_v58 = vsel %vm317_vm0, %v6403_v52, %v6327_v47  ;;  %v4575_v42 = vsel %vm1404_vm10, %v4573_v33, %v6358_v63  ;;  %v5042_v30 = vld [vmem:[%s6605_s24 + $0x70] sm:$0xff]  }
 0xe77   : > { %v4562_v14 = vsel %vm1387_vm5, %v4560_v58, %v6332_v20  ;;  %v5023_v9 = vunpack.c.l.bf16 %v5042_v30  ;;  %v5024_v43 = vunpack.c.h.bf16 %v5042_v30  ;;  %v5027_v52 = vunpack.c.l.bf16 %v5043_v6 }
 0xe78   : > { %4267 = vst.msk [vmem:[%s7280_s12 + $0x68] sm:$0xf] %vm1562_vm12, %v4959_v59  ;;  %v4258_v32 = vmax.f32 %v4256_v16, 0.0  ;;  %v4564_v45 = vsel %vm1390_vm6, %v4562_v14, %v6337_v35 }
 0xe79   : > { %v4566_v49 = vsel %vm398_vm2, %v4564_v45, %v6342_v15 }
 0xe7a   : > { %v4960_v10 = vpack.c.bf16 %v4258_v32, %v4258_v32  ;;  %v4568_v19 = vsel %vm1395_vm7, %v4566_v49, %v6347_v21 }
 0xe7b   : > { %v4570_v61 = vsel %vm1398_vm8, %v4568_v19, %v6322_v29 }
 0xe7c   : > { %4268 = vst.msk [vmem:[%s7280_s12 + $0x6c] sm:$0xf] %vm1562_vm12, %v4960_v10  ;;  %v4572_v36 = vsel %vm1401_vm9, %v4570_v61, %v6352_v57 }
 0xe7d   : > { %v4574_v24 = vsel %vm1404_vm10, %v4572_v36, %v6357_v1 }
 0xe7e   : > { %v4576_v4 = vpack.c.bf16 %v4575_v42, %v4574_v24 }
 0xe83   : > { %v4405_v8 = vpop.f32.mrf.mxu0 }
 0xe84   : > { %v4406_v50 = vadd.f32 %v7866_v44, %v4405_v8 }
 0xe85   : > { %v5640_v18 = vpop.f32.mrf.mxu0 }
 0xe86   : > { %v4412_v13 = vmax.f32 %v4406_v50, 0.0 }
 0xe87   : > { %v4408_v23 = vpop.f32.mrf.mxu0 }
 0xe88   : > { %v4409_v26 = vadd.f32 %v7866_v44, %v4408_v23 }
 0xe89   : > { %v5641_v27 = vpop.f32.mrf.mxu0 }
 0xe8a   : > { %v4413_v55 = vmax.f32 %v4409_v26, 0.0 }
 0xe8c   : > { %v4414_v38 = vpack.c.bf16 %v4413_v55, %v4412_v13 }
 0xe8e   : > { %5645 = vmatmul.mubr.msk.bf16.vlgmr.msra.gmra.mxu1 %vm317_vm0, %v4414_v38 }
 0xe8f   : > { %5649 = vmatpush3.bf16.msra.mxu1 %v6876_v37  ;;  %5658 = vmatprep.mubr.msk.bf16.mxu1 %vm6477_vm1, %v6476_v0  ;;  %v6404_v37 = vld [vmem:[%s7978_s3 + $0x18] sm:$0xff]  }
 0xe90   : > { %5650 = vmatprep.subr.bf16.mxu1 %v6476_v0 }
 0xe93   : > { %5651 = vmatpush3.bf16.msra.mxu1 %v6404_v37 }
 0xe94   : > { %5652 = vmatprep.subr.bf16.mxu1 %v6476_v0 }
 0xe97   : > { %5653 = vmatpush3.bf16.msra.mxu1 %v6405_v7 }
 0xe98   : > { %5654 = vmatprep.subr.bf16.mxu1 %v6476_v0 }
 0xe9b   : > { %5655 = vmatpush3.bf16.msra.mxu1 %v6406_v46 }
 0xe9c   : > { %5656 = vmatprep.subr.bf16.mxu1 %v6476_v0  ;;  %v6408_v0 = vld [vmem:[%s7981_s6] ss:$0 sm:$0xff] }
 0xe9f   : > { %5657 = vmatpush3.bf16.msra.mxu1 %v6407_v2 }
 0xea2   : > { %5659 = vmatmul.mubr.msk.bf16.vlgmr.msra.gmra.mxu1 %vm1441_vm11, %v4576_v4 }
 0xf4e   : > { %v4452_v59 = vpop.f32.mrf.mxu1 }
 0xf4f   : > { %v4453_v16 = vadd.f32 %v6408_v0, %v4452_v59 }
 0xf50   : > { %v5646_v32 = vpop.f32.mrf.mxu1 }
 0xf51   : > { %v4463_v10 = vadd.f32 %v5023_v9, %v4453_v16 }
 0xf52   : > { %v4455_v41 = vpop.f32.mrf.mxu1 }
 0xf53   : > { %v4465_v8 = vmax.f32 %v4463_v10, 0.0  ;;  %v4456_v17 = vadd.f32 %v6408_v0, %v4455_v41 }
 0xf54   : > { %v5647_v18 = vpop.f32.mrf.mxu1 }
 0xf55   : > { %v4961_v50 = vpack.c.bf16 %v4465_v8, %v4465_v8  ;;  %v4464_v22 = vadd.f32 %v5024_v43, %v4456_v17 }
 0xf57   : > { %4475 = vst.msk [vmem:[%s7280_s12 + $0x70] sm:$0xf] %vm1562_vm12, %v4961_v50  ;;  %v4466_v5 = vmax.f32 %v4464_v22, 0.0 }
 0xf59   : > { %v4962_v23 = vpack.c.bf16 %v4466_v5, %v4466_v5 }
 0xf5b   : > { %4476 = vst.msk [vmem:[%s7280_s12 + $0x74] sm:$0xf] %vm1562_vm12, %v4962_v23 }
 0xf62   : > { %v4614_v47 = vpop.f32.mrf.mxu1 }
 0xf63   : > { %v4615_v11 = vadd.f32 %v7866_v44, %v4614_v47 }
 0xf64   : > { %v5660_v26 = vpop.f32.mrf.mxu1 }
 0xf65   : > { %v4621_v13 = vmax.f32 %v4615_v11, 0.0 }
 0xf66   : > { %v4617_v20 = vpop.f32.mrf.mxu1 }
 0xf67   : > { %v4618_v27 = vadd.f32 %v7866_v44, %v4617_v20 }
 0xf68   : > { %v5661_v3 = vpop.f32.mrf.mxu1 }
 0xf69   : > { %v4622_v55 = vmax.f32 %v4618_v27, 0.0 }
 0xf6b   : > { %v4623_v31 = vpack.c.bf16 %v4622_v55, %v4621_v13 }
 0xf6d   : > { %5665 = vmatmul.mubr.msk.bf16.vlgmr.msra.gmra.mxu0 %vm317_vm0, %v4623_v31 }
0x102d   : > { %v4661_v58 = vpop.f32.mrf.mxu0 }
0x102e   : > { %v4662_v34 = vadd.f32 %v6408_v0, %v4661_v58 }
0x102f   : > { %v5666_v35 = vpop.f32.mrf.mxu0 }
0x1030   : > { %v4672_v38 = vadd.f32 %v5027_v52, %v4662_v34 }
0x1031   : > { %v4664_v14 = vpop.f32.mrf.mxu0 }
0x1032   : > { %v4674_v39 = vmax.f32 %v4672_v38, 0.0  ;;  %v4665_v40 = vadd.f32 %v6408_v0, %v4664_v14 }
0x1033   : > { %v5667_v15 = vpop.f32.mrf.mxu0 }
0x1034   : > { %v4963_v44 = vpack.c.bf16 %v4674_v39, %v4674_v39  ;;  %v4673_v25 = vadd.f32 %v5028_v12, %v4665_v40 }
0x1036   : > { %4684 = vst.msk [vmem:[%s7280_s12 + $0x78] sm:$0xf] %vm1562_vm12, %v4963_v44  ;;  %v4675_v21 = vmax.f32 %v4673_v25, 0.0 }
0x1038   : > { %v4964_v45 = vpack.c.bf16 %v4675_v21, %v4675_v21 }
0x103a   : > { %4685 = vst.msk [vmem:[%s7280_s12 + $0x7c] sm:$0xf] %vm1562_vm12, %v4964_v45 }
0x103b PF: > { %p17_p9 = scmp.ge.s32.totalorder %s6548_s29, 4   ;;  %s7988_s24 = smov %s6463_s25 }
0x103c   : > { %s7989_s25 = smov %s6467_s26  ;;  %s7990_s26 = smov %s6558_s9 }
0x103d   : > { %s7991_s27 = smov %s6548_s29  ;;  %19 = sbr.rel (!%p17_p9) target bundleno = 3 (0x3), region = 120 }
0x1042   :  { %4707 = vsyncpa [#allocation4], 1 }
0x1043   :  { %4709 = vsyncpa [#allocation4 + $0x1], 1 }

</bundles_post_ra>
